<compile_context>
chip_gen: v6e
topology: v6e:2x2x1
jax: 0.10.0
libtpu: 0.0.40
codegen_flags: <defaults>
</compile_context>

<pallas_src>
import functools

import jax
import jax.numpy as jnp
from jax.experimental import pallas as pl
from jax.experimental.pallas import tpu as pltpu


_WEIGHT_ORDER = (
    "n1w", "n1b", "W1", "b1", "Wd", "b2", "Wsca", "bsca", "W3", "b3",
    "Wu", "bu", "beta", "gamma", "n2w", "n2b", "W4", "b4", "W5", "b5",
    "n3w", "n3b", "Wqkv", "Wdq", "temp", "Wp",
)


def _tcnn_kernel(
    # inputs: per-batch channel-major frame, interior mask, then weights
    x_ref, mask_ref,
    n1w_ref, n1b_ref, w1_ref, b1_ref, wd_ref, b2_ref,
    wsca_ref, bsca_ref, w3_ref, b3_ref, wu_ref, bu_ref,
    beta_ref, gamma_ref, n2w_ref, n2b_ref, w4_ref, b4_ref,
    w5_ref, b5_ref, n3w_ref, n3b_ref, wqkv_ref, wdq_ref, temp_ref, wp_ref,
    # output
    out_ref,
    # VMEM scratch (margined tap windows)
    st_ref, sq_ref,
    *, H, W, Cin, Cout, K, halo, Wf, NP, M, num_heads, mxu_dtype,
):
    f32 = jnp.float32
    dw = 2 * Cin
    dwh = dw // 2
    inv_hw = 1.0 / float(H * W)
    # tap shifts in the flattened frame; outputs land on the same interior coordinates
    # as the inputs (kernel_size == 2*padding + 1 => symmetric halo).
    shifts_k = [(a - halo) * Wf + (b - halo) for a in range(K) for b in range(K)]
    shifts_3 = [(a - 1) * Wf + (b - 1) for a in range(3) for b in range(3)]

    mask = mask_ref[...]                                            # (1, NP)

    def ln(v, wr, br):
        # NAFNet LayerNorm2d: per-pixel LN over channels (sublane axis), eps=1e-6.
        mu = jnp.mean(v, axis=0, keepdims=True)
        var = jnp.mean((v - mu) * (v - mu), axis=0, keepdims=True)
        return (v - mu) * jax.lax.rsqrt(var + 1e-6) * wr[...] + br[...]

    def mxu(wm, act):
        return jnp.dot(wm.astype(mxu_dtype), act.astype(mxu_dtype),
                       preferred_element_type=f32)

    # Scratch margins are read by the shifted taps (only into halo outputs, which are
    # discarded) but must hold *finite* values so masked reductions stay NaN-free.
    # These are tiny, 128-lane-aligned dense stores.
    st_ref[:, :M] = jnp.zeros((dw, M), f32)
    st_ref[:, M + NP:] = jnp.zeros((dw, M), f32)
    sq_ref[:, :M] = jnp.zeros((3 * Cout, M), f32)
    sq_ref[:, M + NP:] = jnp.zeros((3 * Cout, M), f32)

    # ---- skip branch: convu (stride-1 ConvTranspose2d) as ONE im2col matmul ---------
    patches = jnp.concatenate(
        [x_ref[0, :, M + s: M + s + NP] for s in shifts_k], axis=0)  # (K*K*Cin, NP)
    xb = mxu(wu_ref[...], patches) + bu_ref[...]                     # (Cout, NP)

    # ---- main branch: norm1 -> conv1 (1x1) -------------------------------------------
    x = x_ref[0, :, M: M + NP]                                       # (Cin, NP)
    t = ln(x, n1w_ref, n1b_ref)
    t = mxu(w1_ref[...], t) + b1_ref[...]                            # (dw, NP)

    # ---- conv2: depthwise stride-1 ConvTranspose2d via shifted lane taps -------------
    st_ref[:, M: M + NP] = t * mask      # interior only: halo zeros = conv padding
    wd = wd_ref[...]                                                 # (dw, K*K)
    acc = jnp.zeros((dw, NP), f32)
    for i, s in enumerate(shifts_k):
        acc = acc + st_ref[:, M + s: M + s + NP] * wd[:, i:i + 1]
    t = acc + b2_ref[...]                                            # (dw, NP)

    # ---- SimpleGate -> SCA -> conv3 ---------------------------------------------------
    t = t[:dwh, :] * t[dwh:, :]                                      # (dwh, NP)
    s_vec = jnp.sum(t * mask, axis=1, keepdims=True) * inv_hw        # (dwh, 1)
    s_vec = jnp.dot(wsca_ref[...], s_vec, preferred_element_type=f32) + bsca_ref[...]
    t = t * s_vec
    t = mxu(w3_ref[...], t) + b3_ref[...]                            # (Cout, NP)
    # dropout1 == Identity (drop_out_rate = 0.0)
    y = xb + t * beta_ref[...]

    # ---- FFN: norm2 -> conv4 -> SimpleGate -> conv5 -----------------------------------
    t = ln(y, n2w_ref, n2b_ref)
    t = mxu(w4_ref[...], t) + b4_ref[...]                            # (2*Cout, NP)
    t = t[:Cout, :] * t[Cout:, :]
    t = mxu(w5_ref[...], t) + b5_ref[...]                            # (Cout, NP)
    # dropout2 == Identity
    y = y + t * gamma_ref[...]

    # ---- TransAttention (Restormer-style transposed channel attention) ----------------
    z = ln(y, n3w_ref, n3b_ref)
    qkv = mxu(wqkv_ref[...], z)                                      # (3*Cout, NP)
    sq_ref[:, M: M + NP] = qkv * mask    # zero halo = padding for the 3x3 dw conv
    wdq = wdq_ref[...]                                               # (3*Cout, 9)
    qacc = jnp.zeros((3 * Cout, NP), f32)
    for i, s in enumerate(shifts_3):
        qacc = qacc + sq_ref[:, M + s: M + s + NP] * wdq[:, i:i + 1]
    q_all = qacc[:Cout, :] * mask
    k_all = qacc[Cout:2 * Cout, :] * mask
    v_all = qacc[2 * Cout:, :]

    ch = Cout // num_heads
    heads = []
    for h in range(num_heads):
        qh = q_all[h * ch:(h + 1) * ch, :]                           # (ch, NP)
        kh = k_all[h * ch:(h + 1) * ch, :]
        vh = v_all[h * ch:(h + 1) * ch, :]
        # F.normalize along the spatial axis, per channel
        qn = qh * jax.lax.rsqrt(
            jnp.maximum(jnp.sum(qh * qh, axis=1, keepdims=True), 1e-24))
        kn = kh * jax.lax.rsqrt(
            jnp.maximum(jnp.sum(kh * kh, axis=1, keepdims=True), 1e-24))
        attn = jax.lax.dot_general(qn, kn, (((1,), (1,)), ((), ())),
                                   preferred_element_type=f32)       # (ch, ch)
        attn = attn * temp_ref[h:h + 1, :]
        attn = attn - jnp.max(attn, axis=-1, keepdims=True)
        attn = jnp.exp(attn)
        attn = attn * pl.reciprocal(jnp.sum(attn, axis=-1, keepdims=True), approx=True)
        heads.append(jnp.dot(attn, vh, preferred_element_type=f32))  # (ch, NP)
    a = jnp.concatenate(heads, axis=0)                               # (Cout, NP)
    y = y + mxu(wp_ref[...], a)                                      # project_out

    out_ref[0] = y                                                   # dense (Cout, NP) store


def tcnn_block_forward(x_nchw, P, *, K, pad, num_heads, stride=1,
                       mxu_dtype=jnp.bfloat16):
    """NCHW in / NCHW out wrapper around the fused channel-major Pallas kernel."""
    assert stride == 1, "only stride-1 transposed convolutions are implemented"
    halo = K - 1 - pad
    assert halo == pad and halo >= 1, "requires kernel_size == 2*padding + 1, padding>=1"
    B, Cin, H, W = x_nchw.shape
    Cout = P["Wp"].shape[0]
    assert Cout % num_heads == 0
    dw = 2 * Cin
    Hf, Wf = H + 2 * halo, W + 2 * halo
    NP = (Hf * Wf + 127) // 128 * 128                     # lane-dense flattened frame
    M = (max(halo * Wf + halo, 1) + 127) // 128 * 128     # lane-aligned tap margin
    NPM = NP + 2 * M

    # channel-major, spatially zero-padded, flattened (and lane-margined) input frame
    xp = jnp.pad(x_nchw.astype(jnp.float32),
                 ((0, 0), (0, 0), (halo, halo), (halo, halo)))
    xp = xp.reshape(B, Cin, Hf * Wf)
    x_in = jnp.pad(xp, ((0, 0), (0, 0), (M, NPM - M - Hf * Wf)))

    # interior (non-halo) mask over the flattened frame
    mrow = jnp.zeros((Hf, Wf), jnp.float32).at[halo:halo + H, halo:halo + W].set(1.0)
    mask = jnp.pad(mrow.reshape(1, Hf * Wf), ((0, 0), (0, NP - Hf * Wf)))

    weights = [P[k] for k in _WEIGHT_ORDER]

    def _full(arr):
        nd = arr.ndim
        return pl.BlockSpec(arr.shape, lambda b, nd=nd: (0,) * nd)

    in_specs = [
        pl.BlockSpec((1, Cin, NPM), lambda b: (b, 0, 0)),
        pl.BlockSpec((1, NP), lambda b: (0, 0)),
    ] + [_full(w) for w in weights]

    kernel = functools.partial(
        _tcnn_kernel, H=H, W=W, Cin=Cin, Cout=Cout, K=K, halo=halo,
        Wf=Wf, NP=NP, M=M, num_heads=num_heads, mxu_dtype=mxu_dtype)

    out = pl.pallas_call(
        kernel,
        out_shape=jax.ShapeDtypeStruct((B, Cout, NP), jnp.float32),
        grid_spec=pltpu.PrefetchScalarGridSpec(
            num_scalar_prefetch=0,
            grid=(B,),
            in_specs=in_specs,
            out_specs=pl.BlockSpec((1, Cout, NP), lambda b: (b, 0, 0)),
            scratch_shapes=[
                pltpu.VMEM((dw, NPM), jnp.float32),        # conv2 tap window
                pltpu.VMEM((3 * Cout, NPM), jnp.float32),  # qkv dwconv tap window
            ],
        ),
        # batch items are independent -> let v7x's two TensorCores split the grid
        compiler_params=pltpu.CompilerParams(dimension_semantics=("parallel",)),
    )(x_in, mask, *weights)

    # strip frame halo / lane padding in the wrapper (plain XLA layout plumbing)
    out = out[:, :, :Hf * Wf].reshape(B, Cout, Hf, Wf)[:, :, halo:halo + H, halo:halo + W]
    return out


def init_params(key, in_channels, out_channels, num_heads, kernel_size):
    """Deterministic PyTorch-layout parameters (shapes from tcnn_block.__init__)."""
    C, O, K = in_channels, out_channels, kernel_size
    dw, ffn = 2 * C, 2 * out_channels
    dwh = dw // 2
    ks = iter(jax.random.split(key, 32))

    def w(shape, fan_in):
        return jax.random.normal(next(ks), shape, jnp.float32) / jnp.sqrt(float(fan_in))

    return {
        "conv1_w": w((dw, C, 1, 1), C), "conv1_b": w((dw,), C),
        "conv2_w": w((dw, 1, K, K), K * K), "conv2_b": w((dw,), K * K),
        "conv3_w": w((O, dwh, 1, 1), dwh), "conv3_b": w((O,), dwh),
        "convu_w": w((C, O, K, K), C * K * K), "convu_b": w((O,), C),
        "sca_w": w((dwh, dwh, 1, 1), dwh), "sca_b": w((dwh,), dwh),
        "conv4_w": w((ffn, O, 1, 1), O), "conv4_b": w((ffn,), O),
        "conv5_w": w((O, ffn // 2, 1, 1), ffn // 2), "conv5_b": w((O,), ffn // 2),
        "norm1_w": 1.0 + 0.1 * w((C,), 1), "norm1_b": 0.1 * w((C,), 1),
        "norm2_w": 1.0 + 0.1 * w((O,), 1), "norm2_b": 0.1 * w((O,), 1),
        "norm3_w": 1.0 + 0.1 * w((O,), 1), "norm3_b": 0.1 * w((O,), 1),
        # beta/gamma are nn.Parameter zeros in the module; random here so both residual
        # scaling paths are actually exercised (still deterministic).
        "beta": 0.5 * w((1, O, 1, 1), 1),
        "gamma": 0.5 * w((1, O, 1, 1), 1),
        "qkv_w": w((3 * O, O, 1, 1), O),
        "qkv_dw_w": w((3 * O, 1, 3, 3), 9),
        "temperature": 1.0 + 0.1 * w((num_heads, 1, 1), 1),
        "proj_w": w((O, O, 1, 1), O),
    }


def prep_weights(p, in_channels, out_channels, num_heads, kernel_size,
                 mxu_dtype=jnp.bfloat16):
    """PyTorch layout -> channel-major kernel layout.

    Matmul weights are shipped in the MXU dtype (bf16 by default); biases / norm /
    depthwise-tap / SCA weights stay f32 (VPU path).
    """
    C, O, K = in_channels, out_channels, kernel_size
    dw = 2 * C

    def col(v):
        return v.reshape(-1, 1).astype(jnp.float32)

    P = {}
    P["n1w"], P["n1b"] = col(p["norm1_w"]), col(p["norm1_b"])
    P["W1"], P["b1"] = p["conv1_w"][:, :, 0, 0].astype(mxu_dtype), col(p["conv1_b"])
    # stride-1 ConvTranspose2d == conv over (K-1-pad)-padded input with flipped kernel
    P["Wd"] = p["conv2_w"][:, 0, ::-1, ::-1].reshape(dw, K * K).astype(jnp.float32)
    P["b2"] = col(p["conv2_b"])
    P["Wsca"], P["bsca"] = p["sca_w"][:, :, 0, 0].astype(jnp.float32), col(p["sca_b"])
    P["W3"], P["b3"] = p["conv3_w"][:, :, 0, 0].astype(mxu_dtype), col(p["conv3_b"])
    # skip-branch ConvTranspose2d as an im2col matrix: Wu[o, (a*K+b)*C + i]
    wu = jnp.transpose(p["convu_w"][:, :, ::-1, ::-1], (2, 3, 0, 1))   # (K, K, C, O)
    P["Wu"] = wu.reshape(K * K * C, O).T.astype(mxu_dtype)
    P["bu"] = col(p["convu_b"])
    P["beta"], P["gamma"] = col(p["beta"]), col(p["gamma"])
    P["n2w"], P["n2b"] = col(p["norm2_w"]), col(p["norm2_b"])
    P["W4"], P["b4"] = p["conv4_w"][:, :, 0, 0].astype(mxu_dtype), col(p["conv4_b"])
    P["W5"], P["b5"] = p["conv5_w"][:, :, 0, 0].astype(mxu_dtype), col(p["conv5_b"])
    P["n3w"], P["n3b"] = col(p["norm3_w"]), col(p["norm3_b"])
    P["Wqkv"] = p["qkv_w"][:, :, 0, 0].astype(mxu_dtype)
    P["Wdq"] = p["qkv_dw_w"][:, 0].reshape(3 * O, 9).astype(jnp.float32)  # regular conv: no flip
    P["temp"] = p["temperature"].reshape(num_heads, 1).astype(jnp.float32)
    P["Wp"] = p["proj_w"][:, :, 0, 0].astype(mxu_dtype)
    return P


def reference_forward(x_nchw, P, *, Cin, Cout, K, pad, num_heads):
    """Pure-JAX (non-Pallas) f32 reference mirroring the PyTorch forward."""
    B, _, H, W = x_nchw.shape
    dwh = Cin
    q = K - 1 - pad
    x = x_nchw.astype(jnp.float32)

    def ln(t, wv, bv):
        mu = jnp.mean(t, axis=1, keepdims=True)
        var = jnp.mean((t - mu) ** 2, axis=1, keepdims=True)
        return ((t - mu) / jnp.sqrt(var + 1e-6) * wv.reshape(1, -1, 1, 1)
                + bv.reshape(1, -1, 1, 1))

    def conv1x1(t, Wm, bv=None):
        y = jnp.einsum("bchw,oc->bohw", t, Wm.astype(jnp.float32))
        return y if bv is None else y + bv.reshape(1, -1, 1, 1)

    def dwconv(t, Wtap, kk, qq):
        tp = jnp.pad(t, ((0, 0), (0, 0), (qq, qq), (qq, qq)))
        acc = jnp.zeros_like(t)
        for a in range(kk):
            for b in range(kk):
                acc = acc + tp[:, :, a:a + H, b:b + W] * Wtap[:, a * kk + b].reshape(1, -1, 1, 1)
        return acc

    def full_convT(t, Wmat, bv):
        tp = jnp.pad(t, ((0, 0), (0, 0), (q, q), (q, q)))
        Wr = Wmat.astype(jnp.float32).reshape(Cout, K, K, Cin)
        acc = jnp.zeros((B, Cout, H, W), jnp.float32)
        for a in range(K):
            for b in range(K):
                acc = acc + jnp.einsum("bchw,oc->bohw", tp[:, :, a:a + H, b:b + W], Wr[:, a, b, :])
        return acc + bv.reshape(1, -1, 1, 1)

    xb = full_convT(x, P["Wu"], P["bu"])
    t = ln(x, P["n1w"], P["n1b"])
    t = conv1x1(t, P["W1"], P["b1"])
    t = dwconv(t, P["Wd"], K, q) + P["b2"].reshape(1, -1, 1, 1)
    t = t[:, :dwh] * t[:, dwh:]
    s = jnp.mean(t, axis=(2, 3), keepdims=True)
    s = jnp.einsum("bchw,oc->bohw", s, P["Wsca"]) + P["bsca"].reshape(1, -1, 1, 1)
    t = t * s
    t = conv1x1(t, P["W3"], P["b3"])
    y = xb + t * P["beta"].reshape(1, -1, 1, 1)

    t = conv1x1(ln(y, P["n2w"], P["n2b"]), P["W4"], P["b4"])
    t = t[:, :Cout] * t[:, Cout:]
    t = conv1x1(t, P["W5"], P["b5"])
    y = y + t * P["gamma"].reshape(1, -1, 1, 1)

    z = ln(y, P["n3w"], P["n3b"])
    qkv = conv1x1(z, P["Wqkv"])
    qkv = dwconv(qkv, P["Wdq"], 3, 1)
    qkv = qkv.reshape(B, 3 * Cout, H * W)
    q_all, k_all, v_all = qkv[:, :Cout], qkv[:, Cout:2 * Cout], qkv[:, 2 * Cout:]
    ch = Cout // num_heads
    heads = []
    for h in range(num_heads):
        qh = q_all[:, h * ch:(h + 1) * ch]
        kh = k_all[:, h * ch:(h + 1) * ch]
        vh = v_all[:, h * ch:(h + 1) * ch]
        qn = qh / jnp.maximum(jnp.linalg.norm(qh, axis=-1, keepdims=True), 1e-12)
        kn = kh / jnp.maximum(jnp.linalg.norm(kh, axis=-1, keepdims=True), 1e-12)
        attn = jnp.einsum("bcn,bdn->bcd", qn, kn) * P["temp"][h, 0]
        attn = jax.nn.softmax(attn, axis=-1)
        heads.append(jnp.einsum("bcd,bdn->bcn", attn, vh))
    a = jnp.concatenate(heads, axis=1)
    a = jnp.einsum("oc,bcn->bon", P["Wp"].astype(jnp.float32), a).reshape(B, Cout, H, W)
    return y + a


if __name__ == "__main__":
    B, Cin, Cout = 2, 4, 8
    H = W = 16
    num_heads = 2
    kernel_size, stride, padding = 3, 1, 1   # stride-1 ConvTranspose2d, same spatial size

    key = jax.random.PRNGKey(0)
    kx, kp = jax.random.split(key)
    x = jax.random.normal(kx, (B, Cin, H, W), jnp.float32)

    torch_layout_params = init_params(kp, Cin, Cout, num_heads, kernel_size)
    P = prep_weights(torch_layout_params, Cin, Cout, num_heads, kernel_size)

    ref = reference_forward(x, P, Cin=Cin, Cout=Cout, K=kernel_size,
                            pad=padding, num_heads=num_heads)

    # Structural validation with exact-f32 MXU operands: only op-ordering / approximate-
    # reciprocal noise should remain (real layout/arithmetic bugs show up as >1e-1).
    out_f32 = jax.block_until_ready(
        tcnn_block_forward(x, P, K=kernel_size, pad=padding, num_heads=num_heads,
                           stride=stride, mxu_dtype=jnp.float32))
    err_f32 = float(jnp.max(jnp.abs(out_f32 - ref)))
    assert err_f32 < 1e-2, f"f32-MXU Pallas kernel mismatch vs reference: {err_f32}"

    # Delivered configuration: bf16 MXU operands with f32 accumulation (looser, bf16-
    # appropriate tolerance vs the pure-f32 reference).
    out = jax.block_until_ready(
        tcnn_block_forward(x, P, K=kernel_size, pad=padding, num_heads=num_heads,
                           stride=stride))
    err = float(jnp.max(jnp.abs(out - ref)))

    assert out.shape == (B, Cout, H, W), out.shape
    assert bool(jnp.all(jnp.isfinite(out)))
    assert err < 5e-2, f"bf16-MXU Pallas kernel mismatch vs reference: {err}"
    print("KERNEL_OK")
</pallas_src>

<mosaic_0001>
module attributes {stable_mosaic.version = 11 : i64} {
  func.func @_tcnn_kernel(%arg0: i32, %arg1: memref<1x4x640xf32, #tpu.memory_space<vmem>>, %arg2: memref<1x384xf32, #tpu.memory_space<vmem>>, %arg3: memref<4x1xf32, #tpu.memory_space<vmem>>, %arg4: memref<4x1xf32, #tpu.memory_space<vmem>>, %arg5: memref<8x4xbf16, #tpu.memory_space<vmem>>, %arg6: memref<8x1xf32, #tpu.memory_space<vmem>>, %arg7: memref<8x9xf32, #tpu.memory_space<vmem>>, %arg8: memref<8x1xf32, #tpu.memory_space<vmem>>, %arg9: memref<4x4xf32, #tpu.memory_space<vmem>>, %arg10: memref<4x1xf32, #tpu.memory_space<vmem>>, %arg11: memref<8x4xbf16, #tpu.memory_space<vmem>>, %arg12: memref<8x1xf32, #tpu.memory_space<vmem>>, %arg13: memref<8x36xbf16, #tpu.memory_space<vmem>>, %arg14: memref<8x1xf32, #tpu.memory_space<vmem>>, %arg15: memref<8x1xf32, #tpu.memory_space<vmem>>, %arg16: memref<8x1xf32, #tpu.memory_space<vmem>>, %arg17: memref<8x1xf32, #tpu.memory_space<vmem>>, %arg18: memref<8x1xf32, #tpu.memory_space<vmem>>, %arg19: memref<16x8xbf16, #tpu.memory_space<vmem>>, %arg20: memref<16x1xf32, #tpu.memory_space<vmem>>, %arg21: memref<8x8xbf16, #tpu.memory_space<vmem>>, %arg22: memref<8x1xf32, #tpu.memory_space<vmem>>, %arg23: memref<8x1xf32, #tpu.memory_space<vmem>>, %arg24: memref<8x1xf32, #tpu.memory_space<vmem>>, %arg25: memref<24x8xbf16, #tpu.memory_space<vmem>>, %arg26: memref<24x9xf32, #tpu.memory_space<vmem>>, %arg27: memref<2x1xf32, #tpu.memory_space<vmem>>, %arg28: memref<8x8xbf16, #tpu.memory_space<vmem>>, %arg29: memref<1x8x384xf32, #tpu.memory_space<vmem>>, %arg30: memref<8x640xf32, #tpu.memory_space<vmem>>, %arg31: memref<24x640xf32, #tpu.memory_space<vmem>>) attributes {dimension_semantics = [#tpu.dimension_semantics<parallel>], iteration_bounds = array<i64: 2>, scalar_prefetch = 0 : i64, scratch_operands = 2 : i64, tpu.core_type = #tpu.core_type<tc>, window_params = [{transform_indices = @transform_0, window_bounds = array<i64: 1, 4, 640>}, {pipeline_mode = #tpu.pipeline_mode<synchronous>, transform_indices = @transform_1, window_bounds = array<i64: 1, 384>}, {pipeline_mode = #tpu.pipeline_mode<synchronous>, transform_indices = @transform_2, window_bounds = array<i64: 4, 1>}, {pipeline_mode = #tpu.pipeline_mode<synchronous>, transform_indices = @transform_3, window_bounds = array<i64: 4, 1>}, {pipeline_mode = #tpu.pipeline_mode<synchronous>, transform_indices = @transform_4, window_bounds = array<i64: 8, 4>}, {pipeline_mode = #tpu.pipeline_mode<synchronous>, transform_indices = @transform_5, window_bounds = array<i64: 8, 1>}, {pipeline_mode = #tpu.pipeline_mode<synchronous>, transform_indices = @transform_6, window_bounds = array<i64: 8, 9>}, {pipeline_mode = #tpu.pipeline_mode<synchronous>, transform_indices = @transform_7, window_bounds = array<i64: 8, 1>}, {pipeline_mode = #tpu.pipeline_mode<synchronous>, transform_indices = @transform_8, window_bounds = array<i64: 4, 4>}, {pipeline_mode = #tpu.pipeline_mode<synchronous>, transform_indices = @transform_9, window_bounds = array<i64: 4, 1>}, {pipeline_mode = #tpu.pipeline_mode<synchronous>, transform_indices = @transform_10, window_bounds = array<i64: 8, 4>}, {pipeline_mode = #tpu.pipeline_mode<synchronous>, transform_indices = @transform_11, window_bounds = array<i64: 8, 1>}, {pipeline_mode = #tpu.pipeline_mode<synchronous>, transform_indices = @transform_12, window_bounds = array<i64: 8, 36>}, {pipeline_mode = #tpu.pipeline_mode<synchronous>, transform_indices = @transform_13, window_bounds = array<i64: 8, 1>}, {pipeline_mode = #tpu.pipeline_mode<synchronous>, transform_indices = @transform_14, window_bounds = array<i64: 8, 1>}, {pipeline_mode = #tpu.pipeline_mode<synchronous>, transform_indices = @transform_15, window_bounds = array<i64: 8, 1>}, {pipeline_mode = #tpu.pipeline_mode<synchronous>, transform_indices = @transform_16, window_bounds = array<i64: 8, 1>}, {pipeline_mode = #tpu.pipeline_mode<synchronous>, transform_indices = @transform_17, window_bounds = array<i64: 8, 1>}, {pipeline_mode = #tpu.pipeline_mode<synchronous>, transform_indices = @transform_18, window_bounds = array<i64: 16, 8>}, {pipeline_mode = #tpu.pipeline_mode<synchronous>, transform_indices = @transform_19, window_bounds = array<i64: 16, 1>}, {pipeline_mode = #tpu.pipeline_mode<synchronous>, transform_indices = @transform_20, window_bounds = array<i64: 8, 8>}, {pipeline_mode = #tpu.pipeline_mode<synchronous>, transform_indices = @transform_21, window_bounds = array<i64: 8, 1>}, {pipeline_mode = #tpu.pipeline_mode<synchronous>, transform_indices = @transform_22, window_bounds = array<i64: 8, 1>}, {pipeline_mode = #tpu.pipeline_mode<synchronous>, transform_indices = @transform_23, window_bounds = array<i64: 8, 1>}, {pipeline_mode = #tpu.pipeline_mode<synchronous>, transform_indices = @transform_24, window_bounds = array<i64: 24, 8>}, {pipeline_mode = #tpu.pipeline_mode<synchronous>, transform_indices = @transform_25, window_bounds = array<i64: 24, 9>}, {pipeline_mode = #tpu.pipeline_mode<synchronous>, transform_indices = @transform_26, window_bounds = array<i64: 2, 1>}, {pipeline_mode = #tpu.pipeline_mode<synchronous>, transform_indices = @transform_27, window_bounds = array<i64: 8, 8>}, {transform_indices = @transform_28, window_bounds = array<i64: 1, 8, 384>}]} {
    %c0 = arith.constant 0 : index
    %c0_0 = arith.constant 0 : index
    %0 = vector.load %arg2[%c0, %c0_0] : memref<1x384xf32, #tpu.memory_space<vmem>>, vector<1x384xf32>
    %cst = arith.constant 0.000000e+00 : f32
    %1 = vector.broadcast %cst : f32 to vector<8x128xf32>
    %c0_1 = arith.constant 0 : index
    %c0_2 = arith.constant 0 : index
    %2 = vector.load %arg30[%c0_1, %c0_2] : memref<8x640xf32, #tpu.memory_space<vmem>>, vector<8x128xf32>
    tpu.vector_store %arg30[%c0_1, %c0_2], %1 {strides = array<i32>} : memref<8x640xf32, #tpu.memory_space<vmem>>, vector<8x128xf32>,
    %cst_3 = arith.constant 0.000000e+00 : f32
    %3 = vector.broadcast %cst_3 : f32 to vector<8x128xf32>
    %c0_4 = arith.constant 0 : index
    %c512 = arith.constant 512 : index
    %4 = vector.load %arg30[%c0_4, %c512] : memref<8x640xf32, #tpu.memory_space<vmem>>, vector<8x128xf32>
    tpu.vector_store %arg30[%c0_4, %c512], %3 {strides = array<i32>} : memref<8x640xf32, #tpu.memory_space<vmem>>, vector<8x128xf32>,
    %cst_5 = arith.constant 0.000000e+00 : f32
    %5 = vector.broadcast %cst_5 : f32 to vector<24x128xf32>
    %c0_6 = arith.constant 0 : index
    %c0_7 = arith.constant 0 : index
    %6 = vector.load %arg31[%c0_6, %c0_7] : memref<24x640xf32, #tpu.memory_space<vmem>>, vector<24x128xf32>
    tpu.vector_store %arg31[%c0_6, %c0_7], %5 {strides = array<i32>} : memref<24x640xf32, #tpu.memory_space<vmem>>, vector<24x128xf32>,
    %cst_8 = arith.constant 0.000000e+00 : f32
    %7 = vector.broadcast %cst_8 : f32 to vector<24x128xf32>
    %c0_9 = arith.constant 0 : index
    %c512_10 = arith.constant 512 : index
    %8 = vector.load %arg31[%c0_9, %c512_10] : memref<24x640xf32, #tpu.memory_space<vmem>>, vector<24x128xf32>
    tpu.vector_store %arg31[%c0_9, %c512_10], %7 {strides = array<i32>} : memref<24x640xf32, #tpu.memory_space<vmem>>, vector<24x128xf32>,
    %c0_11 = arith.constant 0 : index
    %c0_12 = arith.constant 0 : index
    %c109 = arith.constant 109 : index
    %9 = vector.load %arg1[%c0_11, %c0_12, %c109] : memref<1x4x640xf32, #tpu.memory_space<vmem>>, vector<1x4x384xf32>
    %10 = vector.shape_cast %9 : vector<1x4x384xf32> to vector<4x384xf32>
    %c0_13 = arith.constant 0 : index
    %c0_14 = arith.constant 0 : index
    %c110 = arith.constant 110 : index
    %11 = vector.load %arg1[%c0_13, %c0_14, %c110] : memref<1x4x640xf32, #tpu.memory_space<vmem>>, vector<1x4x384xf32>
    %12 = vector.shape_cast %11 : vector<1x4x384xf32> to vector<4x384xf32>
    %c0_15 = arith.constant 0 : index
    %c0_16 = arith.constant 0 : index
    %c111 = arith.constant 111 : index
    %13 = vector.load %arg1[%c0_15, %c0_16, %c111] : memref<1x4x640xf32, #tpu.memory_space<vmem>>, vector<1x4x384xf32>
    %14 = vector.shape_cast %13 : vector<1x4x384xf32> to vector<4x384xf32>
    %c0_17 = arith.constant 0 : index
    %c0_18 = arith.constant 0 : index
    %c127 = arith.constant 127 : index
    %15 = vector.load %arg1[%c0_17, %c0_18, %c127] : memref<1x4x640xf32, #tpu.memory_space<vmem>>, vector<1x4x384xf32>
    %16 = vector.shape_cast %15 : vector<1x4x384xf32> to vector<4x384xf32>
    %c0_19 = arith.constant 0 : index
    %c0_20 = arith.constant 0 : index
    %c128 = arith.constant 128 : index
    %17 = vector.load %arg1[%c0_19, %c0_20, %c128] : memref<1x4x640xf32, #tpu.memory_space<vmem>>, vector<1x4x384xf32>
    %18 = vector.shape_cast %17 : vector<1x4x384xf32> to vector<4x384xf32>
    %c0_21 = arith.constant 0 : index
    %c0_22 = arith.constant 0 : index
    %c129 = arith.constant 129 : index
    %19 = vector.load %arg1[%c0_21, %c0_22, %c129] : memref<1x4x640xf32, #tpu.memory_space<vmem>>, vector<1x4x384xf32>
    %20 = vector.shape_cast %19 : vector<1x4x384xf32> to vector<4x384xf32>
    %c0_23 = arith.constant 0 : index
    %c0_24 = arith.constant 0 : index
    %c145 = arith.constant 145 : index
    %21 = vector.load %arg1[%c0_23, %c0_24, %c145] : memref<1x4x640xf32, #tpu.memory_space<vmem>>, vector<1x4x384xf32>
    %22 = vector.shape_cast %21 : vector<1x4x384xf32> to vector<4x384xf32>
    %c0_25 = arith.constant 0 : index
    %c0_26 = arith.constant 0 : index
    %c146 = arith.constant 146 : index
    %23 = vector.load %arg1[%c0_25, %c0_26, %c146] : memref<1x4x640xf32, #tpu.memory_space<vmem>>, vector<1x4x384xf32>
    %24 = vector.shape_cast %23 : vector<1x4x384xf32> to vector<4x384xf32>
    %c0_27 = arith.constant 0 : index
    %c0_28 = arith.constant 0 : index
    %c147 = arith.constant 147 : index
    %25 = vector.load %arg1[%c0_27, %c0_28, %c147] : memref<1x4x640xf32, #tpu.memory_space<vmem>>, vector<1x4x384xf32>
    %26 = vector.shape_cast %25 : vector<1x4x384xf32> to vector<4x384xf32>
    %27 = tpu.concatenate %10, %12, %14, %16, %18, %20, %22, %24, %26 in 0 : vector<4x384xf32>, vector<4x384xf32>, vector<4x384xf32>, vector<4x384xf32>, vector<4x384xf32>, vector<4x384xf32>, vector<4x384xf32>, vector<4x384xf32>, vector<4x384xf32> -> vector<36x384xf32>
    %c0_29 = arith.constant 0 : index
    %c0_30 = arith.constant 0 : index
    %28 = vector.load %arg13[%c0_29, %c0_30] : memref<8x36xbf16, #tpu.memory_space<vmem>>, vector<8x36xbf16>
    %29 = arith.extf %28 : vector<8x36xbf16> to vector<8x36xf32>
    %cst_31 = arith.constant dense<0.000000e+00> : vector<8x384xf32>
    %30 = tpu.matmul %29, %27, %cst_31 {dimension_numbers = #tpu.dot_dimension_numbers<[1], [0], [0], [1], [0, 0, 1, 1], [], []>} : vector<8x36xf32>, vector<36x384xf32>, vector<8x384xf32> -> vector<8x384xf32>
    %c0_32 = arith.constant 0 : index
    %c0_33 = arith.constant 0 : index
    %31 = vector.load %arg14[%c0_32, %c0_33] : memref<8x1xf32, #tpu.memory_space<vmem>>, vector<8x1xf32>
    %32 = vector.broadcast %31 : vector<8x1xf32> to vector<8x384xf32>
    %33 = arith.addf %30, %32 : vector<8x384xf32>
    %c0_34 = arith.constant 0 : index
    %c0_35 = arith.constant 0 : index
    %c128_36 = arith.constant 128 : index
    %34 = vector.load %arg1[%c0_34, %c0_35, %c128_36] : memref<1x4x640xf32, #tpu.memory_space<vmem>>, vector<1x4x384xf32>
    %35 = vector.shape_cast %34 : vector<1x4x384xf32> to vector<4x384xf32>
    %cst_37 = arith.constant dense<0.000000e+00> : vector<384xf32>
    %36 = vector.multi_reduction <add>, %35, %cst_37 [0] : vector<4x384xf32> to vector<384xf32>
    %37 = vector.shape_cast %36 : vector<384xf32> to vector<1x384xf32>
    %cst_38 = arith.constant 4.000000e+00 : f32
    %38 = vector.broadcast %cst_38 : f32 to vector<1x384xf32>
    %39 = arith.divf %37, %38 : vector<1x384xf32>
    %40 = vector.broadcast %39 : vector<1x384xf32> to vector<4x384xf32>
    %41 = arith.subf %35, %40 : vector<4x384xf32>
    %42 = vector.broadcast %39 : vector<1x384xf32> to vector<4x384xf32>
    %43 = arith.subf %35, %42 : vector<4x384xf32>
    %44 = arith.mulf %41, %43 : vector<4x384xf32>
    %cst_39 = arith.constant dense<0.000000e+00> : vector<384xf32>
    %45 = vector.multi_reduction <add>, %44, %cst_39 [0] : vector<4x384xf32> to vector<384xf32>
    %46 = vector.shape_cast %45 : vector<384xf32> to vector<1x384xf32>
    %cst_40 = arith.constant 4.000000e+00 : f32
    %47 = vector.broadcast %cst_40 : f32 to vector<1x384xf32>
    %48 = arith.divf %46, %47 : vector<1x384xf32>
    %49 = vector.broadcast %39 : vector<1x384xf32> to vector<4x384xf32>
    %50 = arith.subf %35, %49 : vector<4x384xf32>
    %cst_41 = arith.constant 9.99999997E-7 : f32
    %51 = vector.broadcast %cst_41 : f32 to vector<1x384xf32>
    %52 = arith.addf %48, %51 : vector<1x384xf32>
    %53 = math.rsqrt %52 : vector<1x384xf32>
    %54 = vector.broadcast %53 : vector<1x384xf32> to vector<4x384xf32>
    %55 = arith.mulf %50, %54 : vector<4x384xf32>
    %c0_42 = arith.constant 0 : index
    %c0_43 = arith.constant 0 : index
    %56 = vector.load %arg3[%c0_42, %c0_43] : memref<4x1xf32, #tpu.memory_space<vmem>>, vector<4x1xf32>
    %57 = vector.broadcast %56 : vector<4x1xf32> to vector<4x384xf32>
    %58 = arith.mulf %55, %57 : vector<4x384xf32>
    %c0_44 = arith.constant 0 : index
    %c0_45 = arith.constant 0 : index
    %59 = vector.load %arg4[%c0_44, %c0_45] : memref<4x1xf32, #tpu.memory_space<vmem>>, vector<4x1xf32>
    %60 = vector.broadcast %59 : vector<4x1xf32> to vector<4x384xf32>
    %61 = arith.addf %58, %60 : vector<4x384xf32>
    %c0_46 = arith.constant 0 : index
    %c0_47 = arith.constant 0 : index
    %62 = vector.load %arg5[%c0_46, %c0_47] : memref<8x4xbf16, #tpu.memory_space<vmem>>, vector<8x4xbf16>
    %63 = arith.extf %62 : vector<8x4xbf16> to vector<8x4xf32>
    %cst_48 = arith.constant dense<0.000000e+00> : vector<8x384xf32>
    %64 = tpu.matmul %63, %61, %cst_48 {dimension_numbers = #tpu.dot_dimension_numbers<[1], [0], [0], [1], [0, 0, 1, 1], [], []>} : vector<8x4xf32>, vector<4x384xf32>, vector<8x384xf32> -> vector<8x384xf32>
    %c0_49 = arith.constant 0 : index
    %c0_50 = arith.constant 0 : index
    %65 = vector.load %arg6[%c0_49, %c0_50] : memref<8x1xf32, #tpu.memory_space<vmem>>, vector<8x1xf32>
    %66 = vector.broadcast %65 : vector<8x1xf32> to vector<8x384xf32>
    %67 = arith.addf %64, %66 : vector<8x384xf32>
    %68 = vector.broadcast %0 : vector<1x384xf32> to vector<8x384xf32>
    %69 = arith.mulf %67, %68 : vector<8x384xf32>
    %c0_51 = arith.constant 0 : index
    %c128_52 = arith.constant 128 : index
    %70 = vector.load %arg30[%c0_51, %c128_52] : memref<8x640xf32, #tpu.memory_space<vmem>>, vector<8x384xf32>
    tpu.vector_store %arg30[%c0_51, %c128_52], %69 {strides = array<i32>} : memref<8x640xf32, #tpu.memory_space<vmem>>, vector<8x384xf32>,
    %c0_53 = arith.constant 0 : index
    %c0_54 = arith.constant 0 : index
    %71 = vector.load %arg7[%c0_53, %c0_54] : memref<8x9xf32, #tpu.memory_space<vmem>>, vector<8x9xf32>
    %cst_55 = arith.constant 0.000000e+00 : f32
    %72 = vector.broadcast %cst_55 : f32 to vector<8x384xf32>
    %c0_56 = arith.constant 0 : index
    %c109_57 = arith.constant 109 : index
    %73 = vector.load %arg30[%c0_56, %c109_57] : memref<8x640xf32, #tpu.memory_space<vmem>>, vector<8x384xf32>
    %74 = vector.extract_strided_slice %71 {offsets = [0, 0], sizes = [8, 1], strides = [1, 1]} : vector<8x9xf32> to vector<8x1xf32>
    %75 = vector.broadcast %74 : vector<8x1xf32> to vector<8x384xf32>
    %76 = arith.mulf %73, %75 : vector<8x384xf32>
    %77 = arith.addf %72, %76 : vector<8x384xf32>
    %c0_58 = arith.constant 0 : index
    %c110_59 = arith.constant 110 : index
    %78 = vector.load %arg30[%c0_58, %c110_59] : memref<8x640xf32, #tpu.memory_space<vmem>>, vector<8x384xf32>
    %79 = vector.extract_strided_slice %71 {offsets = [0, 1], sizes = [8, 1], strides = [1, 1]} : vector<8x9xf32> to vector<8x1xf32>
    %80 = vector.broadcast %79 : vector<8x1xf32> to vector<8x384xf32>
    %81 = arith.mulf %78, %80 : vector<8x384xf32>
    %82 = arith.addf %77, %81 : vector<8x384xf32>
    %c0_60 = arith.constant 0 : index
    %c111_61 = arith.constant 111 : index
    %83 = vector.load %arg30[%c0_60, %c111_61] : memref<8x640xf32, #tpu.memory_space<vmem>>, vector<8x384xf32>
    %84 = vector.extract_strided_slice %71 {offsets = [0, 2], sizes = [8, 1], strides = [1, 1]} : vector<8x9xf32> to vector<8x1xf32>
    %85 = vector.broadcast %84 : vector<8x1xf32> to vector<8x384xf32>
    %86 = arith.mulf %83, %85 : vector<8x384xf32>
    %87 = arith.addf %82, %86 : vector<8x384xf32>
    %c0_62 = arith.constant 0 : index
    %c127_63 = arith.constant 127 : index
    %88 = vector.load %arg30[%c0_62, %c127_63] : memref<8x640xf32, #tpu.memory_space<vmem>>, vector<8x384xf32>
    %89 = vector.extract_strided_slice %71 {offsets = [0, 3], sizes = [8, 1], strides = [1, 1]} : vector<8x9xf32> to vector<8x1xf32>
    %90 = vector.broadcast %89 : vector<8x1xf32> to vector<8x384xf32>
    %91 = arith.mulf %88, %90 : vector<8x384xf32>
    %92 = arith.addf %87, %91 : vector<8x384xf32>
    %c0_64 = arith.constant 0 : index
    %c128_65 = arith.constant 128 : index
    %93 = vector.load %arg30[%c0_64, %c128_65] : memref<8x640xf32, #tpu.memory_space<vmem>>, vector<8x384xf32>
    %94 = vector.extract_strided_slice %71 {offsets = [0, 4], sizes = [8, 1], strides = [1, 1]} : vector<8x9xf32> to vector<8x1xf32>
    %95 = vector.broadcast %94 : vector<8x1xf32> to vector<8x384xf32>
    %96 = arith.mulf %93, %95 : vector<8x384xf32>
    %97 = arith.addf %92, %96 : vector<8x384xf32>
    %c0_66 = arith.constant 0 : index
    %c129_67 = arith.constant 129 : index
    %98 = vector.load %arg30[%c0_66, %c129_67] : memref<8x640xf32, #tpu.memory_space<vmem>>, vector<8x384xf32>
    %99 = vector.extract_strided_slice %71 {offsets = [0, 5], sizes = [8, 1], strides = [1, 1]} : vector<8x9xf32> to vector<8x1xf32>
    %100 = vector.broadcast %99 : vector<8x1xf32> to vector<8x384xf32>
    %101 = arith.mulf %98, %100 : vector<8x384xf32>
    %102 = arith.addf %97, %101 : vector<8x384xf32>
    %c0_68 = arith.constant 0 : index
    %c145_69 = arith.constant 145 : index
    %103 = vector.load %arg30[%c0_68, %c145_69] : memref<8x640xf32, #tpu.memory_space<vmem>>, vector<8x384xf32>
    %104 = vector.extract_strided_slice %71 {offsets = [0, 6], sizes = [8, 1], strides = [1, 1]} : vector<8x9xf32> to vector<8x1xf32>
    %105 = vector.broadcast %104 : vector<8x1xf32> to vector<8x384xf32>
    %106 = arith.mulf %103, %105 : vector<8x384xf32>
    %107 = arith.addf %102, %106 : vector<8x384xf32>
    %c0_70 = arith.constant 0 : index
    %c146_71 = arith.constant 146 : index
    %108 = vector.load %arg30[%c0_70, %c146_71] : memref<8x640xf32, #tpu.memory_space<vmem>>, vector<8x384xf32>
    %109 = vector.extract_strided_slice %71 {offsets = [0, 7], sizes = [8, 1], strides = [1, 1]} : vector<8x9xf32> to vector<8x1xf32>
    %110 = vector.broadcast %109 : vector<8x1xf32> to vector<8x384xf32>
    %111 = arith.mulf %108, %110 : vector<8x384xf32>
    %112 = arith.addf %107, %111 : vector<8x384xf32>
    %c0_72 = arith.constant 0 : index
    %c147_73 = arith.constant 147 : index
    %113 = vector.load %arg30[%c0_72, %c147_73] : memref<8x640xf32, #tpu.memory_space<vmem>>, vector<8x384xf32>
    %114 = vector.extract_strided_slice %71 {offsets = [0, 8], sizes = [8, 1], strides = [1, 1]} : vector<8x9xf32> to vector<8x1xf32>
    %115 = vector.broadcast %114 : vector<8x1xf32> to vector<8x384xf32>
    %116 = arith.mulf %113, %115 : vector<8x384xf32>
    %117 = arith.addf %112, %116 : vector<8x384xf32>
    %c0_74 = arith.constant 0 : index
    %c0_75 = arith.constant 0 : index
    %118 = vector.load %arg8[%c0_74, %c0_75] : memref<8x1xf32, #tpu.memory_space<vmem>>, vector<8x1xf32>
    %119 = vector.broadcast %118 : vector<8x1xf32> to vector<8x384xf32>
    %120 = arith.addf %117, %119 : vector<8x384xf32>
    %121 = vector.extract_strided_slice %120 {offsets = [0, 0], sizes = [4, 384], strides = [1, 1]} : vector<8x384xf32> to vector<4x384xf32>
    %122 = vector.extract_strided_slice %120 {offsets = [4, 0], sizes = [4, 384], strides = [1, 1]} : vector<8x384xf32> to vector<4x384xf32>
    %123 = arith.mulf %121, %122 : vector<4x384xf32>
    %124 = vector.broadcast %0 : vector<1x384xf32> to vector<4x384xf32>
    %125 = arith.mulf %123, %124 : vector<4x384xf32>
    %cst_76 = arith.constant dense<0.000000e+00> : vector<4xf32>
    %126 = vector.multi_reduction <add>, %125, %cst_76 [1] : vector<4x384xf32> to vector<4xf32>
    %127 = vector.shape_cast %126 : vector<4xf32> to vector<4x1xf32>
    %cst_77 = arith.constant 3.906250e-03 : f32
    %128 = vector.broadcast %cst_77 : f32 to vector<4x1xf32>
    %129 = arith.mulf %127, %128 : vector<4x1xf32>
    %c0_78 = arith.constant 0 : index
    %c0_79 = arith.constant 0 : index
    %130 = vector.load %arg9[%c0_78, %c0_79] : memref<4x4xf32, #tpu.memory_space<vmem>>, vector<4x4xf32>
    %cst_80 = arith.constant dense<0.000000e+00> : vector<4x1xf32>
    %131 = tpu.matmul %130, %129, %cst_80 {dimension_numbers = #tpu.dot_dimension_numbers<[1], [0], [0], [1], [0, 0, 1, 1], [], []>} : vector<4x4xf32>, vector<4x1xf32>, vector<4x1xf32> -> vector<4x1xf32>
    %c0_81 = arith.constant 0 : index
    %c0_82 = arith.constant 0 : index
    %132 = vector.load %arg10[%c0_81, %c0_82] : memref<4x1xf32, #tpu.memory_space<vmem>>, vector<4x1xf32>
    %133 = arith.addf %131, %132 : vector<4x1xf32>
    %134 = vector.broadcast %133 : vector<4x1xf32> to vector<4x384xf32>
    %135 = arith.mulf %123, %134 : vector<4x384xf32>
    %c0_83 = arith.constant 0 : index
    %c0_84 = arith.constant 0 : index
    %136 = vector.load %arg11[%c0_83, %c0_84] : memref<8x4xbf16, #tpu.memory_space<vmem>>, vector<8x4xbf16>
    %137 = arith.extf %136 : vector<8x4xbf16> to vector<8x4xf32>
    %cst_85 = arith.constant dense<0.000000e+00> : vector<8x384xf32>
    %138 = tpu.matmul %137, %135, %cst_85 {dimension_numbers = #tpu.dot_dimension_numbers<[1], [0], [0], [1], [0, 0, 1, 1], [], []>} : vector<8x4xf32>, vector<4x384xf32>, vector<8x384xf32> -> vector<8x384xf32>
    %c0_86 = arith.constant 0 : index
    %c0_87 = arith.constant 0 : index
    %139 = vector.load %arg12[%c0_86, %c0_87] : memref<8x1xf32, #tpu.memory_space<vmem>>, vector<8x1xf32>
    %140 = vector.broadcast %139 : vector<8x1xf32> to vector<8x384xf32>
    %141 = arith.addf %138, %140 : vector<8x384xf32>
    %c0_88 = arith.constant 0 : index
    %c0_89 = arith.constant 0 : index
    %142 = vector.load %arg15[%c0_88, %c0_89] : memref<8x1xf32, #tpu.memory_space<vmem>>, vector<8x1xf32>
    %143 = vector.broadcast %142 : vector<8x1xf32> to vector<8x384xf32>
    %144 = arith.mulf %141, %143 : vector<8x384xf32>
    %145 = arith.addf %33, %144 : vector<8x384xf32>
    %cst_90 = arith.constant dense<0.000000e+00> : vector<384xf32>
    %146 = vector.multi_reduction <add>, %145, %cst_90 [0] : vector<8x384xf32> to vector<384xf32>
    %147 = vector.shape_cast %146 : vector<384xf32> to vector<1x384xf32>
    %cst_91 = arith.constant 8.000000e+00 : f32
    %148 = vector.broadcast %cst_91 : f32 to vector<1x384xf32>
    %149 = arith.divf %147, %148 : vector<1x384xf32>
    %150 = vector.broadcast %149 : vector<1x384xf32> to vector<8x384xf32>
    %151 = arith.subf %145, %150 : vector<8x384xf32>
    %152 = vector.broadcast %149 : vector<1x384xf32> to vector<8x384xf32>
    %153 = arith.subf %145, %152 : vector<8x384xf32>
    %154 = arith.mulf %151, %153 : vector<8x384xf32>
    %cst_92 = arith.constant dense<0.000000e+00> : vector<384xf32>
    %155 = vector.multi_reduction <add>, %154, %cst_92 [0] : vector<8x384xf32> to vector<384xf32>
    %156 = vector.shape_cast %155 : vector<384xf32> to vector<1x384xf32>
    %cst_93 = arith.constant 8.000000e+00 : f32
    %157 = vector.broadcast %cst_93 : f32 to vector<1x384xf32>
    %158 = arith.divf %156, %157 : vector<1x384xf32>
    %159 = vector.broadcast %149 : vector<1x384xf32> to vector<8x384xf32>
    %160 = arith.subf %145, %159 : vector<8x384xf32>
    %cst_94 = arith.constant 9.99999997E-7 : f32
    %161 = vector.broadcast %cst_94 : f32 to vector<1x384xf32>
    %162 = arith.addf %158, %161 : vector<1x384xf32>
    %163 = math.rsqrt %162 : vector<1x384xf32>
    %164 = vector.broadcast %163 : vector<1x384xf32> to vector<8x384xf32>
    %165 = arith.mulf %160, %164 : vector<8x384xf32>
    %c0_95 = arith.constant 0 : index
    %c0_96 = arith.constant 0 : index
    %166 = vector.load %arg17[%c0_95, %c0_96] : memref<8x1xf32, #tpu.memory_space<vmem>>, vector<8x1xf32>
    %167 = vector.broadcast %166 : vector<8x1xf32> to vector<8x384xf32>
    %168 = arith.mulf %165, %167 : vector<8x384xf32>
    %c0_97 = arith.constant 0 : index
    %c0_98 = arith.constant 0 : index
    %169 = vector.load %arg18[%c0_97, %c0_98] : memref<8x1xf32, #tpu.memory_space<vmem>>, vector<8x1xf32>
    %170 = vector.broadcast %169 : vector<8x1xf32> to vector<8x384xf32>
    %171 = arith.addf %168, %170 : vector<8x384xf32>
    %c0_99 = arith.constant 0 : index
    %c0_100 = arith.constant 0 : index
    %172 = vector.load %arg19[%c0_99, %c0_100] : memref<16x8xbf16, #tpu.memory_space<vmem>>, vector<16x8xbf16>
    %173 = arith.extf %172 : vector<16x8xbf16> to vector<16x8xf32>
    %cst_101 = arith.constant dense<0.000000e+00> : vector<16x384xf32>
    %174 = tpu.matmul %173, %171, %cst_101 {dimension_numbers = #tpu.dot_dimension_numbers<[1], [0], [0], [1], [0, 0, 1, 1], [], []>} : vector<16x8xf32>, vector<8x384xf32>, vector<16x384xf32> -> vector<16x384xf32>
    %c0_102 = arith.constant 0 : index
    %c0_103 = arith.constant 0 : index
    %175 = vector.load %arg20[%c0_102, %c0_103] : memref<16x1xf32, #tpu.memory_space<vmem>>, vector<16x1xf32>
    %176 = vector.broadcast %175 : vector<16x1xf32> to vector<16x384xf32>
    %177 = arith.addf %174, %176 : vector<16x384xf32>
    %178 = vector.extract_strided_slice %177 {offsets = [0, 0], sizes = [8, 384], strides = [1, 1]} : vector<16x384xf32> to vector<8x384xf32>
    %179 = vector.extract_strided_slice %177 {offsets = [8, 0], sizes = [8, 384], strides = [1, 1]} : vector<16x384xf32> to vector<8x384xf32>
    %180 = arith.mulf %178, %179 : vector<8x384xf32>
    %c0_104 = arith.constant 0 : index
    %c0_105 = arith.constant 0 : index
    %181 = vector.load %arg21[%c0_104, %c0_105] : memref<8x8xbf16, #tpu.memory_space<vmem>>, vector<8x8xbf16>
    %182 = arith.extf %181 : vector<8x8xbf16> to vector<8x8xf32>
    %cst_106 = arith.constant dense<0.000000e+00> : vector<8x384xf32>
    %183 = tpu.matmul %182, %180, %cst_106 {dimension_numbers = #tpu.dot_dimension_numbers<[1], [0], [0], [1], [0, 0, 1, 1], [], []>} : vector<8x8xf32>, vector<8x384xf32>, vector<8x384xf32> -> vector<8x384xf32>
    %c0_107 = arith.constant 0 : index
    %c0_108 = arith.constant 0 : index
    %184 = vector.load %arg22[%c0_107, %c0_108] : memref<8x1xf32, #tpu.memory_space<vmem>>, vector<8x1xf32>
    %185 = vector.broadcast %184 : vector<8x1xf32> to vector<8x384xf32>
    %186 = arith.addf %183, %185 : vector<8x384xf32>
    %c0_109 = arith.constant 0 : index
    %c0_110 = arith.constant 0 : index
    %187 = vector.load %arg16[%c0_109, %c0_110] : memref<8x1xf32, #tpu.memory_space<vmem>>, vector<8x1xf32>
    %188 = vector.broadcast %187 : vector<8x1xf32> to vector<8x384xf32>
    %189 = arith.mulf %186, %188 : vector<8x384xf32>
    %190 = arith.addf %145, %189 : vector<8x384xf32>
    %cst_111 = arith.constant dense<0.000000e+00> : vector<384xf32>
    %191 = vector.multi_reduction <add>, %190, %cst_111 [0] : vector<8x384xf32> to vector<384xf32>
    %192 = vector.shape_cast %191 : vector<384xf32> to vector<1x384xf32>
    %cst_112 = arith.constant 8.000000e+00 : f32
    %193 = vector.broadcast %cst_112 : f32 to vector<1x384xf32>
    %194 = arith.divf %192, %193 : vector<1x384xf32>
    %195 = vector.broadcast %194 : vector<1x384xf32> to vector<8x384xf32>
    %196 = arith.subf %190, %195 : vector<8x384xf32>
    %197 = vector.broadcast %194 : vector<1x384xf32> to vector<8x384xf32>
    %198 = arith.subf %190, %197 : vector<8x384xf32>
    %199 = arith.mulf %196, %198 : vector<8x384xf32>
    %cst_113 = arith.constant dense<0.000000e+00> : vector<384xf32>
    %200 = vector.multi_reduction <add>, %199, %cst_113 [0] : vector<8x384xf32> to vector<384xf32>
    %201 = vector.shape_cast %200 : vector<384xf32> to vector<1x384xf32>
    %cst_114 = arith.constant 8.000000e+00 : f32
    %202 = vector.broadcast %cst_114 : f32 to vector<1x384xf32>
    %203 = arith.divf %201, %202 : vector<1x384xf32>
    %204 = vector.broadcast %194 : vector<1x384xf32> to vector<8x384xf32>
    %205 = arith.subf %190, %204 : vector<8x384xf32>
    %cst_115 = arith.constant 9.99999997E-7 : f32
    %206 = vector.broadcast %cst_115 : f32 to vector<1x384xf32>
    %207 = arith.addf %203, %206 : vector<1x384xf32>
    %208 = math.rsqrt %207 : vector<1x384xf32>
    %209 = vector.broadcast %208 : vector<1x384xf32> to vector<8x384xf32>
    %210 = arith.mulf %205, %209 : vector<8x384xf32>
    %c0_116 = arith.constant 0 : index
    %c0_117 = arith.constant 0 : index
    %211 = vector.load %arg23[%c0_116, %c0_117] : memref<8x1xf32, #tpu.memory_space<vmem>>, vector<8x1xf32>
    %212 = vector.broadcast %211 : vector<8x1xf32> to vector<8x384xf32>
    %213 = arith.mulf %210, %212 : vector<8x384xf32>
    %c0_118 = arith.constant 0 : index
    %c0_119 = arith.constant 0 : index
    %214 = vector.load %arg24[%c0_118, %c0_119] : memref<8x1xf32, #tpu.memory_space<vmem>>, vector<8x1xf32>
    %215 = vector.broadcast %214 : vector<8x1xf32> to vector<8x384xf32>
    %216 = arith.addf %213, %215 : vector<8x384xf32>
    %c0_120 = arith.constant 0 : index
    %c0_121 = arith.constant 0 : index
    %217 = vector.load %arg25[%c0_120, %c0_121] : memref<24x8xbf16, #tpu.memory_space<vmem>>, vector<24x8xbf16>
    %218 = arith.extf %217 : vector<24x8xbf16> to vector<24x8xf32>
    %cst_122 = arith.constant dense<0.000000e+00> : vector<24x384xf32>
    %219 = tpu.matmul %218, %216, %cst_122 {dimension_numbers = #tpu.dot_dimension_numbers<[1], [0], [0], [1], [0, 0, 1, 1], [], []>} : vector<24x8xf32>, vector<8x384xf32>, vector<24x384xf32> -> vector<24x384xf32>
    %220 = vector.broadcast %0 : vector<1x384xf32> to vector<24x384xf32>
    %221 = arith.mulf %219, %220 : vector<24x384xf32>
    %c0_123 = arith.constant 0 : index
    %c128_124 = arith.constant 128 : index
    %222 = vector.load %arg31[%c0_123, %c128_124] : memref<24x640xf32, #tpu.memory_space<vmem>>, vector<24x384xf32>
    tpu.vector_store %arg31[%c0_123, %c128_124], %221 {strides = array<i32>} : memref<24x640xf32, #tpu.memory_space<vmem>>, vector<24x384xf32>,
    %c0_125 = arith.constant 0 : index
    %c0_126 = arith.constant 0 : index
    %223 = vector.load %arg26[%c0_125, %c0_126] : memref<24x9xf32, #tpu.memory_space<vmem>>, vector<24x9xf32>
    %cst_127 = arith.constant 0.000000e+00 : f32
    %224 = vector.broadcast %cst_127 : f32 to vector<24x384xf32>
    %c0_128 = arith.constant 0 : index
    %c109_129 = arith.constant 109 : index
    %225 = vector.load %arg31[%c0_128, %c109_129] : memref<24x640xf32, #tpu.memory_space<vmem>>, vector<24x384xf32>
    %226 = vector.extract_strided_slice %223 {offsets = [0, 0], sizes = [24, 1], strides = [1, 1]} : vector<24x9xf32> to vector<24x1xf32>
    %227 = vector.broadcast %226 : vector<24x1xf32> to vector<24x384xf32>
    %228 = arith.mulf %225, %227 : vector<24x384xf32>
    %229 = arith.addf %224, %228 : vector<24x384xf32>
    %c0_130 = arith.constant 0 : index
    %c110_131 = arith.constant 110 : index
    %230 = vector.load %arg31[%c0_130, %c110_131] : memref<24x640xf32, #tpu.memory_space<vmem>>, vector<24x384xf32>
    %231 = vector.extract_strided_slice %223 {offsets = [0, 1], sizes = [24, 1], strides = [1, 1]} : vector<24x9xf32> to vector<24x1xf32>
    %232 = vector.broadcast %231 : vector<24x1xf32> to vector<24x384xf32>
    %233 = arith.mulf %230, %232 : vector<24x384xf32>
    %234 = arith.addf %229, %233 : vector<24x384xf32>
    %c0_132 = arith.constant 0 : index
    %c111_133 = arith.constant 111 : index
    %235 = vector.load %arg31[%c0_132, %c111_133] : memref<24x640xf32, #tpu.memory_space<vmem>>, vector<24x384xf32>
    %236 = vector.extract_strided_slice %223 {offsets = [0, 2], sizes = [24, 1], strides = [1, 1]} : vector<24x9xf32> to vector<24x1xf32>
    %237 = vector.broadcast %236 : vector<24x1xf32> to vector<24x384xf32>
    %238 = arith.mulf %235, %237 : vector<24x384xf32>
    %239 = arith.addf %234, %238 : vector<24x384xf32>
    %c0_134 = arith.constant 0 : index
    %c127_135 = arith.constant 127 : index
    %240 = vector.load %arg31[%c0_134, %c127_135] : memref<24x640xf32, #tpu.memory_space<vmem>>, vector<24x384xf32>
    %241 = vector.extract_strided_slice %223 {offsets = [0, 3], sizes = [24, 1], strides = [1, 1]} : vector<24x9xf32> to vector<24x1xf32>
    %242 = vector.broadcast %241 : vector<24x1xf32> to vector<24x384xf32>
    %243 = arith.mulf %240, %242 : vector<24x384xf32>
    %244 = arith.addf %239, %243 : vector<24x384xf32>
    %c0_136 = arith.constant 0 : index
    %c128_137 = arith.constant 128 : index
    %245 = vector.load %arg31[%c0_136, %c128_137] : memref<24x640xf32, #tpu.memory_space<vmem>>, vector<24x384xf32>
    %246 = vector.extract_strided_slice %223 {offsets = [0, 4], sizes = [24, 1], strides = [1, 1]} : vector<24x9xf32> to vector<24x1xf32>
    %247 = vector.broadcast %246 : vector<24x1xf32> to vector<24x384xf32>
    %248 = arith.mulf %245, %247 : vector<24x384xf32>
    %249 = arith.addf %244, %248 : vector<24x384xf32>
    %c0_138 = arith.constant 0 : index
    %c129_139 = arith.constant 129 : index
    %250 = vector.load %arg31[%c0_138, %c129_139] : memref<24x640xf32, #tpu.memory_space<vmem>>, vector<24x384xf32>
    %251 = vector.extract_strided_slice %223 {offsets = [0, 5], sizes = [24, 1], strides = [1, 1]} : vector<24x9xf32> to vector<24x1xf32>
    %252 = vector.broadcast %251 : vector<24x1xf32> to vector<24x384xf32>
    %253 = arith.mulf %250, %252 : vector<24x384xf32>
    %254 = arith.addf %249, %253 : vector<24x384xf32>
    %c0_140 = arith.constant 0 : index
    %c145_141 = arith.constant 145 : index
    %255 = vector.load %arg31[%c0_140, %c145_141] : memref<24x640xf32, #tpu.memory_space<vmem>>, vector<24x384xf32>
    %256 = vector.extract_strided_slice %223 {offsets = [0, 6], sizes = [24, 1], strides = [1, 1]} : vector<24x9xf32> to vector<24x1xf32>
    %257 = vector.broadcast %256 : vector<24x1xf32> to vector<24x384xf32>
    %258 = arith.mulf %255, %257 : vector<24x384xf32>
    %259 = arith.addf %254, %258 : vector<24x384xf32>
    %c0_142 = arith.constant 0 : index
    %c146_143 = arith.constant 146 : index
    %260 = vector.load %arg31[%c0_142, %c146_143] : memref<24x640xf32, #tpu.memory_space<vmem>>, vector<24x384xf32>
    %261 = vector.extract_strided_slice %223 {offsets = [0, 7], sizes = [24, 1], strides = [1, 1]} : vector<24x9xf32> to vector<24x1xf32>
    %262 = vector.broadcast %261 : vector<24x1xf32> to vector<24x384xf32>
    %263 = arith.mulf %260, %262 : vector<24x384xf32>
    %264 = arith.addf %259, %263 : vector<24x384xf32>
    %c0_144 = arith.constant 0 : index
    %c147_145 = arith.constant 147 : index
    %265 = vector.load %arg31[%c0_144, %c147_145] : memref<24x640xf32, #tpu.memory_space<vmem>>, vector<24x384xf32>
    %266 = vector.extract_strided_slice %223 {offsets = [0, 8], sizes = [24, 1], strides = [1, 1]} : vector<24x9xf32> to vector<24x1xf32>
    %267 = vector.broadcast %266 : vector<24x1xf32> to vector<24x384xf32>
    %268 = arith.mulf %265, %267 : vector<24x384xf32>
    %269 = arith.addf %264, %268 : vector<24x384xf32>
    %270 = vector.extract_strided_slice %269 {offsets = [0, 0], sizes = [8, 384], strides = [1, 1]} : vector<24x384xf32> to vector<8x384xf32>
    %271 = vector.broadcast %0 : vector<1x384xf32> to vector<8x384xf32>
    %272 = arith.mulf %270, %271 : vector<8x384xf32>
    %273 = vector.extract_strided_slice %269 {offsets = [8, 0], sizes = [8, 384], strides = [1, 1]} : vector<24x384xf32> to vector<8x384xf32>
    %274 = vector.broadcast %0 : vector<1x384xf32> to vector<8x384xf32>
    %275 = arith.mulf %273, %274 : vector<8x384xf32>
    %276 = vector.extract_strided_slice %269 {offsets = [16, 0], sizes = [8, 384], strides = [1, 1]} : vector<24x384xf32> to vector<8x384xf32>
    %277 = vector.extract_strided_slice %272 {offsets = [0, 0], sizes = [4, 384], strides = [1, 1]} : vector<8x384xf32> to vector<4x384xf32>
    %278 = vector.extract_strided_slice %275 {offsets = [0, 0], sizes = [4, 384], strides = [1, 1]} : vector<8x384xf32> to vector<4x384xf32>
    %279 = vector.extract_strided_slice %276 {offsets = [0, 0], sizes = [4, 384], strides = [1, 1]} : vector<8x384xf32> to vector<4x384xf32>
    %280 = arith.mulf %277, %277 : vector<4x384xf32>
    %cst_146 = arith.constant dense<0.000000e+00> : vector<4xf32>
    %281 = vector.multi_reduction <add>, %280, %cst_146 [1] : vector<4x384xf32> to vector<4xf32>
    %282 = vector.shape_cast %281 : vector<4xf32> to vector<4x1xf32>
    %cst_147 = arith.constant 1.000000e-24 : f32
    %283 = vector.broadcast %cst_147 : f32 to vector<4x1xf32>
    %284 = arith.maximumf %282, %283 : vector<4x1xf32>
    %285 = math.rsqrt %284 : vector<4x1xf32>
    %286 = vector.broadcast %285 : vector<4x1xf32> to vector<4x384xf32>
    %287 = arith.mulf %277, %286 : vector<4x384xf32>
    %288 = arith.mulf %278, %278 : vector<4x384xf32>
    %cst_148 = arith.constant dense<0.000000e+00> : vector<4xf32>
    %289 = vector.multi_reduction <add>, %288, %cst_148 [1] : vector<4x384xf32> to vector<4xf32>
    %290 = vector.shape_cast %289 : vector<4xf32> to vector<4x1xf32>
    %cst_149 = arith.constant 1.000000e-24 : f32
    %291 = vector.broadcast %cst_149 : f32 to vector<4x1xf32>
    %292 = arith.maximumf %290, %291 : vector<4x1xf32>
    %293 = math.rsqrt %292 : vector<4x1xf32>
    %294 = vector.broadcast %293 : vector<4x1xf32> to vector<4x384xf32>
    %295 = arith.mulf %278, %294 : vector<4x384xf32>
    %cst_150 = arith.constant dense<0.000000e+00> : vector<4x4xf32>
    %296 = tpu.matmul %287, %295, %cst_150 {dimension_numbers = #tpu.dot_dimension_numbers<[1], [1], [0], [0], [0, 0, 1, 0], [], []>} : vector<4x384xf32>, vector<4x384xf32>, vector<4x4xf32> -> vector<4x4xf32>
    %c0_151 = arith.constant 0 : index
    %c0_152 = arith.constant 0 : index
    %297 = vector.load %arg27[%c0_151, %c0_152] : memref<2x1xf32, #tpu.memory_space<vmem>>, vector<1x1xf32>
    %298 = vector.broadcast %297 : vector<1x1xf32> to vector<4x4xf32>
    %299 = arith.mulf %296, %298 : vector<4x4xf32>
    %cst_153 = arith.constant dense<0xFF800000> : vector<4xf32>
    %300 = vector.multi_reduction <maximumf>, %299, %cst_153 [1] : vector<4x4xf32> to vector<4xf32>
    %301 = vector.shape_cast %300 : vector<4xf32> to vector<4x1xf32>
    %302 = vector.broadcast %301 : vector<4x1xf32> to vector<4x4xf32>
    %303 = arith.subf %299, %302 : vector<4x4xf32>
    %304 = math.exp %303 : vector<4x4xf32>
    %cst_154 = arith.constant dense<0.000000e+00> : vector<4xf32>
    %305 = vector.multi_reduction <add>, %304, %cst_154 [1] : vector<4x4xf32> to vector<4xf32>
    %306 = vector.shape_cast %305 : vector<4xf32> to vector<4x1xf32>
    %307 = tpu.reciprocal %306 {approx = true} : vector<4x1xf32> -> vector<4x1xf32>
    %308 = vector.broadcast %307 : vector<4x1xf32> to vector<4x4xf32>
    %309 = arith.mulf %304, %308 : vector<4x4xf32>
    %cst_155 = arith.constant dense<0.000000e+00> : vector<4x384xf32>
    %310 = tpu.matmul %309, %279, %cst_155 {dimension_numbers = #tpu.dot_dimension_numbers<[1], [0], [0], [1], [0, 0, 1, 1], [], []>} : vector<4x4xf32>, vector<4x384xf32>, vector<4x384xf32> -> vector<4x384xf32>
    %311 = vector.extract_strided_slice %272 {offsets = [4, 0], sizes = [4, 384], strides = [1, 1]} : vector<8x384xf32> to vector<4x384xf32>
    %312 = vector.extract_strided_slice %275 {offsets = [4, 0], sizes = [4, 384], strides = [1, 1]} : vector<8x384xf32> to vector<4x384xf32>
    %313 = vector.extract_strided_slice %276 {offsets = [4, 0], sizes = [4, 384], strides = [1, 1]} : vector<8x384xf32> to vector<4x384xf32>
    %314 = arith.mulf %311, %311 : vector<4x384xf32>
    %cst_156 = arith.constant dense<0.000000e+00> : vector<4xf32>
    %315 = vector.multi_reduction <add>, %314, %cst_156 [1] : vector<4x384xf32> to vector<4xf32>
    %316 = vector.shape_cast %315 : vector<4xf32> to vector<4x1xf32>
    %cst_157 = arith.constant 1.000000e-24 : f32
    %317 = vector.broadcast %cst_157 : f32 to vector<4x1xf32>
    %318 = arith.maximumf %316, %317 : vector<4x1xf32>
    %319 = math.rsqrt %318 : vector<4x1xf32>
    %320 = vector.broadcast %319 : vector<4x1xf32> to vector<4x384xf32>
    %321 = arith.mulf %311, %320 : vector<4x384xf32>
    %322 = arith.mulf %312, %312 : vector<4x384xf32>
    %cst_158 = arith.constant dense<0.000000e+00> : vector<4xf32>
    %323 = vector.multi_reduction <add>, %322, %cst_158 [1] : vector<4x384xf32> to vector<4xf32>
    %324 = vector.shape_cast %323 : vector<4xf32> to vector<4x1xf32>
    %cst_159 = arith.constant 1.000000e-24 : f32
    %325 = vector.broadcast %cst_159 : f32 to vector<4x1xf32>
    %326 = arith.maximumf %324, %325 : vector<4x1xf32>
    %327 = math.rsqrt %326 : vector<4x1xf32>
    %328 = vector.broadcast %327 : vector<4x1xf32> to vector<4x384xf32>
    %329 = arith.mulf %312, %328 : vector<4x384xf32>
    %cst_160 = arith.constant dense<0.000000e+00> : vector<4x4xf32>
    %330 = tpu.matmul %321, %329, %cst_160 {dimension_numbers = #tpu.dot_dimension_numbers<[1], [1], [0], [0], [0, 0, 1, 0], [], []>} : vector<4x384xf32>, vector<4x384xf32>, vector<4x4xf32> -> vector<4x4xf32>
    %c1 = arith.constant 1 : index
    %c0_161 = arith.constant 0 : index
    %331 = vector.load %arg27[%c1, %c0_161] : memref<2x1xf32, #tpu.memory_space<vmem>>, vector<1x1xf32>
    %332 = vector.broadcast %331 : vector<1x1xf32> to vector<4x4xf32>
    %333 = arith.mulf %330, %332 : vector<4x4xf32>
    %cst_162 = arith.constant dense<0xFF800000> : vector<4xf32>
    %334 = vector.multi_reduction <maximumf>, %333, %cst_162 [1] : vector<4x4xf32> to vector<4xf32>
    %335 = vector.shape_cast %334 : vector<4xf32> to vector<4x1xf32>
    %336 = vector.broadcast %335 : vector<4x1xf32> to vector<4x4xf32>
    %337 = arith.subf %333, %336 : vector<4x4xf32>
    %338 = math.exp %337 : vector<4x4xf32>
    %cst_163 = arith.constant dense<0.000000e+00> : vector<4xf32>
    %339 = vector.multi_reduction <add>, %338, %cst_163 [1] : vector<4x4xf32> to vector<4xf32>
    %340 = vector.shape_cast %339 : vector<4xf32> to vector<4x1xf32>
    %341 = tpu.reciprocal %340 {approx = true} : vector<4x1xf32> -> vector<4x1xf32>
    %342 = vector.broadcast %341 : vector<4x1xf32> to vector<4x4xf32>
    %343 = arith.mulf %338, %342 : vector<4x4xf32>
    %cst_164 = arith.constant dense<0.000000e+00> : vector<4x384xf32>
    %344 = tpu.matmul %343, %313, %cst_164 {dimension_numbers = #tpu.dot_dimension_numbers<[1], [0], [0], [1], [0, 0, 1, 1], [], []>} : vector<4x4xf32>, vector<4x384xf32>, vector<4x384xf32> -> vector<4x384xf32>
    %345 = tpu.concatenate %310, %344 in 0 : vector<4x384xf32>, vector<4x384xf32> -> vector<8x384xf32>
    %c0_165 = arith.constant 0 : index
    %c0_166 = arith.constant 0 : index
    %346 = vector.load %arg28[%c0_165, %c0_166] : memref<8x8xbf16, #tpu.memory_space<vmem>>, vector<8x8xbf16>
    %347 = arith.extf %346 : vector<8x8xbf16> to vector<8x8xf32>
    %cst_167 = arith.constant dense<0.000000e+00> : vector<8x384xf32>
    %348 = tpu.matmul %347, %345, %cst_167 {dimension_numbers = #tpu.dot_dimension_numbers<[1], [0], [0], [1], [0, 0, 1, 1], [], []>} : vector<8x8xf32>, vector<8x384xf32>, vector<8x384xf32> -> vector<8x384xf32>
    %349 = arith.addf %190, %348 : vector<8x384xf32>
    %c0_168 = arith.constant 0 : index
    %c0_169 = arith.constant 0 : index
    %c0_170 = arith.constant 0 : index
    %350 = vector.load %arg29[%c0_168, %c0_169, %c0_170] : memref<1x8x384xf32, #tpu.memory_space<vmem>>, vector<1x8x384xf32>
    %351 = vector.shape_cast %350 : vector<1x8x384xf32> to vector<8x384xf32>
    %352 = vector.shape_cast %349 : vector<8x384xf32> to vector<1x8x384xf32>
    tpu.vector_store %arg29[%c0_168, %c0_169, %c0_170], %352 {strides = array<i32>} : memref<1x8x384xf32, #tpu.memory_space<vmem>>, vector<1x8x384xf32>,
    return
  }
  func.func @transform_0(%arg0: i32) -> (i32, i32, i32) {
    %c0_i32 = arith.constant 0 : i32
    %c0_i32_0 = arith.constant 0 : i32
    %c0_i32_1 = arith.constant 0 : i32
    return %arg0, %c0_i32, %c0_i32_0 : i32, i32, i32
  }
  func.func @transform_1(%arg0: i32) -> (i32, i32) {
    %c0_i32 = arith.constant 0 : i32
    %c0_i32_0 = arith.constant 0 : i32
    %c0_i32_1 = arith.constant 0 : i32
    return %c0_i32, %c0_i32_0 : i32, i32
  }
  func.func @transform_2(%arg0: i32) -> (i32, i32) {
    %c0_i32 = arith.constant 0 : i32
    %c0_i32_0 = arith.constant 0 : i32
    %c0_i32_1 = arith.constant 0 : i32
    return %c0_i32, %c0_i32_0 : i32, i32
  }
  func.func @transform_3(%arg0: i32) -> (i32, i32) {
    %c0_i32 = arith.constant 0 : i32
    %c0_i32_0 = arith.constant 0 : i32
    %c0_i32_1 = arith.constant 0 : i32
    return %c0_i32, %c0_i32_0 : i32, i32
  }
  func.func @transform_4(%arg0: i32) -> (i32, i32) {
    %c0_i32 = arith.constant 0 : i32
    %c0_i32_0 = arith.constant 0 : i32
    %c0_i32_1 = arith.constant 0 : i32
    return %c0_i32, %c0_i32_0 : i32, i32
  }
  func.func @transform_5(%arg0: i32) -> (i32, i32) {
    %c0_i32 = arith.constant 0 : i32
    %c0_i32_0 = arith.constant 0 : i32
    %c0_i32_1 = arith.constant 0 : i32
    return %c0_i32, %c0_i32_0 : i32, i32
  }
  func.func @transform_6(%arg0: i32) -> (i32, i32) {
    %c0_i32 = arith.constant 0 : i32
    %c0_i32_0 = arith.constant 0 : i32
    %c0_i32_1 = arith.constant 0 : i32
    return %c0_i32, %c0_i32_0 : i32, i32
  }
  func.func @transform_7(%arg0: i32) -> (i32, i32) {
    %c0_i32 = arith.constant 0 : i32
    %c0_i32_0 = arith.constant 0 : i32
    %c0_i32_1 = arith.constant 0 : i32
    return %c0_i32, %c0_i32_0 : i32, i32
  }
  func.func @transform_8(%arg0: i32) -> (i32, i32) {
    %c0_i32 = arith.constant 0 : i32
    %c0_i32_0 = arith.constant 0 : i32
    %c0_i32_1 = arith.constant 0 : i32
    return %c0_i32, %c0_i32_0 : i32, i32
  }
  func.func @transform_9(%arg0: i32) -> (i32, i32) {
    %c0_i32 = arith.constant 0 : i32
    %c0_i32_0 = arith.constant 0 : i32
    %c0_i32_1 = arith.constant 0 : i32
    return %c0_i32, %c0_i32_0 : i32, i32
  }
  func.func @transform_10(%arg0: i32) -> (i32, i32) {
    %c0_i32 = arith.constant 0 : i32
    %c0_i32_0 = arith.constant 0 : i32
    %c0_i32_1 = arith.constant 0 : i32
    return %c0_i32, %c0_i32_0 : i32, i32
  }
  func.func @transform_11(%arg0: i32) -> (i32, i32) {
    %c0_i32 = arith.constant 0 : i32
    %c0_i32_0 = arith.constant 0 : i32
    %c0_i32_1 = arith.constant 0 : i32
    return %c0_i32, %c0_i32_0 : i32, i32
  }
  func.func @transform_12(%arg0: i32) -> (i32, i32) {
    %c0_i32 = arith.constant 0 : i32
    %c0_i32_0 = arith.constant 0 : i32
    %c0_i32_1 = arith.constant 0 : i32
    return %c0_i32, %c0_i32_0 : i32, i32
  }
  func.func @transform_13(%arg0: i32) -> (i32, i32) {
    %c0_i32 = arith.constant 0 : i32
    %c0_i32_0 = arith.constant 0 : i32
    %c0_i32_1 = arith.constant 0 : i32
    return %c0_i32, %c0_i32_0 : i32, i32
  }
  func.func @transform_14(%arg0: i32) -> (i32, i32) {
    %c0_i32 = arith.constant 0 : i32
    %c0_i32_0 = arith.constant 0 : i32
    %c0_i32_1 = arith.constant 0 : i32
    return %c0_i32, %c0_i32_0 : i32, i32
  }
  func.func @transform_15(%arg0: i32) -> (i32, i32) {
    %c0_i32 = arith.constant 0 : i32
    %c0_i32_0 = arith.constant 0 : i32
    %c0_i32_1 = arith.constant 0 : i32
    return %c0_i32, %c0_i32_0 : i32, i32
  }
  func.func @transform_16(%arg0: i32) -> (i32, i32) {
    %c0_i32 = arith.constant 0 : i32
    %c0_i32_0 = arith.constant 0 : i32
    %c0_i32_1 = arith.constant 0 : i32
    return %c0_i32, %c0_i32_0 : i32, i32
  }
  func.func @transform_17(%arg0: i32) -> (i32, i32) {
    %c0_i32 = arith.constant 0 : i32
    %c0_i32_0 = arith.constant 0 : i32
    %c0_i32_1 = arith.constant 0 : i32
    return %c0_i32, %c0_i32_0 : i32, i32
  }
  func.func @transform_18(%arg0: i32) -> (i32, i32) {
    %c0_i32 = arith.constant 0 : i32
    %c0_i32_0 = arith.constant 0 : i32
    %c0_i32_1 = arith.constant 0 : i32
    return %c0_i32, %c0_i32_0 : i32, i32
  }
  func.func @transform_19(%arg0: i32) -> (i32, i32) {
    %c0_i32 = arith.constant 0 : i32
    %c0_i32_0 = arith.constant 0 : i32
    %c0_i32_1 = arith.constant 0 : i32
    return %c0_i32, %c0_i32_0 : i32, i32
  }
  func.func @transform_20(%arg0: i32) -> (i32, i32) {
    %c0_i32 = arith.constant 0 : i32
    %c0_i32_0 = arith.constant 0 : i32
    %c0_i32_1 = arith.constant 0 : i32
    return %c0_i32, %c0_i32_0 : i32, i32
  }
  func.func @transform_21(%arg0: i32) -> (i32, i32) {
    %c0_i32 = arith.constant 0 : i32
    %c0_i32_0 = arith.constant 0 : i32
    %c0_i32_1 = arith.constant 0 : i32
    return %c0_i32, %c0_i32_0 : i32, i32
  }
  func.func @transform_22(%arg0: i32) -> (i32, i32) {
    %c0_i32 = arith.constant 0 : i32
    %c0_i32_0 = arith.constant 0 : i32
    %c0_i32_1 = arith.constant 0 : i32
    return %c0_i32, %c0_i32_0 : i32, i32
  }
  func.func @transform_23(%arg0: i32) -> (i32, i32) {
    %c0_i32 = arith.constant 0 : i32
    %c0_i32_0 = arith.constant 0 : i32
    %c0_i32_1 = arith.constant 0 : i32
    return %c0_i32, %c0_i32_0 : i32, i32
  }
  func.func @transform_24(%arg0: i32) -> (i32, i32) {
    %c0_i32 = arith.constant 0 : i32
    %c0_i32_0 = arith.constant 0 : i32
    %c0_i32_1 = arith.constant 0 : i32
    return %c0_i32, %c0_i32_0 : i32, i32
  }
  func.func @transform_25(%arg0: i32) -> (i32, i32) {
    %c0_i32 = arith.constant 0 : i32
    %c0_i32_0 = arith.constant 0 : i32
    %c0_i32_1 = arith.constant 0 : i32
    return %c0_i32, %c0_i32_0 : i32, i32
  }
  func.func @transform_26(%arg0: i32) -> (i32, i32) {
    %c0_i32 = arith.constant 0 : i32
    %c0_i32_0 = arith.constant 0 : i32
    %c0_i32_1 = arith.constant 0 : i32
    return %c0_i32, %c0_i32_0 : i32, i32
  }
  func.func @transform_27(%arg0: i32) -> (i32, i32) {
    %c0_i32 = arith.constant 0 : i32
    %c0_i32_0 = arith.constant 0 : i32
    %c0_i32_1 = arith.constant 0 : i32
    return %c0_i32, %c0_i32_0 : i32, i32
  }
  func.func @transform_28(%arg0: i32) -> (i32, i32, i32) {
    %c0_i32 = arith.constant 0 : i32
    %c0_i32_0 = arith.constant 0 : i32
    %c0_i32_1 = arith.constant 0 : i32
    return %arg0, %c0_i32, %c0_i32_0 : i32, i32, i32
  }
}

</mosaic_0001>

<bundles_post_ra>
// kernel: tpu_custom_call.1
= control target key start
LH: loop header
LB: loop body
LE: loop exit
PB: predicated region body
PF: predicated region fallthrough
CT: control target
= control target key end

     0   :  { %s6682_s0 = inlined_call_operand.vmem [shape: f32[2,4,640], index: 0, kind: input, shape index: {}]   ;;  %s6683_s1 = inlined_call_operand.vmem [shape: f32[1,384], index: 1, kind: input, shape index: {}]   ;;  %s6684_s2 = inlined_call_operand.vmem [shape: f32[4,1], index: 2, kind: input, shape index: {}]   ;;  %s6685_s3 = inlined_call_operand.vmem [shape: f32[4,1], index: 3, kind: input, shape index: {}]   ;;  %s6686_s4 = inlined_call_operand.vmem [shape: bf16[8,4], index: 4, kind: input, shape index: {}]   ;;  %s6687_s5 = inlined_call_operand.vmem [shape: f32[8,1], index: 5, kind: input, shape index: {}]   ;;  %s6688_s6 = inlined_call_operand.vmem [shape: f32[8,9], index: 6, kind: input, shape index: {}]   ;;  %s6689_s7 = inlined_call_operand.vmem [shape: f32[8,1], index: 7, kind: input, shape index: {}]   ;;  %s6690_s8 = inlined_call_operand.vmem [shape: f32[4,4], index: 8, kind: input, shape index: {}]   ;;  %s6691_s9 = inlined_call_operand.vmem [shape: f32[4,1], index: 9, kind: input, shape index: {}]   ;;  %s6692_s10 = inlined_call_operand.vmem [shape: bf16[8,4], index: 10, kind: input, shape index: {}]   ;;  %s6693_s11 = inlined_call_operand.vmem [shape: f32[8,1], index: 11, kind: input, shape index: {}]   ;;  %s6694_s12 = inlined_call_operand.vmem [shape: bf16[8,36], index: 12, kind: input, shape index: {}]   ;;  %s6695_s13 = inlined_call_operand.vmem [shape: f32[8,1], index: 13, kind: input, shape index: {}]   ;;  %s6696_s14 = inlined_call_operand.vmem [shape: f32[8,1], index: 14, kind: input, shape index: {}]   ;;  %s6697_s15 = inlined_call_operand.vmem [shape: f32[8,1], index: 15, kind: input, shape index: {}]   ;;  %s6698_s16 = inlined_call_operand.vmem [shape: f32[8,1], index: 16, kind: input, shape index: {}]   ;;  %s6699_s17 = inlined_call_operand.vmem [shape: f32[8,1], index: 17, kind: input, shape index: {}]   ;;  %s6700_s18 = inlined_call_operand.vmem [shape: bf16[16,8], index: 18, kind: input, shape index: {}]   ;;  %s6701_s19 = inlined_call_operand.vmem [shape: f32[16,1], index: 19, kind: input, shape index: {}]   ;;  %s6702_s20 = inlined_call_operand.vmem [shape: bf16[8,8], index: 20, kind: input, shape index: {}]   ;;  %s6703_s21 = inlined_call_operand.vmem [shape: f32[8,1], index: 21, kind: input, shape index: {}]   ;;  %s6704_s22 = inlined_call_operand.vmem [shape: f32[8,1], index: 22, kind: input, shape index: {}]   ;;  %s6705_s23 = inlined_call_operand.vmem [shape: f32[8,1], index: 23, kind: input, shape index: {}]   ;;  %s6706_s24 = inlined_call_operand.vmem [shape: bf16[24,8], index: 24, kind: input, shape index: {}]   ;;  %s6707_s25 = inlined_call_operand.vmem [shape: f32[24,9], index: 25, kind: input, shape index: {}]   ;;  %s6708_s26 = inlined_call_operand.vmem [shape: f32[2,1], index: 26, kind: input, shape index: {}]   ;;  %s6709_s27 = inlined_call_operand.vmem [shape: bf16[8,8], index: 27, kind: input, shape index: {}]   ;;  %s6710_s28 = inlined_call_operand.hbm [shape: f32[2,8,384], index: 28, kind: output, shape index: {}]  }
   0x1   :  { %6762 = sst [smem:[#allocation25_spill]] %s6682_s0 }
   0x2   :  { %6763 = sst [smem:[#allocation26_spill]] %s6683_s1 }
   0x3   :  { %6764 = sst [smem:[#allocation27_spill]] %s6684_s2 }
   0x4   :  { %6765 = sst [smem:[#allocation28_spill]] %s6685_s3 }
   0x5   :  { %6766 = sst [smem:[#allocation29_spill]] %s6686_s4 }
   0x6   :  { %6767 = sst [smem:[#allocation30_spill]] %s6687_s5 }
   0x7   :  { %6768 = sst [smem:[#allocation31_spill]] %s6688_s6 }
   0x8   :  { %6769 = sst [smem:[#allocation32_spill]] %s6689_s7 }
   0x9   :  { %6770 = sst [smem:[#allocation33_spill]] %s6690_s8 }
   0xa   :  { %6771 = sst [smem:[#allocation34_spill]] %s6691_s9 }
   0xb   :  { %6772 = sst [smem:[#allocation35_spill]] %s6692_s10 }
   0xc   :  { %6773 = sst [smem:[#allocation36_spill]] %s6693_s11 }
   0xd   :  { %6774 = sst [smem:[#allocation37_spill]] %s6694_s12 }
   0xe   :  { %6775 = sst [smem:[#allocation38_spill]] %s6698_s16 }
   0xf   :  { %6776 = sst [smem:[#allocation39_spill]] %s6705_s23 }
  0x10   :  { %6777 = sst [smem:[#allocation40_spill]] %s6708_s26 }
  0x11   :  { %6778 = sst [smem:[#allocation41_spill]] %s6709_s27 }
  0x12   :  { %6779 = sst [smem:[#allocation42_spill]] %s6710_s28 }
  0x13   :  { %33 = vsyncpa [#allocation5], 0 }
  0x14   :  { %35 = vsyncpa [#allocation5 + $0x1], 0  ;;  %s5256_s8 = smov 0   ;;  %s5258_s5 = smov 0  }
  0x15   :  { %s5260_s9 = smov 0   ;;  %s5262_s30 = smov 0  }
  0x16 LB: > { %6780 = sst [smem:[#allocation7_spill]] %s5075_s8  ;;  %s5277_s3 = sadd.s32 4294967295, %s5087_s30   ;;  %s5087_s30 = sphi %s5262_s30, %s6851_s30   ;;  %s5083_s9 = sphi %s5260_s9, %s6854_s9   ;;  %s5079_s5 = sphi %s5258_s5, %s6853_s5   ;;  %s5075_s8 = sphi %s5256_s8, %s6852_s8  }
  0x17   : > { %6781 = sst [smem:[#allocation8_spill]] %s5079_s5  ;;  %s4701_s6 = sadd.s32 4294967294, %s5087_s30  }
  0x18   : > { %6782 = sst [smem:[#allocation9_spill]] %s5083_s9  ;;  %s5281_s10 = sadd.s32 1, %s5087_s30  }
  0x19   : > { %6783 = sst [smem:[#allocation10_spill]] %s5087_s30  ;;  %s641_s0 = sadd.s32 1, %s5083_s9 }
  0x1a   : > { %6784 = sst [smem:[#allocation11_spill]] %s5277_s3  ;;  %s638_s11 = ssub.s32 %s5087_s30, %s5281_s10 }
  0x1b   : > { %6785 = sst [smem:[#allocation12_spill]] %s5281_s10  ;;  %p651_p0 = scmp.ne.s32.totalorder %s5083_s9, %s5079_s5 }
  0x1c   : > { %p639_p1 = scmp.eq.s32.totalorder %s638_s11, 0  ;;  %p652_p2 = scmp.eq.s32.totalorder %s5277_s3, 1 }
  0x1d   : > { %p657_p3 = scmp.ne.s32.totalorder %s5079_s5, %s5075_s8  ;;  %p658_p4 = scmp.eq.s32.totalorder %s4701_s6, 1 }
  0x1e   : > { %s5292_s29 = scalar_select %p639_p1, %s5083_s9, %s641_s0  }
  0x1f   : > { %p5294_p5 = por %p652_p2, %p651_p0  ;;  %p5298_p6 = por %p658_p4, %p657_p3 }
  0x20   : > { %6786 = sst [smem:[#allocation13_spill]] %s5292_s29  ;;  %p4704_p7 = scmp.ge.s32.totalorder %s5087_s30, 1 }
  0x21   : > { %s6787_s2 = scalar_select %p5294_p5, 1, 0 }
  0x22   : > { %s6789_s7 = scalar_select %p5298_p6, 1, 0 }
  0x23   : > { %6788 = sst [smem:[#allocation14_spill]] %s6787_s2  ;;  %p765_p8 = scmp.lt.s32.totalorder %s5087_s30, 3 }
  0x24   : > { %6790 = sst [smem:[#allocation15_spill]] %s6789_s7 }
  0x25   : > { %p766_p9 = pnand %p4704_p7, %p765_p8 }
  0x27   : > { %769 = sbr.rel (%p766_p9) target bundleno = 4418 (0x1142), region = 132 }
  0x2c   : > { %p839_p10 = scmp.lt.s32.totalorder %s5277_s3, 1  ;;  %v6743_v0 = vmov 0   ;;  %s6791_s0 = sld [smem:[#allocation25_spill]]  ;;  %vm997_vm0 = vcmask 1043456   ;;  %vm993_vm1 = vcmask 736256   ;;  %v6749_v47 = vmov 0.0  }
  0x2d   : > { %4930 = vset.pattern.permute.xlu1 %v6743_v0  ;;  %s6711_s29 = smov 90   ;;  %s6713_s4 = smov 109   ;;  %4789 = vmatprep.subr.mxu1 %v6749_v47  ;;  %vm961_vm2 = vcmask 752640   ;;  %vm977_vm3 = vcmask 744448   ;;  %vm943_vm4 = vcmask 883712   ;;  %vm924_vm5 = vcmask 891904  }
  0x2e   : > { %s840_s12 = scalar_select %p839_p10, %s5277_s3, 1  ;;  %1180 = vmatprep.mubr.f32.mxu0 %v6749_v47  ;;  %vm891_vm6 = vcmask 1031168   ;;  %vm907_vm7 = vcmask 900096   ;;  %vm875_vm8 = vcmask 1039360   ;;  %vm5100_vm9 = vmmov 0  }
  0x2f   : > { %s6719_s6 = smov 108   ;;  %s6726_s9 = smov 19   ;;  %4799 = vmatprep.mubr.msk.f32.mxu1 %vm5100_vm9, %v6749_v47  ;;  %vm1078_vm10 = vcmask 154624   ;;  %vm1106_vm11 = vcmask 293888   ;;  %vm1371_vm12 = vcmask 31744   ;;  %vm2241_vm13 = vcmask 64512  }
  0x30   : > { %s4864_s1 = smul.u32 20, %s840_s12  ;;  %s6717_s12 = smov 92   ;;  %vm4070_vm14 = vcmask 1047556   ;;  %vm3893_vm15 = vcmask 27648  }
  0x31   : > { %s6811_s10 = smov 19   ;;  %s6813_s16 = sld [smem:[#allocation38_spill]] }
  0x32   : > { %s5310_s11 = scalar_lea.vmem %s6791_s0, %s4864_s1  ;;  %s6715_s1 = smov 91  }
  0x33   : > { %v858_v1 = vld [vmem:[%s5310_s11 + $0xc] sm:$0xff]  ;;  %v5314_v2 = vld [vmem:[%s5310_s11 + $0x4] sm:$0xff]  ;;  %s6723_s0 = smov 126   ;;  %s6814_s23 = sld [smem:[#allocation39_spill]] }
  0x34   : > { %989 = vrot.lane.b32.xlu1 %v858_v1, %s6711_s29  ;;  %985 = vrot.lane.b32.xlu0 %v5314_v2, %s6711_s29  ;;  %v951_v3 = vcombine.high %v5314_v2, %v5314_v2  ;;  %v933_v4 = vcombine.low %v5314_v2, %v5314_v2  ;;  %v934_v5 = vcombine.low %v858_v1, %v858_v1  ;;  %v5335_v6 = vld [vmem:[%s5310_s11 + $0xc] sm:$0xf]  ;;  %v5347_v10 = vld [vmem:[%s5310_s11] sm:$0xff]  ;;  %v1258_v11 = vsel %vm997_vm0, %v5314_v2, 0.0  ;;  %s6815_s5 = sld [smem:[#allocation33_spill]] }
  0x35   : > { %v952_v7 = vcombine.high %v858_v1, %v858_v1  ;;  %v5355_v12 = vcombine.high %v5347_v10, %v5347_v10  ;;  %v1259_v13 = vrot.slane %v1258_v11, 4  ;;  %v5358_v15 = vld [vmem:[%s5310_s11 + $0x8] sm:$0xff]  ;;  %v865_v22 = vcombine.low %v5347_v10, %v5347_v10  ;;  %s6728_s11 = smov 127   ;;  %s6816_s30 = sld [smem:[#allocation34_spill]] }
  0x36   : > { %v1265_v8 = vsel %vm997_vm0, %v951_v3, 0.0  ;;  %v5366_v16 = vcombine.high %v5358_v15, %v5358_v15  ;;  %v866_v19 = vcombine.low %v5358_v15, %v5358_v15  ;;  %s6817_s2 = sld [smem:[#allocation36_spill]] }
  0x37   : > { %v1266_v9 = vrot.slane %v1265_v8, 4  ;;  %v1260_v17 = vadd.f32 %v1259_v13, %v1258_v11  ;;  %s6838_s8 = sld [smem:[#allocation40_spill]] }
  0x38   : > { %953 = vrot.lane.b32.xlu1 %v5314_v2, %s6717_s12  ;;  %987 = vrot.lane.b32.xlu0 %v951_v3, %s6711_s29  ;;  %s6847_s28 = sld [smem:[#allocation42_spill]] }
  0x39   : > { %v1267_v14 = vadd.f32 %v1266_v9, %v1265_v8  ;;  %v1261_v20 = vrot.slane %v1260_v17, 2 }
  0x3b   : > { %v1268_v18 = vrot.slane %v1267_v14, 2  ;;  %v1262_v23 = vadd.f32 %v1261_v20, %v1260_v17 }
  0x3c   : > { %957 = vrot.lane.b32.xlu1 %v858_v1, %s6717_s12  ;;  %955 = vrot.lane.b32.xlu0 %v951_v3, %s6717_s12 }
  0x3d   : > { %v1269_v21 = vadd.f32 %v1268_v18, %v1267_v14  ;;  %v1263_v25 = vrot.slane %v1262_v23, 1 }
  0x3f   : > { %v1270_v24 = vrot.slane %v1269_v21, 1  ;;  %v1264_v28 = vadd.f32 %v1263_v25, %v1262_v23 }
  0x40   : > { %971 = vrot.lane.b32.xlu1 %v5314_v2, %s6715_s1  ;;  %969 = vrot.lane.b32.xlu0 %v933_v4, %s6715_s1 }
  0x41   : > { %v1271_v26 = vadd.f32 %v1270_v24, %v1269_v21  ;;  %v1280_v29 = vmul.f32 0.25, %v1264_v28 }
  0x43   : > { %v1281_v27 = vmul.f32 0.25, %v1271_v26 }
  0x44   : > { %973 = vrot.lane.b32.xlu0 %v934_v5, %s6715_s1  ;;  %918 = vrot.lane.b32.xlu1 %v5314_v2, %s6713_s4 }
  0x45   : > { %v1285_v31 = vcombine.low %v1280_v29, %v1281_v27 }
  0x47   : > { %v5392_v32 = vsub.f32 %v5314_v2, %v1285_v31 }
  0x48   : > { %922 = vrot.lane.b32.xlu1 %v5335_v6, %s6713_s4  ;;  %920 = vrot.lane.b32.xlu0 %v951_v3, %s6713_s4  ;;  %s6801_s4 = smov 92  }
  0x4c   : > { %937 = vrot.lane.b32.xlu1 %v5314_v2, %s6719_s6  ;;  %935 = vrot.lane.b32.xlu0 %v933_v4, %s6719_s6 }
  0x50   : > { %991 = vrot.lane.b32.xlu1 %v952_v7, %s6711_s29  ;;  %939 = vrot.lane.b32.xlu0 %v934_v5, %s6719_s6  ;;  %s6721_s29 = smov 110  }
  0x54   : > { %975 = vrot.lane.b32.xlu1 %v858_v1, %s6715_s1  ;;  %959 = vrot.lane.b32.xlu0 %v952_v7, %s6717_s12  ;;  %s6792_s12 = sld [smem:[#allocation27_spill]] }
  0x55   : > { %s6794_s1 = sld [smem:[#allocation30_spill]] }
  0x58   : > { %887 = vrot.lane.b32.xlu1 %v5358_v15, %s6723_s0  ;;  %885 = vrot.lane.b32.xlu0 %v5355_v12, %s6723_s0 }
  0x5a   : > { %v1330_v30 = vld [vmem:[%s6792_s12] sm:$0xf]  ;;  %s6799_s12 = smov 110  }
  0x5c   : > { %901 = vrot.lane.b32.xlu1 %v5347_v10, %s6721_s29  ;;  %889 = vrot.lane.b32.xlu0 %v5366_v16, %s6723_s0 }
  0x60   : > { %905 = vrot.lane.b32.xlu1 %v5358_v15, %s6721_s29  ;;  %903 = vrot.lane.b32.xlu0 %v866_v19, %s6721_s29 }
  0x64   : > { %899 = vrot.lane.b32.xlu1 %v865_v22, %s6721_s29  ;;  %883 = vrot.lane.b32.xlu0 %v5347_v10, %s6723_s0  ;;  %s6793_s0 = sld [smem:[#allocation28_spill]]  ;;  %s6798_s29 = smov 126  }
  0x68   : > { %869 = vrot.lane.b32.xlu1 %v5347_v10, %s6728_s11  ;;  %941 = vrot.lane.b32.xlu0 %v858_v1, %s6719_s6  ;;  %s6809_s6 = smov 127  }
  0x6a   : > { %v1345_v33 = vld [vmem:[%s6793_s0] sm:$0xf]  ;;  %s6795_s0 = sld [smem:[#allocation31_spill]] }
  0x6c   : > { %873 = vrot.lane.b32.xlu1 %v5358_v15, %s6728_s11  ;;  %871 = vrot.lane.b32.xlu0 %v866_v19, %s6728_s11 }
  0x70   : > { %867 = vrot.lane.b32.xlu0 %v865_v22, %s6728_s11  ;;  %1333 = vperm.xlu1 %4930, %v1330_v30  }
  0x74   : > { %1348 = vperm.xlu1 %4930, %v1345_v33  }
  0xa6   : > { %v990_v34 = vpop.permute.xlu1 %989  ;;  %v986_v35 = vpop.permute.xlu0 %985 }
  0xa7   : > { %1070 = vrot.lane.b32.xlu0 %v986_v35, %s6726_s9 }
  0xaa   : > { %v954_v36 = vpop.permute.xlu1 %953  ;;  %v988_v37 = vpop.permute.xlu0 %987 }
  0xab   : > { %v994_v38 = vsel %vm993_vm1, %v986_v35, %v988_v37  ;;  %v995_v39 = vsel %vm993_vm1, %v988_v37, %v990_v34 }
  0xac   : > { %1072 = vrot.lane.b32.xlu1 %v994_v38, %s6726_s9  ;;  %1074 = vrot.lane.b32.xlu0 %v995_v39, %s6726_s9 }
  0xae   : > { %v958_v40 = vpop.permute.xlu1 %957  ;;  %v956_v41 = vpop.permute.xlu0 %955 }
  0xaf   : > { %v963_v54 = vsel %vm961_vm2, %v956_v41, %v958_v40  ;;  %v962_v61 = vsel %vm961_vm2, %v954_v36, %v956_v41 }
  0xb2   : > { %v972_v42 = vpop.permute.xlu1 %971  ;;  %v970_v43 = vpop.permute.xlu0 %969 }
  0xb3   : > { %v1010_v44 = vsel %vm997_vm0, %v954_v36, %v970_v43  ;;  %v978_v59 = vsel %vm977_vm3, %v970_v43, %v972_v42 }
  0xb4   : > { %1062 = vrot.lane.b32.xlu0 %v1010_v44, %s6726_s9  ;;  %v1011_v2 = vsel %vm997_vm0, %v962_v61, %v978_v59 }
  0xb6   : > { %v974_v45 = vpop.permute.xlu0 %973  ;;  %v919_v46 = vpop.permute.xlu1 %918 }
  0xb7   : > { %v979_v53 = vsel %vm977_vm3, %v972_v42, %v974_v45 }
  0xb8   : > { %v1012_v58 = vsel %vm997_vm0, %v963_v54, %v979_v53  ;;  %v1272_v53 = vsel %vm997_vm0, %v5335_v6, 0.0  ;;  %v6744_v54 = vmov 6  }
  0xba   : > { %v923_v48 = vpop.permute.xlu1 %922  ;;  %v921_v49 = vpop.permute.xlu0 %920 }
  0xbb   : > { %v925_v62 = vsel %vm924_vm5, %v919_v46, %v921_v49  ;;  %v926_v5 = vsel %vm924_vm5, %v921_v49, %v923_v48  ;;  %v5102_v49 = vmov 2  }
  0xbe   : > { %v938_v50 = vpop.permute.xlu1 %937  ;;  %v936_v51 = vpop.permute.xlu0 %935 }
  0xbf   : > { %v1006_v52 = vsel %vm997_vm0, %v919_v46, %v936_v51  ;;  %v944_v60 = vsel %vm943_vm4, %v936_v51, %v938_v50  ;;  %v6748_v51 = vmov 3  }
  0xc0   : > { %1054 = vrot.lane.b32.xlu0 %v1006_v52, %s6726_s9  ;;  %v1007_v3 = vsel %vm997_vm0, %v925_v62, %v944_v60  ;;  %v6746_v52 = vmov 5   ;;  %v1289_v60 = vmul.f32 %v5392_v32, %v5392_v32 }
  0xc2   : > { %v992_v55 = vpop.permute.xlu1 %991  ;;  %v940_v56 = vpop.permute.xlu0 %939  ;;  %v1292_v62 = vcombine.high %v1289_v60, %v1289_v60 }
  0xc3   : > { %v996_v57 = vsel %vm993_vm1, %v990_v34, %v992_v55  ;;  %v945_v4 = vsel %vm943_vm4, %v938_v50, %v940_v56  ;;  %v6747_v50 = vmov 4   ;;  %v1273_v55 = vrot.slane %v1272_v53, 4 }
  0xc4   : > { %1076 = vrot.lane.b32.xlu1 %v996_v57, %s6726_s9  ;;  %1066 = vrot.lane.b32.xlu0 %v1012_v58, %s6726_s9  ;;  %v1008_v9 = vsel %vm997_vm0, %v926_v5, %v945_v4 }
  0xc5   : > { %v1274_v57 = vadd.f32 %v1273_v55, %v1272_v53 }
  0xc6   : > { %v976_v63 = vpop.permute.xlu1 %975  ;;  %v960_v1 = vpop.permute.xlu0 %959 }
  0xc7   : > { %v980_v11 = vsel %vm977_vm3, %v974_v45, %v976_v63  ;;  %v964_v13 = vsel %vm961_vm2, %v958_v40, %v960_v1  ;;  %v1275_v58 = vrot.slane %v1274_v57, 2 }
  0xc8   : > { %1064 = vrot.lane.b32.xlu1 %v1011_v2, %s6726_s9  ;;  %1056 = vrot.lane.b32.xlu0 %v1007_v3, %s6726_s9  ;;  %v1013_v18 = vsel %vm997_vm0, %v964_v13, %v980_v11  ;;  %v1294_v2 = vsel %vm997_vm0, %v1289_v60, 0.0  ;;  %v1301_v3 = vsel %vm997_vm0, %v1292_v62, 0.0  ;;  %v1338_v60 = vlaneseq }
  0xc9   : > { %v1276_v59 = vadd.f32 %v1275_v58, %v1274_v57  ;;  %v1295_v5 = vrot.slane %v1294_v2, 4  ;;  %v5109_v58 = vmov 839922192  }
  0xca   : > { %v888_v7 = vpop.permute.xlu1 %887  ;;  %v886_v8 = vpop.permute.xlu0 %885 }
  0xcb   : > { %v893_v21 = vsel %vm891_vm6, %v886_v8, %v888_v7  ;;  %v1277_v61 = vrot.slane %v1276_v59, 1  ;;  %v1296_v13 = vadd.f32 %v1295_v5, %v1294_v2  ;;  %v5509_v5 = vshrl.u32 %v1338_v60, 7 }
  0xcc   : > { %1058 = vrot.lane.b32.xlu1 %v1008_v9, %s6726_s9 }
  0xcd   : > { %v1278_v1 = vadd.f32 %v1277_v61, %v1276_v59  ;;  %v1336_v59 = vunpack.c.l.s4 %v5109_v58 }
  0xce   : > { %v902_v14 = vpop.permute.xlu1 %901  ;;  %v890_v17 = vpop.permute.xlu0 %889 }
  0xcf   : > { %v894_v22 = vsel %vm891_vm6, %v888_v7, %v890_v17  ;;  %v1282_v4 = vmul.f32 0.25, %v1278_v1  ;;  %v1302_v7 = vrot.slane %v1301_v3, 4 }
  0xd0   : > { %1068 = vrot.lane.b32.xlu1 %v1013_v18, %s6726_s9 }
  0xd1   : > { %v5492_v11 = vsub.f32 %v5335_v6, %v1282_v4  ;;  %v1337_v4 = vunpack.c.0.s8 %v1336_v59 }
  0xd2   : > { %v906_v19 = vpop.permute.xlu1 %905  ;;  %v904_v20 = vpop.permute.xlu0 %903 }
  0xd3   : > { %v909_v23 = vsel %vm907_vm7, %v902_v14, %v904_v20  ;;  %v910_v24 = vsel %vm907_vm7, %v904_v20, %v906_v19  ;;  %v1005_v45 = vsel %vm997_vm0, %v890_v17, %v906_v19  ;;  %v1290_v19 = vmul.f32 %v5492_v11, %v5492_v11 }
  0xd4   : > { %v1004_v25 = vsel %vm997_vm0, %v894_v22, %v910_v24  ;;  %v1003_v26 = vsel %vm997_vm0, %v893_v21, %v909_v23  ;;  %v1297_v20 = vrot.slane %v1296_v13, 2 }
  0xd5   : > { %1050 = vrot.lane.b32.xlu1 %v1004_v25, %s6726_s9  ;;  %1048 = vrot.lane.b32.xlu0 %v1003_v26, %s6726_s9  ;;  %v1308_v6 = vsel %vm997_vm0, %v1290_v19, 0.0 }
  0xd6   : > { %v900_v27 = vpop.permute.xlu1 %899  ;;  %v884_v28 = vpop.permute.xlu0 %883  ;;  %v1298_v24 = vadd.f32 %v1297_v20, %v1296_v13  ;;  %v1309_v26 = vrot.slane %v1308_v6, 4 }
  0xd7   : > { %v908_v29 = vsel %vm907_vm7, %v900_v27, %v902_v14  ;;  %v892_v30 = vsel %vm891_vm6, %v884_v28, %v886_v8  ;;  %v1303_v14 = vadd.f32 %v1302_v7, %v1301_v3 }
  0xd8   : > { %v1002_v31 = vsel %vm997_vm0, %v892_v30, %v908_v29  ;;  %v1299_v27 = vrot.slane %v1298_v24, 1  ;;  %v1310_v29 = vadd.f32 %v1309_v26, %v1308_v6 }
  0xd9   : > { %1046 = vrot.lane.b32.xlu0 %v1002_v31, %s6726_s9  ;;  %v1304_v23 = vrot.slane %v1303_v14, 2 }
  0xda   : > { %v870_v33 = vpop.permute.xlu1 %869  ;;  %v942_v34 = vpop.permute.xlu0 %941  ;;  %v1300_v30 = vadd.f32 %v1299_v27, %v1298_v24 }
  0xdb   : > { %v946_v35 = vsel %vm943_vm4, %v940_v56, %v942_v34  ;;  %v6741_v56 = vmov 8   ;;  %v1305_v25 = vadd.f32 %v1304_v23, %v1303_v14 }
  0xdc   : > { %v1009_v36 = vsel %vm997_vm0, %v923_v48, %v946_v35  ;;  %v1315_v35 = vmul.f32 0.25, %v1300_v30 }
  0xdd   : > { %1060 = vrot.lane.b32.xlu1 %v1009_v36, %s6726_s9  ;;  %v1306_v28 = vrot.slane %v1305_v25, 1 }
  0xde   : > { %v874_v37 = vpop.permute.xlu1 %873  ;;  %v872_v38 = vpop.permute.xlu0 %871 }
  0xdf   : > { %v877_v39 = vsel %vm875_vm8, %v870_v33, %v872_v38  ;;  %v878_v40 = vsel %vm875_vm8, %v872_v38, %v874_v37  ;;  %v1001_v48 = vsel %vm997_vm0, %v5366_v16, %v874_v37  ;;  %v6745_v16 = vmov 7  }
  0xe0   : > { %v1000_v41 = vsel %vm997_vm0, %v5358_v15, %v878_v40  ;;  %v999_v42 = vsel %vm997_vm0, %v5355_v12, %v877_v39  ;;  %v1362_v12 = vld [vmem:[%s6794_s1] sm:$0xff]  ;;  %v5101_v15 = vmov 1   ;;  %v1307_v31 = vadd.f32 %v1306_v28, %v1305_v25  ;;  %s6796_s1 = sld [smem:[#allocation37_spill]] }
  0xe1   : > { %1042 = vrot.lane.b32.xlu1 %v1000_v41, %s6726_s9  ;;  %1040 = vrot.lane.b32.xlu0 %v999_v42, %s6726_s9  ;;  %v1318_v39 = vadd.f32 1e-06, %v1315_v35 }
  0xe2   : > { %v868_v43 = vpop.permute.xlu0 %867  ;;  %4931 = vset.pattern.permute.xlu0 %v5101_v15  ;;  %v1316_v36 = vmul.f32 0.25, %v1307_v31 }
  0xe3   : > { %v876_v44 = vsel %vm875_vm8, %v868_v43, %v870_v33  ;;  %v1311_v33 = vrot.slane %v1310_v29, 2  ;;  %4993 = vrsqrt.f32 %v1318_v39 }
  0xe4   : > { %v998_v46 = vsel %vm997_vm0, %v5347_v10, %v876_v44  ;;  %v1544_v10 = vld [vmem:[%s6795_s0] sm:$0xff]  ;;  %v1319_v40 = vadd.f32 1e-06, %v1316_v36  ;;  %s6797_s0 = sld [smem:[#allocation29_spill]] }
  0xe5   : > { %1052 = vrot.lane.b32.xlu1 %v1005_v45, %s6726_s9  ;;  %1038 = vrot.lane.b32.xlu0 %v998_v46, %s6726_s9  ;;  %v1312_v37 = vadd.f32 %v1311_v33, %v1310_v29 }
  0xe6   : > { %4995 = vrsqrt.f32 %v1319_v40 }
  0xe7   : > { %v1313_v41 = vrot.slane %v1312_v37, 1 }
  0xe9   : > { %1365 = vperm.xlu1 %4930, %v1362_v12   ;;  %1044 = vrot.lane.b32.xlu0 %v1001_v48, %s6726_s9  ;;  %v1314_v45 = vadd.f32 %v1313_v41, %v1312_v37  ;;  %s6802_s9 = sld [smem:[#allocation32_spill]] }
  0xeb   : > { %v5485_v63 = vpop.permute.xlu1 %1333  ;;  %v1317_v53 = vmul.f32 0.25, %v1314_v45 }
  0xed   : > { %4932 = vset.pattern.permute.xlu1 %v5102_v49  ;;  %1563 = vperm.xlu0 %4931, %v1544_v10   ;;  %v1320_v62 = vadd.f32 1e-06, %v1317_v53 }
  0xee   : > { %1594 = vperm.xlu1 %4932, %v1544_v10  }
  0xef   : > { %v5489_v8 = vpop.permute.xlu1 %1348  ;;  %4997 = vrsqrt.f32 %v1320_v62  ;;  %v1809_v58 = vld [vmem:[%s6802_s9] sm:$0xff]  ;;  %s6808_s9 = smov 109  }
  0xf0   : > { %v4994_v3 = vpop.eup %4993 }
  0xf1   : > { %4934 = vset.pattern.permute.xlu0 %v6747_v50 }
  0xf2   : > { %4933 = vset.pattern.permute.xlu1 %v6748_v51  ;;  %1656 = vperm.xlu0 %4934, %v1544_v10  }
  0xf3   : > { %1625 = vperm.xlu1 %4933, %v1544_v10   ;;  %v4996_v7 = vpop.eup %4995 }
  0xf4   : > { %v1326_v14 = vcombine.low %v4994_v3, %v4996_v7 }
  0xf6   : > { %4937 = vset.pattern.permute.xlu0 %v6745_v16  ;;  %v1328_v20 = vmul.f32 %v1326_v14, %v5392_v32  ;;  %v1014_v32 = vld [vmem:[%s6796_s1] sm:$0xf]  ;;  %s6800_s1 = smov 108  }
  0xf7   : > { %4935 = vset.pattern.permute.xlu1 %v6746_v52  ;;  %1748 = vperm.xlu0 %4937, %v1544_v10   ;;  %v1015_v31 = vunpack.c.l.bf16 %v1014_v32 }
  0xf8   : > { %1686 = vperm.xlu1 %4935, %v1544_v10  }
  0xfb   : > { %4940 = vset.pattern.permute.xlu0 %v6743_v0 }
  0xfc   : > { %4936 = vset.pattern.permute.xlu1 %v6744_v54  ;;  %v4998_v26 = vpop.eup %4997 }
  0xfd   : > { %1717 = vperm.xlu1 %4936, %v1544_v10   ;;  %v1329_v30 = vmul.f32 %v4998_v26, %v5492_v11 }
 0x101   : > { %4938 = vset.pattern.permute.xlu1 %v6741_v56 }
 0x102   : > { %1779 = vperm.xlu1 %4938, %v1544_v10  }
 0x106   : > { %4939 = vset.pattern.permute.xlu1 %v6743_v0 }
 0x107   : > { %1551 = vperm.xlu1 %4939, %v1544_v10  }
 0x119   : > { %v1071_v9 = vpop.permute.xlu0 %1070 }
 0x11e   : > { %v1073_v17 = vpop.permute.xlu1 %1072  ;;  %v1075_v18 = vpop.permute.xlu0 %1074 }
 0x11f   : > { %v1092_v21 = vsel %vm1078_vm10, %v1073_v17, %v1075_v18  ;;  %v1091_v22 = vsel %vm1078_vm10, %v1071_v9, %v1073_v17  ;;  %v1340_v17 = vsub.s32 %v1337_v4, %v5509_v5  ;;  %v1525_v4 = vsub.s32 0, %v5509_v5 }
 0x120   : > { %4706 = vmatprep.subr.msk.mxu0 %vm997_vm0, %v1092_v21 }
 0x121   : > { %4707 = vmatpush1.msk.msra.mxu0 %vm997_vm0, %v1091_v22  ;;  %v1341_v21 = vrot.slane %v5485_v63, %v1340_v17  ;;  %v1356_v24 = vrot.slane %v5489_v8, %v1340_v17  ;;  %v1529_v17 = vsub.s32 1, %v5509_v5 }
 0x123   : > { %v1343_v6 = vmul.f32 %v1341_v21, %v1328_v20 }
 0x125   : > { %v1358_v63 = vadd.f32 %v1356_v24, %v1343_v6 }
 0x126   : > { %v1063_v34 = vpop.permute.xlu0 %1062 }
 0x127   : > { %v1370_v35 = vcombine.high %v1358_v63, %v1358_v63 }
 0x132   : > { %v1055_v38 = vpop.permute.xlu0 %1054 }
 0x136   : > { %v1077_v42 = vpop.permute.xlu1 %1076  ;;  %v1067_v43 = vpop.permute.xlu0 %1066 }
 0x137   : > { %v1093_v44 = vsel %vm1078_vm10, %v1075_v18, %v1077_v42 }
 0x138   : > { %4790 = vmatpush3.msk.msra.mxu1 %vm997_vm0, %v1093_v44 }
 0x139   : > { %4791 = vmatprep.subr.mxu1 %v6749_v47 }
 0x13a   : > { %v1065_v46 = vpop.permute.xlu1 %1064  ;;  %v1057_v10 = vpop.permute.xlu0 %1056 }
 0x13b   : > { %v1089_v12 = vsel %vm1078_vm10, %v1065_v46, %v1067_v43  ;;  %v1088_v48 = vsel %vm1078_vm10, %v1063_v34, %v1065_v46  ;;  %v1085_v61 = vsel %vm1078_vm10, %v1055_v38, %v1057_v10  ;;  %v1360_v34 = vld [vmem:[%s6797_s0] sm:$0xf]  ;;  %v1344_v38 = vmul.f32 %v1341_v21, %v1329_v30  ;;  %s6804_s0 = sld [smem:[#allocation26_spill]] }
 0x13c   : > { %1140 = vmatprep.subr.mxu0 %v1089_v12  ;;  %v1361_v11 = vunpack.c.l.bf16 %v1360_v34 }
 0x13d   : > { %1141 = vmatpush1.msra.mxu0 %v1088_v48  ;;  %v1359_v41 = vadd.f32 %v1356_v24, %v1344_v38 }
 0x13e   : > { %v1059_v55 = vpop.permute.xlu1 %1058 }
 0x13f   : > { %v1086_v57 = vsel %vm1078_vm10, %v1057_v10, %v1059_v55 }
 0x140   : > { %1142 = vmatprep.subr.mxu0 %v1086_v57 }
 0x141   : > { %1143 = vmatpush1.msra.mxu0 %v1085_v61  ;;  %v844_v7 = vld [vmem:[%s6804_s0] sm:$0x7]  ;;  %s6810_s0 = smov 90  }
 0x142   : > { %v1069_v1 = vpop.permute.xlu1 %1068  ;;  %v5590_v20 = vrot.slane %v844_v7, %v1525_v4  ;;  %v5595_v24 = vrot.slane %v844_v7, %v1529_v17 }
 0x143   : > { %v1090_v2 = vsel %vm1078_vm10, %v1067_v43, %v1069_v1 }
 0x144   : > { %4792 = vmatpush3.msra.mxu1 %v1090_v2  ;;  %v1533_v2 = vsub.s32 2, %v5509_v5  ;;  %6806 = vst [vmem:[#allocation17_spill] sm:$0xff] %v5590_v20  ;;  %6807 = vst [vmem:[#allocation18_spill] sm:$0xff] %v5595_v24 }
 0x145   : > { %4793 = vmatprep.subr.mxu1 %v6749_v47 }
 0x146   : > { %v5587_v14 = vrot.slane %v844_v7, %v1533_v2 }
 0x147   : > { %v1051_v9 = vpop.permute.xlu1 %1050  ;;  %v1049_v13 = vpop.permute.xlu0 %1048 }
 0x148   : > { %v1083_v18 = vsel %vm1078_vm10, %v1049_v13, %v1051_v9  ;;  %6805 = vst [vmem:[#allocation16_spill] sm:$0xff] %v5587_v14 }
 0x149   : > { %1144 = vmatprep.subr.mxu0 %v1083_v18 }
 0x14b   : > { %v1047_v19 = vpop.permute.xlu0 %1046 }
 0x14c   : > { %v1082_v22 = vsel %vm1078_vm10, %v1047_v19, %v1049_v13 }
 0x14d   : > { %1145 = vmatpush1.msra.mxu0 %v1082_v22 }
 0x14f   : > { %v1061_v23 = vpop.permute.xlu1 %1060 }
 0x150   : > { %v1087_v25 = vsel %vm1078_vm10, %v1059_v55, %v1061_v23 }
 0x151   : > { %4794 = vmatpush3.msra.mxu1 %v1087_v25 }
 0x152   : > { %4795 = vmatprep.subr.mxu1 %v6749_v47 }
 0x153   : > { %v1043_v27 = vpop.permute.xlu1 %1042  ;;  %v1041_v28 = vpop.permute.xlu0 %1040 }
 0x154   : > { %v1080_v29 = vsel %vm1078_vm10, %v1041_v28, %v1043_v27 }
 0x155   : > { %1146 = vmatprep.subr.mxu0 %v1080_v29 }
 0x157   : > { %v1053_v8 = vpop.permute.xlu1 %1052  ;;  %v1039_v33 = vpop.permute.xlu0 %1038 }
 0x158   : > { %v1079_v36 = vsel %vm1078_vm10, %v1039_v33, %v1041_v28  ;;  %v1084_v37 = vsel %vm1078_vm10, %v1051_v9, %v1053_v8 }
 0x159   : > { %1147 = vmatpush1.msra.mxu0 %v1079_v36  ;;  %4796 = vmatpush3.msra.mxu1 %v1084_v37 }
 0x15a   : > { %4708 = vmatmul.mubr.msk.f32.vlgmr.msra.gmra.mxu0 %vm1106_vm11, %v1015_v31  ;;  %4711 = vmatprep.subr.msk.mxu0 %vm997_vm0, %v1370_v35 }
 0x15b   : > { %4712 = vmatpush1.msk.msra.mxu0 %vm997_vm0, %v1358_v63  ;;  %v1045_v39 = vpop.permute.xlu0 %1044  ;;  %4797 = vmatprep.subr.mxu1 %v6749_v47 }
 0x15c   : > { %v1081_v40 = vsel %vm1078_vm10, %v1043_v27, %v1045_v39  ;;  %1445 = vmatprep.mubr.f32.mxu0 %v6749_v47  ;;  %4807 = vmatprep.subr.mxu0 %v6749_v47 }
 0x15d   : > { %4798 = vmatpush3.msra.mxu1 %v1081_v40 }
 0x15e   : > { %4800 = vmatmul.mubr.msk.f32.vlgmr.msra.gmra.mxu1 %vm1106_vm11, %v1015_v31  ;;  %4713 = vmatmul.mubr.msk.f32.vlgmr.msra.gmra.mxu0 %vm1371_vm12, %v1361_v11 }
 0x15f   : > { %4802 = vmatprep.subr.mxu1 %v6749_v47  ;;  %4804 = vmatprep.mubr.msk.f32.mxu1 %vm5100_vm9, %v6749_v47 }
 0x160   : > { %4803 = vmatpush3.msk.msra.mxu1 %vm997_vm0, %v1359_v41  ;;  %4809 = vmatprep.mubr.msk.f32.mxu0 %vm5100_vm9, %v6749_v47 }
 0x162   : > { %4805 = vmatmul.mubr.msk.f32.vlgmr.msra.gmra.mxu1 %vm1371_vm12, %v1361_v11 }
 0x163   : > { %2060 = vmatprep.mubr.f32.mxu1 %v6749_v47 }
 0x164   : > { %v1366_v42 = vpop.permute.xlu1 %1365 }
 0x168   : > { %v5547_v43 = vpop.permute.xlu0 %1563 }
 0x169   : > { %v1566_v44 = vmul.f32 0.0, %v5547_v43  ;;  %v5550_v45 = vpop.permute.xlu1 %1594 }
 0x16a   : > { %v1597_v46 = vmul.f32 0.0, %v5550_v45 }
 0x16b   : > { %1574 = vrot.lane.b32.xlu0 %v1566_v44, %s6728_s11  ;;  %s6803_s11 = smov 91  }
 0x16d   : > { %v5570_v59 = vpop.permute.xlu0 %1656 }
 0x16e   : > { %v5554_v12 = vpop.permute.xlu1 %1625 }
 0x16f   : > { %1605 = vrot.lane.b32.xlu0 %v1597_v46, %s6798_s29  ;;  %v1628_v48 = vmul.f32 0.0, %v5554_v12 }
 0x172   : > { %v5572_v60 = vpop.permute.xlu0 %1748 }
 0x173   : > { %1636 = vrot.lane.b32.xlu0 %v1628_v48, %s6799_s12  ;;  %v5559_v10 = vpop.permute.xlu1 %1686  ;;  %v1754_v61 = vmul.f32 0.0, %v5572_v60 }
 0x174   : > { %v1692_v53 = vmul.f32 0.0, %v5559_v10 }
 0x175   : > { %1765 = vrot.lane.b32.xlu1 %v1754_v61, %s6803_s11 }
 0x177   : > { %1703 = vrot.lane.b32.xlu0 %v1692_v53, %s6800_s1 }
 0x178   : > { %v5563_v55 = vpop.permute.xlu1 %1717 }
 0x179   : > { %v1723_v57 = vmul.f32 0.0, %v5563_v55 }
 0x17b   : > { %1734 = vrot.lane.b32.xlu0 %v1723_v57, %s6801_s4 }
 0x17d   : > { %v1780_v40 = vpop.permute.xlu1 %1779 }
 0x17f   : > { %1812 = vperm.xlu0 %4940, %v1809_v58  }
 0x1dd   : > { %v1575_v53 = vpop.permute.xlu0 %1574 }
 0x21a   : > { %v5576_v62 = vpop.f32.mrf.mxu0 }
 0x21c   : > { %v5578_v1 = vpop.f32.mrf.mxu0 }
 0x21e   : > { %v5581_v3 = vpop.f32.mrf.mxu1  ;;  %v1447_v9 = vpop.f32.mrf.mxu0 }
 0x21f   : > { %v1448_v19 = vadd.f32 %v1447_v9, %v1366_v42 }
 0x220   : > { %v4801_v13 = vpop.f32.mrf.mxu1  ;;  %v1449_v22 = vpop.f32.mrf.mxu0 }
 0x221   : > { %v5598_v25 = vmul.f32 %v5590_v20, %v1448_v19  ;;  %v1450_v26 = vadd.f32 %v1449_v22, %v1366_v42 }
 0x222   : > { %v1518_v18 = vpop.f32.mrf.mxu1 }
 0x223   : > { %v1519_v21 = vadd.f32 %v1518_v18, %v1366_v42  ;;  %v5607_v28 = vmul.f32 %v5595_v24, %v1450_v26  ;;  %v1659_v32 = vmul.f32 %v5570_v59, %v5598_v25  ;;  %v1567_v38 = vmul.f32 %v5547_v43, %v5598_v25 }
 0x224   : > { %v4806_v23 = vpop.f32.mrf.mxu1  ;;  %v1598_v39 = vmul.f32 %v5550_v45, %v5598_v25  ;;  %v1629_v42 = vmul.f32 %v5554_v12, %v5598_v25  ;;  %v1689_v44 = vmul.f32 %v5559_v10, %v5598_v25  ;;  %v1751_v46 = vmul.f32 %v5572_v60, %v5598_v25 }
 0x225   : > { %v5593_v6 = vmul.f32 %v5587_v14, %v1519_v21  ;;  %v1568_v29 = vmul.f32 %v5547_v43, %v5607_v28  ;;  %v1599_v31 = vmul.f32 %v5550_v45, %v5607_v28  ;;  %v1630_v33 = vmul.f32 %v5554_v12, %v5607_v28 }
 0x226   : > { %v1690_v35 = vmul.f32 %v5559_v10, %v5607_v28  ;;  %v1721_v37 = vmul.f32 %v5563_v55, %v5607_v28  ;;  %v1752_v11 = vmul.f32 %v5572_v60, %v5607_v28  ;;  %v1783_v41 = vmul.f32 %v1780_v40, %v5607_v28 }
 0x227   : > { %v1661_v27 = vmul.f32 %v5570_v59, %v5593_v6  ;;  %v1569_v5 = vmul.f32 %v5547_v43, %v5593_v6  ;;  %v1600_v63 = vmul.f32 %v5550_v45, %v5593_v6  ;;  %v1631_v30 = vmul.f32 %v5554_v12, %v5593_v6 }
 0x228   : > { %v1691_v8 = vmul.f32 %v5559_v10, %v5593_v6  ;;  %v1722_v34 = vmul.f32 %v5563_v55, %v5593_v6  ;;  %v1753_v36 = vmul.f32 %v5572_v60, %v5593_v6  ;;  %v1785_v43 = vmul.f32 0.0, %v1780_v40 }
 0x229   : > { %1669 = vrot.lane.b32.xlu0 %v1661_v27, %s6808_s9  ;;  %1580 = vrot.lane.b32.xlu1 %v1569_v5, %s6809_s6  ;;  %v1720_v45 = vmul.f32 %v5563_v55, %v5598_v25  ;;  %v1660_v12 = vmul.f32 %v5570_v59, %v5607_v28  ;;  %v1782_v48 = vmul.f32 %v1780_v40, %v5598_v25  ;;  %v1606_v55 = vpop.permute.xlu0 %1605  ;;  %v1552_v59 = vpop.permute.xlu1 %1551 }
 0x22a   : > { %v1784_v10 = vmul.f32 %v1780_v40, %v5593_v6 }
 0x22d   : > { %1665 = vrot.lane.b32.xlu0 %v1659_v32, %s6808_s9  ;;  %1611 = vrot.lane.b32.xlu1 %v1600_v63, %s6798_s29  ;;  %v1637_v57 = vpop.permute.xlu0 %1636  ;;  %v5679_v61 = vpop.permute.xlu1 %1765  ;;  %v1554_v63 = vmul.f32 0.0, %v1552_v59 }
 0x231   : > { %1578 = vrot.lane.b32.xlu0 %v1568_v29, %s6809_s6  ;;  %1642 = vrot.lane.b32.xlu1 %v1631_v30, %s6799_s12  ;;  %v1704_v58 = vpop.permute.xlu0 %1703 }
 0x235   : > { %1609 = vrot.lane.b32.xlu0 %v1599_v31, %s6798_s29  ;;  %1701 = vrot.lane.b32.xlu1 %v1691_v8, %s6800_s1  ;;  %v1735_v60 = vpop.permute.xlu0 %1734 }
 0x239   : > { %1640 = vrot.lane.b32.xlu0 %v1630_v33, %s6799_s12  ;;  %1732 = vrot.lane.b32.xlu1 %v1722_v34, %s6801_s4  ;;  %v5681_v2 = vpop.permute.xlu0 %1812 }
 0x23d   : > { %1699 = vrot.lane.b32.xlu0 %v1690_v35, %s6800_s1  ;;  %1763 = vrot.lane.b32.xlu1 %v1753_v36, %s6803_s11 }
 0x241   : > { %1730 = vrot.lane.b32.xlu0 %v1721_v37, %s6801_s4  ;;  %1576 = vrot.lane.b32.xlu1 %v1567_v38, %s6809_s6  ;;  %v1557_v37 = vmul.f32 %v1552_v59, %v5593_v6 }
 0x245   : > { %1761 = vrot.lane.b32.xlu0 %v1752_v11, %s6803_s11  ;;  %1607 = vrot.lane.b32.xlu1 %v1598_v39, %s6798_s29 }
 0x249   : > { %1792 = vrot.lane.b32.xlu0 %v1783_v41, %s6810_s0  ;;  %1638 = vrot.lane.b32.xlu1 %v1629_v42, %s6799_s12 }
 0x24d   : > { %1697 = vrot.lane.b32.xlu1 %v1689_v44, %s6800_s1  ;;  %1796 = vrot.lane.b32.xlu0 %v1785_v43, %s6810_s0  ;;  %v1556_v44 = vmul.f32 %v1552_v59, %v5607_v28 }
 0x251   : > { %1728 = vrot.lane.b32.xlu1 %v1720_v45, %s6801_s4  ;;  %1837 = vrot.lane.b32.xlu0 %v5595_v24, %s6808_s9  ;;  %v1555_v45 = vmul.f32 %v1552_v59, %v5598_v25 }
 0x255   : > { %1759 = vrot.lane.b32.xlu1 %v1751_v46, %s6803_s11 }
 0x259   : > { %1667 = vrot.lane.b32.xlu1 %v1660_v12, %s6808_s9 }
 0x25d   : > { %1790 = vrot.lane.b32.xlu1 %v1782_v48, %s6810_s0 }
 0x261   : > { %1794 = vrot.lane.b32.xlu1 %v1784_v10, %s6810_s0 }
 0x265   : > { %1835 = vrot.lane.b32.xlu1 %v5590_v20, %s6808_s9 }
 0x269   : > { %1839 = vrot.lane.b32.xlu1 %v5587_v14, %s6808_s9 }
 0x29b   : > { %v1581_v4 = vpop.permute.xlu1 %1580  ;;  %v1670_v7 = vpop.permute.xlu0 %1669 }
 0x29c   : > { %v1592_v38 = vadd.f32 %v1581_v4, %v1557_v37 }
 0x29f   : > { %v1612_v9 = vpop.permute.xlu1 %1611  ;;  %v1666_v17 = vpop.permute.xlu0 %1665 }
 0x2a0   : > { %v1623_v43 = vadd.f32 %v1612_v9, %v1592_v38 }
 0x2a3   : > { %v1643_v13 = vpop.permute.xlu1 %1642  ;;  %v1579_v19 = vpop.permute.xlu0 %1578 }
 0x2a4   : > { %v1584_v40 = vsel %vm875_vm8, %v1579_v19, %v1581_v4  ;;  %v1654_v48 = vadd.f32 %v1643_v13, %v1623_v43 }
 0x2a5   : > { %v1591_v10 = vadd.f32 %v1584_v40, %v1556_v44 }
 0x2a7   : > { %v1702_v18 = vpop.permute.xlu1 %1701  ;;  %v1610_v23 = vpop.permute.xlu0 %1609 }
 0x2a8   : > { %v1615_v46 = vsel %vm891_vm6, %v1610_v23, %v1612_v9  ;;  %v1707_v59 = vsel %vm943_vm4, %v1702_v18, %v1704_v58 }
 0x2ab   : > { %v1733_v21 = vpop.permute.xlu1 %1732  ;;  %v1641_v27 = vpop.permute.xlu0 %1640 }
 0x2af   : > { %v5683_v22 = vpop.permute.xlu1 %1763  ;;  %v1700_v8 = vpop.permute.xlu0 %1699 }
 0x2b0   : > { %v1769_v58 = vsel %vm977_vm3, %v5683_v22, %v5679_v61 }
 0x2b3   : > { %v1577_v26 = vpop.permute.xlu1 %1576  ;;  %v1731_v11 = vpop.permute.xlu0 %1730 }
 0x2b4   : > { %v1582_v32 = vsel %vm875_vm8, %v1575_v53, %v1577_v26  ;;  %v1583_v41 = vsel %vm875_vm8, %v1577_v26, %v1579_v19  ;;  %v1622_v19 = vadd.f32 %v1615_v46, %v1591_v10 }
 0x2b5   : > { %v1589_v31 = vadd.f32 %v1582_v32, %v1554_v63  ;;  %v1590_v6 = vadd.f32 %v1583_v41, %v1555_v45  ;;  %v1680_v63 = vadd.f32 %v1670_v7, %v1654_v48 }
 0x2b7   : > { %v1608_v5 = vpop.permute.xlu1 %1607  ;;  %v1762_v32 = vpop.permute.xlu0 %1761 }
 0x2b8   : > { %v1613_v29 = vsel %vm891_vm6, %v1606_v55, %v1608_v5  ;;  %v1614_v12 = vsel %vm891_vm6, %v1608_v5, %v1610_v23  ;;  %v1646_v55 = vsel %vm907_vm7, %v1641_v27, %v1643_v13  ;;  %v1738_v13 = vsel %vm961_vm2, %v1733_v21, %v1735_v60 }
 0x2b9   : > { %v1620_v34 = vadd.f32 %v1613_v29, %v1589_v31  ;;  %v1621_v26 = vadd.f32 %v1614_v12, %v1590_v6  ;;  %v1653_v28 = vadd.f32 %v1646_v55, %v1622_v19 }
 0x2bb   : > { %v1639_v30 = vpop.permute.xlu1 %1638  ;;  %v1793_v37 = vpop.permute.xlu0 %1792 }
 0x2bc   : > { %v1644_v33 = vsel %vm907_vm7, %v1637_v57, %v1639_v30  ;;  %v1645_v57 = vsel %vm907_vm7, %v1639_v30, %v1641_v27  ;;  %v1706_v27 = vsel %vm943_vm4, %v1700_v8, %v1702_v18 }
 0x2bd   : > { %v1651_v36 = vadd.f32 %v1644_v33, %v1620_v34  ;;  %v1652_v29 = vadd.f32 %v1645_v57, %v1621_v26 }
 0x2bf   : > { %v1698_v35 = vpop.permute.xlu1 %1697  ;;  %v1677_v42 = vadd.f32 %v1666_v17, %v1651_v36  ;;  %v1715_v36 = vadd.f32 %v1707_v59, %v1680_v63  ;;  %v1797_v12 = vpop.permute.xlu0 %1796 }
 0x2c0   : > { %v1705_v30 = vsel %vm943_vm4, %v1698_v35, %v1700_v8  ;;  %v1768_v8 = vsel %vm977_vm3, %v1762_v32, %v5683_v22 }
 0x2c1   : > { %v1712_v4 = vadd.f32 %v1698_v35, %v1677_v42  ;;  %v1746_v60 = vadd.f32 %v1738_v13, %v1715_v36 }
 0x2c3   : > { %v1729_v39 = vpop.permute.xlu1 %1728  ;;  %v1777_v45 = vadd.f32 %v1769_v58, %v1746_v60 }
 0x2c4   : > { %v1743_v9 = vadd.f32 %v1729_v39, %v1712_v4 }
 0x2c7   : > { %v1760_v53 = vpop.permute.xlu1 %1759 }
 0x2c8   : > { %v1774_v34 = vadd.f32 %v1760_v53, %v1743_v9  ;;  %v1767_v35 = vsel %vm977_vm3, %v1760_v53, %v1762_v32 }
 0x2cb   : > { %v1668_v25 = vpop.permute.xlu1 %1667 }
 0x2cc   : > { %v1671_v23 = vsel %vm924_vm5, %v1666_v17, %v1668_v25  ;;  %v1672_v5 = vsel %vm924_vm5, %v1668_v25, %v1670_v7  ;;  %v1737_v7 = vsel %vm961_vm2, %v1731_v11, %v1733_v21  ;;  %v1736_v17 = vsel %vm961_vm2, %v1729_v39, %v1731_v11 }
 0x2cd   : > { %v1678_v31 = vadd.f32 %v1671_v23, %v1652_v29  ;;  %v1679_v33 = vadd.f32 %v1672_v5, %v1653_v28  ;;  %v1838_v29 = vpop.permute.xlu0 %1837 }
 0x2cf   : > { %v1713_v38 = vadd.f32 %v1705_v30, %v1678_v31  ;;  %v1714_v40 = vadd.f32 %v1706_v27, %v1679_v33  ;;  %v1791_v41 = vpop.permute.xlu1 %1790 }
 0x2d0   : > { %v1805_v42 = vadd.f32 %v1791_v41, %v1774_v34  ;;  %v1798_v21 = vsel %vm993_vm1, %v1791_v41, %v1793_v37 }
 0x2d1   : > { %v1744_v43 = vadd.f32 %v1736_v17, %v1713_v38  ;;  %v1745_v18 = vadd.f32 %v1737_v7, %v1714_v40 }
 0x2d2   : > { %v1815_v44 = vadd.f32 %v5681_v2, %v1805_v42 }
 0x2d3   : > { %v1775_v46 = vadd.f32 %v1767_v35, %v1744_v43  ;;  %v1795_v48 = vpop.permute.xlu1 %1794  ;;  %v1776_v61 = vadd.f32 %v1768_v8, %v1745_v18  ;;  %v2207_v43 = vld [vmem:[%s6813_s16] sm:$0xff]  ;;  %s6839_s16 = smov %s6838_s8 }
 0x2d4   : > { %v1823_v10 = vrot.slane %v1815_v44, 4  ;;  %v1799_v11 = vsel %vm993_vm1, %v1793_v37, %v1795_v48  ;;  %v1800_v39 = vsel %vm993_vm1, %v1795_v48, %v1797_v12  ;;  %v2633_v18 = vld [vmem:[%s6814_s23] sm:$0xff] }
 0x2d5   : > { %v1806_v6 = vadd.f32 %v1798_v21, %v1775_v46  ;;  %v1807_v55 = vadd.f32 %v1799_v11, %v1776_v61  ;;  %v1808_v57 = vadd.f32 %v1800_v39, %v1777_v45  ;;  %v1878_v45 = vld [vmem:[%s6816_s30] sm:$0xf]  ;;  %s6818_s30 = sld [smem:[#allocation35_spill]] }
 0x2d6   : > { %v1831_v22 = vmul.f32 %v1823_v10, %v1815_v44  ;;  %v1877_v44 = vld [vmem:[%s6815_s5] sm:$0xf] }
 0x2d7   : > { %v1816_v53 = vadd.f32 %v5681_v2, %v1806_v6  ;;  %v1817_v4 = vadd.f32 %v5681_v2, %v1807_v55  ;;  %v1818_v19 = vadd.f32 %v5681_v2, %v1808_v57  ;;  %v5718_v26 = vpop.permute.xlu1 %1835  ;;  %v1966_v6 = vld [vmem:[%s6817_s2] sm:$0xff] }
 0x2d8   : > { %v1847_v32 = vmul.f32 %v5718_v26, %v1831_v22  ;;  %v5726_v5 = vsel %vm924_vm5, %v5718_v26, %v1838_v29  ;;  %v1016_v55 = vld [vmem:[%s6695_s13] sm:$0xff] }
 0x2d9   : > { %v1824_v63 = vrot.slane %v1816_v53, 4  ;;  %v1826_v28 = vrot.slane %v1818_v19, 4  ;;  %v1825_v25 = vrot.slane %v1817_v4, 4  ;;  %v2137_v57 = vld [vmem:[%s6696_s14] sm:$0xff] }
 0x2da   : > { %1855 = vrot.lane.b32.xlu0 %v1847_v32, %s6811_s10  ;;  %v2555_v32 = vld [vmem:[%s6697_s15] sm:$0xff] }
 0x2db   : > { %v1832_v59 = vmul.f32 %v1824_v63, %v1816_v53  ;;  %v5722_v9 = vpop.permute.xlu1 %1839  ;;  %v1833_v23 = vmul.f32 %v1825_v25, %v1817_v4  ;;  %v1834_v31 = vmul.f32 %v1826_v28, %v1818_v19  ;;  %v2229_v53 = vld [vmem:[%s6701_s19] sm:$0xff]  ;;  %v2230_v4 = vld [vmem:[%s6701_s19 + $0x8] sm:$0xff] }
 0x2dc   : > { %6812 = vst [vmem:[#allocation19_spill] sm:$0xff] %v5722_v9  ;;  %v5730_v2 = vsel %vm924_vm5, %v1838_v29, %v5722_v9  ;;  %v2405_v19 = vld [vmem:[%s6703_s21] sm:$0xff] }
 0x2dd   : > { %v1848_v33 = vmul.f32 %v5726_v5, %v1832_v59  ;;  %v1849_v13 = vmul.f32 %v5730_v2, %v1833_v23  ;;  %v1850_v27 = vmul.f32 %v5722_v9, %v1834_v31  ;;  %v2624_v63 = vld [vmem:[%s6704_s22] sm:$0xff] }
 0x2de   : > { %v1964_v25 = vld [vmem:[%s6818_s30] sm:$0xf] }
 0x2df   : > { %1859 = vrot.lane.b32.xlu0 %v1849_v13, %s6811_s10  ;;  %1857 = vrot.lane.b32.xlu1 %v1848_v33, %s6811_s10 }
 0x2e3   : > { %1861 = vrot.lane.b32.xlu1 %v1850_v27, %s6811_s10 }
 0x34c   : > { %v1856_v30 = vpop.permute.xlu0 %1855 }
 0x351   : > { %v1858_v34 = vpop.permute.xlu1 %1857  ;;  %v1860_v36 = vpop.permute.xlu0 %1859 }
 0x352   : > { %v1863_v37 = vsel %vm1078_vm10, %v1856_v30, %v1858_v34  ;;  %v1864_v38 = vsel %vm1078_vm10, %v1858_v34, %v1860_v36  ;;  %v5809_v30 = vld [vmem:[%s6700_s18] sm:$0xff]  }
 0x353   : > { %v1869_v40 = vsel %vm997_vm0, %v1863_v37, 0.0  ;;  %v1870_v41 = vsel %vm997_vm0, %v1864_v38, 0.0  ;;  %v4752_v34 = vunpack.c.l.bf16 %v5809_v30 }
 0x354   : > { %v1871_v7 = vadd.f32 %v1870_v41, %v1869_v40 }
 0x355   : > { %v1862_v58 = vpop.permute.xlu1 %1861 }
 0x356   : > { %v1865_v17 = vsel %vm1078_vm10, %v1860_v36, %v1862_v58 }
 0x357   : > { %v1872_v42 = vsel %vm997_vm0, %v1865_v17, 0.0 }
 0x358   : > { %v1873_v60 = vadd.f32 %v1872_v42, %v1871_v7 }
 0x35a   : > { %1874 = vadd.xlane.f32.xlu0 %v1873_v60 }
 0x370   : > { %2210 = vperm.xlu0 %4940, %v2207_v43  }
 0x374   : > { %2636 = vperm.xlu0 %4940, %v2633_v18  }
 0x378   : > { %4942 = vset.pattern.permute.xlu0 %v5102_v49 }
 0x3e3   : > { %v1875_v8 = vpop.xlane.xlu0 %1874 }
 0x3e4   : > { %v1876_v35 = vmul.f32 0.00390625, %v1875_v8 }
 0x3e6   : > { %4808 = vmatpush3.msk.msra.mxu0 %vm997_vm0, %v1876_v35 }
 0x3e7   : > { %4810 = vmatmul.mubr.msk.f32.vlgmr.msra.gmra.mxu0 %vm1371_vm12, %v1877_v44  ;;  %4812 = vmatprep.subr.mxu0 %v6749_v47 }
 0x3e8   : > { %4814 = vmatprep.mubr.msk.f32.mxu0 %vm5100_vm9, %v6749_v47 }
 0x4a7   : > { %v1951_v46 = vpop.f32.mrf.mxu0 }
 0x4a8   : > { %v1952_v12 = vadd.f32 %v1951_v46, %v1878_v45 }
 0x4a9   : > { %v4811_v48 = vpop.f32.mrf.mxu0 }
 0x4aa   : > { %1957 = vperm.xlu1 %4939, %v1952_v12  }
 0x525   : > { %v1958_v61 = vpop.permute.xlu1 %1957 }
 0x526   : > { %v1961_v21 = vmul.f32 %v1958_v61, %v1832_v59  ;;  %v1962_v10 = vmul.f32 %v1958_v61, %v1833_v23  ;;  %v1960_v11 = vmul.f32 %v1958_v61, %v1831_v22  ;;  %v1963_v39 = vmul.f32 %v1958_v61, %v1834_v31  ;;  %v2216_v22 = vld [vmem:[%s6699_s17] sm:$0xff] }
 0x527   : > { %v1965_v23 = vunpack.c.l.bf16 %v1964_v25 }
 0x528   : > { %1978 = vrot.lane.b32.xlu1 %v1961_v21, %s6811_s10 }
 0x52c   : > { %1980 = vrot.lane.b32.xlu1 %v1962_v10, %s6811_s10 }
 0x530   : > { %1976 = vrot.lane.b32.xlu1 %v1960_v11, %s6811_s10 }
 0x534   : > { %1982 = vrot.lane.b32.xlu1 %v1963_v39, %s6811_s10 }
 0x538   : > { %1969 = vperm.xlu1 %4939, %v1966_v6  }
 0x53c   : > { %1019 = vperm.xlu1 %4939, %v1016_v55  }
 0x540   : > { %2140 = vperm.xlu1 %4939, %v2137_v57  }
 0x544   : > { %2219 = vperm.xlu1 %4939, %v2216_v22  }
 0x548   : > { %2233 = vperm.xlu1 %4939, %v2229_v53  }
 0x54c   : > { %2238 = vperm.xlu1 %4939, %v2230_v4  }
 0x550   : > { %2408 = vperm.xlu1 %4939, %v2405_v19  }
 0x554   : > { %2558 = vperm.xlu1 %4939, %v2555_v32  }
 0x558   : > { %2627 = vperm.xlu1 %4939, %v2624_v63  }
 0x55c   : > { %4941 = vset.pattern.permute.xlu1 %v5101_v15 }
 0x59a   : > { %v1979_v28 = vpop.permute.xlu1 %1978 }
 0x59e   : > { %v1981_v29 = vpop.permute.xlu1 %1980 }
 0x59f   : > { %v1985_v59 = vsel %vm1078_vm10, %v1979_v28, %v1981_v29 }
 0x5a0   : > { %4718 = vmatprep.subr.msk.mxu1 %vm997_vm0, %v1985_v59 }
 0x5a2   : > { %v1977_v31 = vpop.permute.xlu1 %1976 }
 0x5a3   : > { %v1984_v33 = vsel %vm1078_vm10, %v1977_v31, %v1979_v28 }
 0x5a4   : > { %4719 = vmatpush1.msk.msra.mxu1 %vm997_vm0, %v1984_v33 }
 0x5a5   : > { %4720 = vmatmul.mubr.msk.f32.vlgmr.msra.gmra.mxu1 %vm1371_vm12, %v1965_v23 }
 0x5a6   : > { %v1983_v13 = vpop.permute.xlu1 %1982  ;;  %2312 = vmatprep.mubr.f32.mxu1 %v6749_v47 }
 0x5a7   : > { %v1986_v27 = vsel %vm1078_vm10, %v1981_v29, %v1983_v13 }
 0x5a8   : > { %4813 = vmatpush3.msk.msra.mxu0 %vm997_vm0, %v1986_v27 }
 0x5a9   : > { %4815 = vmatmul.mubr.msk.f32.vlgmr.msra.gmra.mxu0 %vm1371_vm12, %v1965_v23 }
 0x5aa   : > { %4819 = vmatprep.mubr.msk.f32.mxu0 %vm2241_vm13, %v4752_v34 }
 0x5b3   : > { %v1970_v36 = vpop.permute.xlu1 %1969 }
 0x5b7   : > { %v1020_v37 = vpop.permute.xlu1 %1019 }
 0x5b8   : > { %v1183_v7 = vadd.f32 %v5576_v62, %v1020_v37  ;;  %v1185_v43 = vadd.f32 %v5578_v1, %v1020_v37  ;;  %v1254_v45 = vadd.f32 %v5581_v3, %v1020_v37 }
 0x5bb   : > { %v2141_v41 = vpop.permute.xlu1 %2140 }
 0x665   : > { %v2062_v38 = vpop.f32.mrf.mxu1 }
 0x666   : > { %v2063_v40 = vadd.f32 %v2062_v38, %v1970_v36 }
 0x667   : > { %v2064_v58 = vpop.f32.mrf.mxu1 }
 0x668   : > { %v2143_v17 = vmul.f32 %v2141_v41, %v2063_v40  ;;  %v2065_v42 = vadd.f32 %v2064_v58, %v1970_v36 }
 0x669   : > { %v2133_v60 = vpop.f32.mrf.mxu0 }
 0x66a   : > { %v5817_v18 = vadd.f32 %v2143_v17, %v1183_v7  ;;  %v2144_v8 = vmul.f32 %v2141_v41, %v2065_v42  ;;  %v2134_v35 = vadd.f32 %v2133_v60, %v1970_v36 }
 0x66b   : > { %v4816_v44 = vpop.f32.mrf.mxu0 }
 0x66c   : > { %v2149_v46 = vrot.slane %v5817_v18, 4  ;;  %v5821_v12 = vadd.f32 %v2144_v8, %v1185_v43  ;;  %v2145_v48 = vmul.f32 %v2141_v41, %v2134_v35 }
 0x66e   : > { %v2150_v61 = vadd.f32 %v2149_v46, %v5817_v18  ;;  %v2155_v62 = vrot.slane %v5821_v12, 4  ;;  %v5825_v21 = vadd.f32 %v2145_v48, %v1254_v45 }
 0x670   : > { %v2151_v10 = vrot.slane %v2150_v61, 2  ;;  %v2156_v1 = vadd.f32 %v2155_v62, %v5821_v12  ;;  %v2161_v11 = vrot.slane %v5825_v21, 4 }
 0x672   : > { %v2152_v39 = vadd.f32 %v2151_v10, %v2150_v61  ;;  %v2157_v6 = vrot.slane %v2156_v1, 2  ;;  %v2162_v3 = vadd.f32 %v2161_v11, %v5825_v21 }
 0x674   : > { %v2153_v55 = vrot.slane %v2152_v39, 1  ;;  %v2163_v57 = vrot.slane %v2162_v3, 2  ;;  %v2158_v22 = vadd.f32 %v2157_v6, %v2156_v1 }
 0x676   : > { %v2154_v53 = vadd.f32 %v2153_v55, %v2152_v39  ;;  %v2159_v4 = vrot.slane %v2158_v22, 1  ;;  %v2164_v19 = vadd.f32 %v2163_v57, %v2162_v3 }
 0x678   : > { %v2168_v32 = vmul.f32 0.125, %v2154_v53  ;;  %v2160_v63 = vadd.f32 %v2159_v4, %v2158_v22  ;;  %v2165_v28 = vrot.slane %v2164_v19, 1  ;;  %v2211_v53 = vpop.permute.xlu0 %2210 }
 0x67a   : > { %v2171_v29 = vsub.f32 %v5817_v18, %v2168_v32  ;;  %v2169_v25 = vmul.f32 0.125, %v2160_v63  ;;  %v2166_v59 = vadd.f32 %v2165_v28, %v2164_v19 }
 0x67c   : > { %v2174_v23 = vmul.f32 %v2171_v29, %v2171_v29  ;;  %v2172_v31 = vsub.f32 %v5821_v12, %v2169_v25  ;;  %v2170_v33 = vmul.f32 0.125, %v2166_v59  ;;  %v2220_v25 = vpop.permute.xlu1 %2219 }
 0x67e   : > { %v2177_v13 = vrot.slane %v2174_v23, 4  ;;  %v2175_v27 = vmul.f32 %v2172_v31, %v2172_v31  ;;  %v2173_v36 = vsub.f32 %v5825_v21, %v2170_v33 }
 0x680   : > { %v2178_v37 = vadd.f32 %v2177_v13, %v2174_v23  ;;  %v2183_v38 = vrot.slane %v2175_v27, 4  ;;  %v2176_v40 = vmul.f32 %v2173_v36, %v2173_v36 }
 0x682   : > { %v2179_v41 = vrot.slane %v2178_v37, 2  ;;  %v2184_v58 = vadd.f32 %v2183_v38, %v2175_v27  ;;  %v2189_v7 = vrot.slane %v2176_v40, 4  ;;  %v4753_v27 = vunpack.c.h.bf16 %v5809_v30 }
 0x684   : > { %v2180_v17 = vadd.f32 %v2179_v41, %v2178_v37  ;;  %v2185_v42 = vrot.slane %v2184_v58, 2  ;;  %v2190_v60 = vadd.f32 %v2189_v7, %v2176_v40  ;;  %v2403_v37 = vld [vmem:[%s6702_s20] sm:$0xf] }
 0x686   : > { %v2181_v43 = vrot.slane %v2180_v17, 1  ;;  %v2186_v8 = vadd.f32 %v2185_v42, %v2184_v58  ;;  %v2191_v35 = vrot.slane %v2190_v60, 2  ;;  %v2404_v42 = vunpack.c.l.bf16 %v2403_v37 }
 0x688   : > { %v2182_v44 = vadd.f32 %v2181_v43, %v2180_v17  ;;  %v2187_v45 = vrot.slane %v2186_v8, 1  ;;  %v2192_v46 = vadd.f32 %v2191_v35, %v2190_v60 }
 0x68a   : > { %v2195_v48 = vmul.f32 0.125, %v2182_v44  ;;  %v2188_v61 = vadd.f32 %v2187_v45, %v2186_v8  ;;  %v2193_v62 = vrot.slane %v2192_v46, 1 }
 0x68c   : > { %v2198_v10 = vadd.f32 1e-06, %v2195_v48  ;;  %v2196_v1 = vmul.f32 0.125, %v2188_v61  ;;  %v2194_v11 = vadd.f32 %v2193_v62, %v2192_v46  ;;  %v2839_v46 = vld [vmem:[%s6707_s25 + $0x8] sm:$0xff]  ;;  %v2838_v48 = vld [vmem:[%s6707_s25] sm:$0xff] }
 0x68d   : > { %2897 = vperm.xlu1 %4941, %v2839_v46   ;;  %2990 = vperm.xlu0 %4942, %v2839_v46  }
 0x68e   : > { %4999 = vrsqrt.f32 %v2198_v10  ;;  %v2199_v39 = vadd.f32 1e-06, %v2196_v1  ;;  %v2197_v6 = vmul.f32 0.125, %v2194_v11 }
 0x690   : > { %5001 = vrsqrt.f32 %v2199_v39  ;;  %v2200_v3 = vadd.f32 1e-06, %v2197_v6 }
 0x691   : > { %2893 = vperm.xlu1 %4941, %v2838_v48   ;;  %2986 = vperm.xlu0 %4942, %v2838_v48  }
 0x692   : > { %5003 = vrsqrt.f32 %v2200_v3 }
 0x695   : > { %4943 = vset.pattern.permute.xlu1 %v6748_v51  ;;  %4945 = vset.pattern.permute.xlu0 %v6748_v51 }
 0x696   : > { %3083 = vperm.xlu1 %4943, %v2839_v46   ;;  %3079 = vperm.xlu0 %4945, %v2838_v48  }
 0x69a   : > { %4944 = vset.pattern.permute.xlu1 %v6747_v50  ;;  %4948 = vset.pattern.permute.xlu0 %v6744_v54 }
 0x69b   : > { %v5000_v55 = vpop.eup %4999  ;;  %3176 = vperm.xlu1 %4944, %v2839_v46   ;;  %3359 = vperm.xlu0 %4948, %v2839_v46  }
 0x69c   : > { %v2204_v57 = vmul.f32 %v5000_v55, %v2171_v29  ;;  %v2234_v29 = vpop.permute.xlu1 %2233 }
 0x69d   : > { %v5002_v22 = vpop.eup %5001 }
 0x69e   : > { %v2205_v4 = vmul.f32 %v5002_v22, %v2172_v31  ;;  %v2213_v32 = vmul.f32 %v2211_v53, %v2204_v57 }
 0x69f   : > { %v5004_v19 = vpop.eup %5003  ;;  %4946 = vset.pattern.permute.xlu1 %v6746_v52  ;;  %3355 = vperm.xlu0 %4948, %v2838_v48  }
 0x6a0   : > { %v2214_v63 = vmul.f32 %v2211_v53, %v2205_v4  ;;  %v2206_v28 = vmul.f32 %v5004_v19, %v2173_v36  ;;  %v2222_v33 = vadd.f32 %v2220_v25, %v2213_v32  ;;  %3266 = vperm.xlu1 %4946, %v2839_v46  }
 0x6a2   : > { %v2223_v59 = vadd.f32 %v2220_v25, %v2214_v63  ;;  %v2215_v23 = vmul.f32 %v2211_v53, %v2206_v28 }
 0x6a3   : > { %4952 = vset.pattern.permute.xlu0 %v6745_v16 }
 0x6a4   : > { %2278 = vmatprep.subr.mxu1 %v2223_v59  ;;  %v2224_v13 = vadd.f32 %v2220_v25, %v2215_v23  ;;  %4947 = vset.pattern.permute.xlu1 %v6747_v50 }
 0x6a5   : > { %2279 = vmatpush1.msra.mxu1 %v2222_v33  ;;  %3448 = vperm.xlu0 %4952, %v2838_v48  }
 0x6a6   : > { %4723 = vmatmul.mubr.msk.f32.vlgmr.msra.gmra.mxu1 %vm2241_vm13, %v4752_v34  ;;  %4817 = vmatprep.subr.mxu0 %v2224_v13  ;;  %v2239_v34 = vpop.permute.xlu1 %2238 }
 0x6a7   : > { %4818 = vmatpush3.msra.mxu0 %v2224_v13  ;;  %2318 = vmatprep.mubr.f32.mxu1 %v6749_v47 }
 0x6a8   : > { %4820 = vmatmul.mubr.msk.f32.vlgmr.msra.gmra.mxu0 %vm2241_vm13, %v4753_v27  ;;  %4822 = vmatprep.subr.mxu1 %v6749_v47 }
 0x6a9   : > { %2478 = vmatprep.mubr.f32.mxu0 %v6749_v47  ;;  %3172 = vperm.xlu1 %4947, %v2838_v48  }
 0x6aa   : > { %4724 = vmatmul.mubr.msk.f32.gmra.mxu1 %vm2241_vm13, %v4753_v27  ;;  %4954 = vset.pattern.permute.xlu0 %v6743_v0  ;;  %v2409_v61 = vpop.permute.xlu1 %2408 }
 0x6ab   : > { %4824 = vmatprep.mubr.msk.f32.mxu1 %vm5100_vm9, %v6749_v47  ;;  %2855 = vperm.xlu0 %4954, %v2838_v48  }
 0x6ad   : > { %4949 = vset.pattern.permute.xlu1 %v6746_v52 }
 0x6ae   : > { %3262 = vperm.xlu1 %4949, %v2838_v48   ;;  %v2559_v1 = vpop.permute.xlu1 %2558 }
 0x6af   : > { %4965 = vset.pattern.permute.xlu0 %v5101_v15 }
 0x6b2   : > { %4950 = vset.pattern.permute.xlu1 %v6745_v16 }
 0x6b3   : > { %3452 = vperm.xlu1 %4950, %v2839_v46  }
 0x6b7   : > { %4951 = vset.pattern.permute.xlu1 %v6741_v56 }
 0x6b8   : > { %3545 = vperm.xlu1 %4951, %v2839_v46  }
 0x6bc   : > { %3541 = vperm.xlu1 %4951, %v2838_v48  }
 0x6c0   : > { %4953 = vset.pattern.permute.xlu1 %v6743_v0 }
 0x6c1   : > { %2860 = vperm.xlu1 %4953, %v2839_v46  }
 0x6c5   : > { %4966 = vset.pattern.permute.xlu1 %v5102_v49 }
 0x766   : > { %v2314_v31 = vpop.f32.mrf.mxu1 }
 0x767   : > { %v2315_v35 = vadd.f32 %v2314_v31, %v2234_v29 }
 0x768   : > { %v2316_v30 = vpop.f32.mrf.mxu1  ;;  %v4821_v36 = vpop.f32.mrf.mxu0 }
 0x769   : > { %v2397_v41 = vadd.f32 %v4821_v36, %v2239_v34  ;;  %v2317_v60 = vadd.f32 %v2316_v30, %v2234_v29 }
 0x76a   : > { %v2320_v38 = vpop.f32.mrf.mxu1  ;;  %v2391_v40 = vpop.f32.mrf.mxu0 }
 0x76b   : > { %v2392_v58 = vadd.f32 %v2391_v40, %v2234_v29  ;;  %v2321_v7 = vadd.f32 %v2320_v38, %v2239_v34 }
 0x76c   : > { %v2322_v17 = vpop.f32.mrf.mxu1 }
 0x76d   : > { %v2402_v43 = vmul.f32 %v2397_v41, %v2392_v58  ;;  %v2323_v8 = vadd.f32 %v2322_v17, %v2239_v34  ;;  %v2400_v45 = vmul.f32 %v2321_v7, %v2315_v35 }
 0x76f   : > { %v2401_v44 = vmul.f32 %v2323_v8, %v2317_v60  ;;  %4823 = vmatpush3.msra.mxu1 %v2402_v43 }
 0x770   : > { %4825 = vmatmul.mubr.msk.f32.vlgmr.msra.gmra.mxu1 %vm2241_vm13, %v2404_v42  ;;  %4827 = vmatprep.subr.mxu1 %v6749_v47 }
 0x771   : > { %2444 = vmatprep.subr.mxu0 %v2401_v44  ;;  %4829 = vmatprep.mubr.msk.f32.mxu1 %vm5100_vm9, %v6749_v47 }
 0x772   : > { %2445 = vmatpush1.msra.mxu0 %v2400_v45 }
 0x773   : > { %4727 = vmatmul.mubr.msk.f32.vlgmr.msra.gmra.mxu0 %vm2241_vm13, %v2404_v42 }
 0x774   : > { %2721 = vmatprep.mubr.f32.mxu0 %v6749_v47 }
 0x830   : > { %v2551_v62 = vpop.f32.mrf.mxu1 }
 0x831   : > { %v2552_v10 = vadd.f32 %v2551_v62, %v2409_v61 }
 0x832   : > { %v4826_v11 = vpop.f32.mrf.mxu1 }
 0x833   : > { %v2563_v39 = vmul.f32 %v2559_v1, %v2552_v10  ;;  %v2480_v6 = vpop.f32.mrf.mxu0 }
 0x834   : > { %v2481_v15 = vadd.f32 %v2480_v6, %v2409_v61 }
 0x835   : > { %v5874_v3 = vadd.f32 %v2563_v39, %v5825_v21  ;;  %v2482_v55 = vpop.f32.mrf.mxu0 }
 0x836   : > { %v2561_v57 = vmul.f32 %v2559_v1, %v2481_v15  ;;  %v2483_v22 = vadd.f32 %v2482_v55, %v2409_v61 }
 0x837   : > { %6819 = vst [vmem:[#allocation20_spill] sm:$0xff] %v5874_v3  ;;  %v2579_v53 = vrot.slane %v5874_v3, 4 }
 0x838   : > { %v5878_v4 = vadd.f32 %v2561_v57, %v5817_v18  ;;  %v2562_v19 = vmul.f32 %v2559_v1, %v2483_v22 }
 0x839   : > { %v2580_v49 = vadd.f32 %v2579_v53, %v5874_v3 }
 0x83a   : > { %6820 = vst [vmem:[#allocation21_spill] sm:$0xff] %v5878_v4  ;;  %v2567_v32 = vrot.slane %v5878_v4, 4  ;;  %v5883_v63 = vadd.f32 %v2562_v19, %v5821_v12 }
 0x83b   : > { %v2581_v28 = vrot.slane %v2580_v49, 2 }
 0x83c   : > { %6821 = vst [vmem:[#allocation22_spill] sm:$0xff] %v5883_v63  ;;  %v2568_v21 = vadd.f32 %v2567_v32, %v5878_v4  ;;  %v2573_v25 = vrot.slane %v5883_v63, 4 }
 0x83d   : > { %v2582_v59 = vadd.f32 %v2581_v28, %v2580_v49 }
 0x83e   : > { %v2569_v23 = vrot.slane %v2568_v21, 2  ;;  %v2574_v33 = vadd.f32 %v2573_v25, %v5883_v63 }
 0x83f   : > { %v2583_v13 = vrot.slane %v2582_v59, 1 }
 0x840   : > { %v2570_v18 = vadd.f32 %v2569_v23, %v2568_v21  ;;  %v2575_v27 = vrot.slane %v2574_v33, 2  ;;  %v4755_v23 = vld [vmem:[%s6706_s24] sm:$0xff]  }
 0x841   : > { %v2584_v29 = vadd.f32 %v2583_v13, %v2582_v59 }
 0x842   : > { %v2571_v31 = vrot.slane %v2570_v18, 1  ;;  %v2576_v30 = vadd.f32 %v2575_v27, %v2574_v33  ;;  %v2628_v33 = vpop.permute.xlu1 %2627  ;;  %v2637_v27 = vpop.permute.xlu0 %2636 }
 0x843   : > { %v2587_v36 = vmul.f32 0.125, %v2584_v29  ;;  %v4756_v29 = vunpack.c.l.bf16 %v4755_v23 }
 0x844   : > { %v2572_v34 = vadd.f32 %v2571_v31, %v2570_v18  ;;  %v2577_v37 = vrot.slane %v2576_v30, 1 }
 0x845   : > { %v2590_v12 = vsub.f32 %v5874_v3, %v2587_v36 }
 0x846   : > { %v2585_v38 = vmul.f32 0.125, %v2572_v34  ;;  %v2578_v40 = vadd.f32 %v2577_v37, %v2576_v30 }
 0x847   : > { %v2593_v41 = vmul.f32 %v2590_v12, %v2590_v12 }
 0x848   : > { %v2588_v58 = vsub.f32 %v5878_v4, %v2585_v38  ;;  %v2586_v7 = vmul.f32 0.125, %v2578_v40  ;;  %v4757_v40 = vunpack.c.h.bf16 %v4755_v23 }
 0x849   : > { %v2606_v17 = vrot.slane %v2593_v41, 4 }
 0x84a   : > { %v2591_v42 = vmul.f32 %v2588_v58, %v2588_v58  ;;  %v2589_v60 = vsub.f32 %v5883_v63, %v2586_v7  ;;  %v5904_v7 = vpop.permute.xlu0 %2990 }
 0x84b   : > { %v2607_v43 = vadd.f32 %v2606_v17, %v2593_v41  ;;  %v3001_v17 = vmul.f32 0.0, %v5904_v7 }
 0x84c   : > { %v2594_v8 = vrot.slane %v2591_v42, 4  ;;  %v2592_v35 = vmul.f32 %v2589_v60, %v2589_v60 }
 0x84d   : > { %v2608_v44 = vrot.slane %v2607_v43, 2  ;;  %3029 = vrot.lane.b32.xlu0 %v3001_v17, %s6798_s29 }
 0x84e   : > { %v2595_v45 = vadd.f32 %v2594_v8, %v2591_v42  ;;  %v2600_v46 = vrot.slane %v2592_v35, 4 }
 0x84f   : > { %v2609_v48 = vadd.f32 %v2608_v44, %v2607_v43  ;;  %v5914_v43 = vpop.permute.xlu0 %2986 }
 0x850   : > { %v2596_v61 = vrot.slane %v2595_v45, 2  ;;  %v2601_v62 = vadd.f32 %v2600_v46, %v2592_v35 }
 0x851   : > { %v2610_v10 = vrot.slane %v2609_v48, 1 }
 0x852   : > { %v2597_v1 = vadd.f32 %v2596_v61, %v2595_v45  ;;  %v2602_v11 = vrot.slane %v2601_v62, 2 }
 0x853   : > { %v2611_v39 = vadd.f32 %v2610_v10, %v2609_v48  ;;  %v5921_v44 = vpop.permute.xlu0 %3079  ;;  %v2997_v48 = vmul.f32 0.0, %v5914_v43 }
 0x854   : > { %v2598_v6 = vrot.slane %v2597_v1, 1  ;;  %v2603_v15 = vadd.f32 %v2602_v11, %v2601_v62  ;;  %v3090_v46 = vmul.f32 0.0, %v5921_v44 }
 0x855   : > { %v2614_v55 = vmul.f32 0.125, %v2611_v39 }
 0x856   : > { %v2599_v57 = vadd.f32 %v2598_v6, %v2597_v1  ;;  %v2604_v22 = vrot.slane %v2603_v15, 1 }
 0x857   : > { %v2617_v53 = vadd.f32 1e-06, %v2614_v55  ;;  %v5930_v62 = vpop.permute.xlu0 %3359 }
 0x858   : > { %v2612_v19 = vmul.f32 0.125, %v2599_v57  ;;  %v2605_v49 = vadd.f32 %v2604_v22, %v2603_v15  ;;  %v3373_v10 = vmul.f32 0.0, %v5930_v62 }
 0x859   : > { %5005 = vrsqrt.f32 %v2617_v53 }
 0x85a   : > { %v2615_v32 = vadd.f32 1e-06, %v2612_v19  ;;  %v2613_v28 = vmul.f32 0.125, %v2605_v49 }
 0x85b   : > { %v5945_v55 = vpop.permute.xlu0 %3355 }
 0x85c   : > { %5007 = vrsqrt.f32 %v2615_v32  ;;  %v2616_v21 = vadd.f32 1e-06, %v2613_v28  ;;  %v3369_v22 = vmul.f32 0.0, %v5945_v55 }
 0x85e   : > { %5009 = vrsqrt.f32 %v2616_v21 }
 0x866   : > { %v5006_v25 = vpop.eup %5005 }
 0x867   : > { %v2623_v59 = vmul.f32 %v5006_v25, %v2590_v12 }
 0x869   : > { %v5008_v13 = vpop.eup %5007  ;;  %v2632_v18 = vmul.f32 %v2628_v33, %v2623_v59 }
 0x86a   : > { %v2621_v31 = vmul.f32 %v5008_v13, %v2588_v58  ;;  %v5902_v58 = vpop.permute.xlu1 %2897 }
 0x86b   : > { %v5010_v30 = vpop.eup %5009  ;;  %v2641_v36 = vadd.f32 %v2637_v27, %v2632_v18  ;;  %v2908_v42 = vmul.f32 0.0, %v5902_v58 }
 0x86c   : > { %v2622_v34 = vmul.f32 %v5010_v30, %v2589_v60  ;;  %v2630_v37 = vmul.f32 %v2628_v33, %v2621_v31 }
 0x86d   : > { %4828 = vmatpush3.msra.mxu1 %v2641_v36  ;;  %2936 = vrot.lane.b32.xlu1 %v2908_v42, %s6809_s6 }
 0x86e   : > { %4830 = vmatmul.mubr.msk.f32.vlgmr.msra.gmra.mxu1 %vm2241_vm13, %v4756_v29  ;;  %v2631_v38 = vmul.f32 %v2628_v33, %v2622_v34  ;;  %4838 = vmatprep.subr.mxu1 %v6749_v47  ;;  %v2639_v41 = vadd.f32 %v2637_v27, %v2630_v37  ;;  %v5912_v60 = vpop.permute.xlu1 %2893 }
 0x86f   : > { %4832 = vmatprep.mubr.msk.f32.mxu1 %vm5100_vm9, %v6749_v47  ;;  %v2904_v8 = vmul.f32 0.0, %v5912_v60 }
 0x870   : > { %v2640_v12 = vadd.f32 %v2637_v27, %v2631_v38  ;;  %v5990_v38 = vpop.permute.xlu0 %3448 }
 0x871   : > { %2928 = vrot.lane.b32.xlu0 %v2904_v8, %s6809_s6  ;;  %3114 = vrot.lane.b32.xlu1 %v3090_v46, %s6799_s12 }
 0x872   : > { %2687 = vmatprep.subr.mxu0 %v2640_v12  ;;  %4833 = vmatmul.mubr.msk.f32.gmra.mxu1 %vm2241_vm13, %v4757_v40  ;;  %v5919_v35 = vpop.permute.xlu1 %3083 }
 0x873   : > { %2688 = vmatpush1.msra.mxu0 %v2639_v41  ;;  %4835 = vmatprep.mubr.msk.f32.mxu1 %vm5100_vm9, %v6749_v47  ;;  %v3094_v45 = vmul.f32 0.0, %v5919_v35 }
 0x874   : > { %4729 = vmatmul.mubr.msk.f32.vlgmr.msra.gmra.mxu0 %vm2241_vm13, %v4756_v29 }
 0x875   : > { %2727 = vmatprep.mubr.f32.mxu0 %v6749_v47  ;;  %3122 = vrot.lane.b32.xlu0 %v3094_v45, %s6799_s12 }
 0x876   : > { %v5928_v61 = vpop.permute.xlu1 %3176 }
 0x878   : > { %4730 = vmatmul.mubr.msk.f32.gmra.mxu0 %vm2241_vm13, %v4757_v40 }
 0x879   : > { %2733 = vmatprep.mubr.f32.mxu0 %v6749_v47  ;;  %3021 = vrot.lane.b32.xlu0 %v2997_v48, %s6798_s29 }
 0x87a   : > { %v5934_v1 = vpop.permute.xlu1 %3266 }
 0x87b   : > { %v3280_v19 = vmul.f32 0.0, %v5934_v1 }
 0x87d   : > { %3404 = vrot.lane.b32.xlu0 %v3373_v10, %s6801_s4  ;;  %3311 = vrot.lane.b32.xlu1 %v3280_v19, %s6800_s1 }
 0x87e   : > { %v5937_v11 = vpop.permute.xlu1 %3172 }
 0x882   : > { %v5939_v39 = vpop.permute.xlu1 %3262 }
 0x883   : > { %v3276_v6 = vmul.f32 0.0, %v5939_v39 }
 0x885   : > { %3303 = vrot.lane.b32.xlu0 %v3276_v6, %s6800_s1 }
 0x886   : > { %v5943_v15 = vpop.permute.xlu1 %3452 }
 0x887   : > { %v3466_v57 = vmul.f32 0.0, %v5943_v15 }
 0x889   : > { %3497 = vrot.lane.b32.xlu0 %v3466_v57, %s6803_s11 }
 0x88a   : > { %v5951_v53 = vpop.permute.xlu1 %3545 }
 0x88b   : > { %v3559_v49 = vmul.f32 0.0, %v5951_v53 }
 0x88d   : > { %3396 = vrot.lane.b32.xlu0 %v3369_v22, %s6801_s4 }
 0x891   : > { %3590 = vrot.lane.b32.xlu0 %v3559_v49, %s6810_s0 }
 0x92e   : > { %v2806_v32 = vpop.f32.mrf.mxu1 }
 0x92f   : > { %v5958_v28 = vmul.f32 %v2806_v32, %v5587_v14 }
 0x930   : > { %v4831_v21 = vpop.f32.mrf.mxu1 }
 0x931   : > { %v2907_v25 = vmul.f32 %v5912_v60, %v5958_v28  ;;  %v3093_v59 = vmul.f32 %v5921_v44, %v5958_v28  ;;  %v3000_v18 = vmul.f32 %v5914_v43, %v5958_v28  ;;  %v3185_v27 = vmul.f32 %v5937_v11, %v5958_v28 }
 0x932   : > { %v2811_v23 = vpop.f32.mrf.mxu1  ;;  %v3275_v29 = vmul.f32 %v5939_v39, %v5958_v28  ;;  %v3368_v34 = vmul.f32 %v5945_v55, %v5958_v28  ;;  %v3461_v12 = vmul.f32 %v5990_v38, %v5958_v28 }
 0x933   : > { %2934 = vrot.lane.b32.xlu1 %v2907_v25, %s6809_s6  ;;  %3120 = vrot.lane.b32.xlu0 %v3093_v59, %s6799_s12  ;;  %v5967_v13 = vmul.f32 %v2811_v23, %v5587_v14 }
 0x934   : > { %v4834_v33 = vpop.f32.mrf.mxu1  ;;  %v2723_v30 = vpop.f32.mrf.mxu0 }
 0x935   : > { %v3188_v31 = vmul.f32 %v5928_v61, %v5967_v13  ;;  %v5982_v36 = vmul.f32 %v2723_v30, %v5590_v20  ;;  %v3372_v37 = vmul.f32 %v5930_v62, %v5967_v13  ;;  %v2911_v8 = vmul.f32 %v5902_v58, %v5967_v13 }
 0x936   : > { %v2725_v41 = vpop.f32.mrf.mxu0  ;;  %v3004_v46 = vmul.f32 %v5904_v7, %v5967_v13  ;;  %v3097_v10 = vmul.f32 %v5919_v35, %v5967_v13  ;;  %v3279_v57 = vmul.f32 %v5934_v1, %v5967_v13  ;;  %v3465_v19 = vmul.f32 %v5943_v15, %v5967_v13 }
 0x937   : > { %3027 = vrot.lane.b32.xlu1 %v3000_v18, %s6798_s29  ;;  %3205 = vrot.lane.b32.xlu0 %v3185_v27, %s6808_s9  ;;  %v3091_v40 = vmul.f32 %v5921_v44, %v5982_v36  ;;  %v5999_v17 = vmul.f32 %v2725_v41, %v5595_v24  ;;  %v3183_v42 = vmul.f32 %v5937_v11, %v5982_v36  ;;  %v3542_v41 = vpop.permute.xlu1 %3541 }
 0x938   : > { %v2729_v49 = vpop.f32.mrf.mxu0  ;;  %v3558_v21 = vmul.f32 %v5951_v53, %v5967_v13  ;;  %v2905_v59 = vmul.f32 %v5912_v60, %v5982_v36  ;;  %v2998_v27 = vmul.f32 %v5914_v43, %v5982_v36 }
 0x939   : > { %v2906_v45 = vmul.f32 %v5912_v60, %v5999_v17  ;;  %v2999_v48 = vmul.f32 %v5914_v43, %v5999_v17  ;;  %v3274_v6 = vmul.f32 %v5939_v39, %v5999_v17  ;;  %v3367_v22 = vmul.f32 %v5945_v55, %v5999_v17 }
 0x93a   : > { %v6032_v32 = vmul.f32 %v2729_v49, %v5590_v20  ;;  %v3460_v25 = vmul.f32 %v5990_v38, %v5999_v17  ;;  %v2731_v33 = vpop.f32.mrf.mxu0  ;;  %v3273_v60 = vmul.f32 %v5939_v39, %v5982_v36  ;;  %v3366_v43 = vmul.f32 %v5945_v55, %v5982_v36 }
 0x93b   : > { %3301 = vrot.lane.b32.xlu1 %v3275_v29, %s6800_s1  ;;  %3211 = vrot.lane.b32.xlu0 %v3188_v31, %s6808_s9  ;;  %v6047_v18 = vmul.f32 %v2731_v33, %v5595_v24 }
 0x93c   : > { %v3186_v23 = vmul.f32 %v5928_v61, %v6032_v32  ;;  %v3370_v29 = vmul.f32 %v5930_v62, %v6032_v32 }
 0x93d   : > { %v2910_v31 = vmul.f32 %v5902_v58, %v6047_v18  ;;  %v3003_v30 = vmul.f32 %v5904_v7, %v6047_v18  ;;  %v3096_v39 = vmul.f32 %v5919_v35, %v6047_v18 }
 0x93f   : > { %3394 = vrot.lane.b32.xlu1 %v3368_v34, %s6801_s4  ;;  %3402 = vrot.lane.b32.xlu0 %v3372_v37, %s6801_s4  ;;  %v6065_v34 = vpop.permute.xlu0 %2855  ;;  %v3459_v37 = vmul.f32 %v5990_v38, %v5982_v36 }
 0x943   : > { %3116 = vrot.lane.b32.xlu0 %v3091_v40, %s6799_s12  ;;  %3487 = vrot.lane.b32.xlu1 %v3461_v12, %s6803_s11  ;;  %v6075_v55 = vpop.permute.xlu0 %3029  ;;  %v3278_v40 = vmul.f32 %v5934_v1, %v6047_v18  ;;  %v3092_v12 = vmul.f32 %v5921_v44, %v5999_v17  ;;  %v2909_v44 = vmul.f32 %v5902_v58, %v6032_v32 }
 0x944   : > { %v3095_v58 = vmul.f32 %v5919_v35, %v6032_v32  ;;  %v3556_v35 = vmul.f32 %v5951_v53, %v6032_v32 }
 0x947   : > { %3201 = vrot.lane.b32.xlu0 %v3183_v42, %s6808_s9  ;;  %2942 = vrot.lane.b32.xlu1 %v2911_v8, %s6809_s6  ;;  %v3552_v42 = vmul.f32 %v3542_v41, %v5982_v36  ;;  %v3184_v8 = vmul.f32 %v5937_v11, %v5999_v17  ;;  %v3557_v11 = vmul.f32 %v5951_v53, %v6047_v18  ;;  %v3462_v53 = vmul.f32 0.0, %v5990_v38 }
 0x94b   : > { %2932 = vrot.lane.b32.xlu0 %v2906_v45, %s6809_s6  ;;  %3035 = vrot.lane.b32.xlu1 %v3004_v46, %s6798_s29  ;;  %v6086_v45 = vpop.permute.xlu0 %2928  ;;  %v3464_v46 = vmul.f32 %v5943_v15, %v6047_v18 }
 0x94f   : > { %3025 = vrot.lane.b32.xlu0 %v2999_v48, %s6798_s29  ;;  %3128 = vrot.lane.b32.xlu1 %v3097_v10, %s6799_s12  ;;  %v6096_v48 = vpop.permute.xlu0 %3122  ;;  %v3002_v10 = vmul.f32 %v5904_v7, %v6032_v32 }
 0x953   : > { %3299 = vrot.lane.b32.xlu0 %v3274_v6, %s6800_s1  ;;  %3309 = vrot.lane.b32.xlu1 %v3279_v57, %s6800_s1  ;;  %v3554_v6 = vmul.f32 %v3542_v41, %v5958_v28  ;;  %v6107_v57 = vpop.permute.xlu0 %3021 }
 0x957   : > { %3392 = vrot.lane.b32.xlu0 %v3367_v22, %s6801_s4  ;;  %3495 = vrot.lane.b32.xlu1 %v3465_v19, %s6803_s11  ;;  %v3277_v22 = vmul.f32 %v5934_v1, %v6032_v32  ;;  %v3405_v7 = vpop.permute.xlu0 %3404  ;;  %v3463_v19 = vmul.f32 %v5943_v15, %v6032_v32  ;;  %v3187_v1 = vmul.f32 %v5928_v61, %v6047_v18 }
 0x958   : > { %v3371_v15 = vmul.f32 %v5930_v62, %v6047_v18 }
 0x95b   : > { %3588 = vrot.lane.b32.xlu1 %v3558_v21, %s6810_s0  ;;  %3485 = vrot.lane.b32.xlu0 %v3460_v25, %s6803_s11  ;;  %v6119_v49 = vpop.permute.xlu0 %3303  ;;  %v6122_v21 = vpop.permute.xlu1 %2860 }
 0x95c   : > { %v2872_v3 = vmul.f32 0.0, %v6122_v21 }
 0x95f   : > { %2930 = vrot.lane.b32.xlu1 %v2905_v59, %s6809_s6  ;;  %3207 = vrot.lane.b32.xlu0 %v3186_v23, %s6808_s9  ;;  %v3498_v25 = vpop.permute.xlu0 %3497  ;;  %v6127_v59 = vpop.permute.xlu1 %2936 }
 0x963   : > { %3023 = vrot.lane.b32.xlu1 %v2998_v27, %s6798_s29  ;;  %3398 = vrot.lane.b32.xlu0 %v3370_v29, %s6801_s4  ;;  %v3115_v23 = vpop.permute.xlu1 %3114  ;;  %v6133_v33 = vpop.permute.xlu0 %3396  ;;  %v3553_v27 = vmul.f32 %v3542_v41, %v5999_v17 }
 0x967   : > { %3297 = vrot.lane.b32.xlu1 %v3273_v60, %s6800_s1  ;;  %2940 = vrot.lane.b32.xlu0 %v2910_v31, %s6809_s6  ;;  %v3312_v61 = vpop.permute.xlu1 %3311  ;;  %v3591_v29 = vpop.permute.xlu0 %3590  ;;  %v3555_v60 = vmul.f32 0.0, %v3542_v41 }
 0x96b   : > { %3390 = vrot.lane.b32.xlu1 %v3366_v43, %s6801_s4  ;;  %3033 = vrot.lane.b32.xlu0 %v3003_v30, %s6798_s29 }
 0x96f   : > { %3126 = vrot.lane.b32.xlu0 %v3096_v39, %s6799_s12  ;;  %3483 = vrot.lane.b32.xlu1 %v3459_v37, %s6803_s11 }
 0x973   : > { %3307 = vrot.lane.b32.xlu0 %v3278_v40, %s6800_s1  ;;  %3118 = vrot.lane.b32.xlu1 %v3092_v12, %s6799_s12 }
 0x977   : > { %3576 = vrot.lane.b32.xlu0 %v3552_v42, %s6810_s0  ;;  %3203 = vrot.lane.b32.xlu1 %v3184_v8, %s6808_s9 }
 0x97b   : > { %3493 = vrot.lane.b32.xlu0 %v3464_v46, %s6803_s11  ;;  %2938 = vrot.lane.b32.xlu1 %v2909_v44, %s6809_s6  ;;  %v2875_v46 = vmul.f32 %v6122_v21, %v5967_v13 }
 0x97f   : > { %3586 = vrot.lane.b32.xlu0 %v3557_v11, %s6810_s0  ;;  %3031 = vrot.lane.b32.xlu1 %v3002_v10, %s6798_s29 }
 0x983   : > { %3580 = vrot.lane.b32.xlu0 %v3554_v6, %s6810_s0  ;;  %3124 = vrot.lane.b32.xlu1 %v3095_v58, %s6799_s12 }
 0x987   : > { %3305 = vrot.lane.b32.xlu1 %v3277_v22, %s6800_s1 }
 0x98b   : > { %3491 = vrot.lane.b32.xlu1 %v3463_v19, %s6803_s11 }
 0x98f   : > { %3584 = vrot.lane.b32.xlu1 %v3556_v35, %s6810_s0 }
 0x993   : > { %3209 = vrot.lane.b32.xlu1 %v3187_v1, %s6808_s9 }
 0x997   : > { %3400 = vrot.lane.b32.xlu1 %v3371_v15, %s6801_s4 }
 0x99b   : > { %3489 = vrot.lane.b32.xlu1 %v3462_v53, %s6803_s11 }
 0x99f   : > { %3578 = vrot.lane.b32.xlu1 %v3553_v27, %s6810_s0 }
 0x9a3   : > { %3582 = vrot.lane.b32.xlu1 %v3555_v60, %s6810_s0 }
 0x9a5   : > { %v6139_v31 = vpop.permute.xlu1 %2934  ;;  %v6141_v62 = vpop.permute.xlu0 %3120 }
 0x9a9   : > { %v6143_v43 = vpop.permute.xlu1 %3027  ;;  %v6145_v38 = vpop.permute.xlu0 %3205 }
 0x9ad   : > { %v6147_v30 = vpop.permute.xlu1 %3301  ;;  %v6149_v39 = vpop.permute.xlu0 %3211 }
 0x9b1   : > { %v6151_v37 = vpop.permute.xlu1 %3394  ;;  %v6153_v40 = vpop.permute.xlu0 %3402 }
 0x9b2   : > { %v3419_v27 = vsel %vm961_vm2, %v6153_v40, %v3405_v7 }
 0x9b5   : > { %v6155_v12 = vpop.permute.xlu1 %3487  ;;  %v6157_v41 = vpop.permute.xlu0 %3116 }
 0x9b9   : > { %v6159_v42 = vpop.permute.xlu1 %2942  ;;  %v6161_v8 = vpop.permute.xlu0 %3201 }
 0x9ba   : > { %v2980_v10 = vadd.f32 %v6159_v42, %v2875_v46 }
 0x9bd   : > { %v6165_v44 = vpop.permute.xlu1 %3035  ;;  %v6167_v11 = vpop.permute.xlu0 %2932 }
 0x9be   : > { %v3073_v6 = vadd.f32 %v6165_v44, %v2980_v10 }
 0x9c1   : > { %v6171_v58 = vpop.permute.xlu1 %3128  ;;  %v6173_v22 = vpop.permute.xlu0 %3025 }
 0x9c2   : > { %v3166_v19 = vadd.f32 %v6171_v58, %v3073_v6 }
 0x9c4   : > { %v3244_v35 = vadd.f32 %v6149_v39, %v3166_v19 }
 0x9c5   : > { %v6177_v1 = vpop.permute.xlu1 %3309  ;;  %v6179_v15 = vpop.permute.xlu0 %3299 }
 0x9c6   : > { %v3326_v13 = vsel %vm943_vm4, %v6177_v1, %v3312_v61 }
 0x9c7   : > { %v3349_v53 = vadd.f32 %v3326_v13, %v3244_v35 }
 0x9c9   : > { %v6185_v60 = vpop.permute.xlu1 %3495  ;;  %v3442_v46 = vadd.f32 %v3419_v27, %v3349_v53  ;;  %v6187_v10 = vpop.permute.xlu0 %3392 }
 0x9ca   : > { %v3512_v6 = vsel %vm977_vm3, %v6185_v60, %v3498_v25  ;;  %v2868_v25 = vmul.f32 0.0, %v6065_v34 }
 0x9cb   : > { %v3535_v19 = vadd.f32 %v3512_v6, %v3442_v46 }
 0x9cd   : > { %v6191_v56 = vpop.permute.xlu1 %3588  ;;  %v6193_v0 = vpop.permute.xlu0 %3485 }
 0x9ce   : > { %v3605_v61 = vsel %vm993_vm1, %v6191_v56, %v3591_v29 }
 0x9cf   : > { %v3628_v35 = vadd.f32 %v3605_v61, %v3535_v19 }
 0x9d1   : > { %v6198_v13 = vmul.f32 %v3628_v35, %v5722_v9  ;;  %v2931_v7 = vpop.permute.xlu1 %2930  ;;  %v6200_v54 = vpop.permute.xlu0 %3207  ;;  %v3138_v35 = vsel %vm907_vm7, %v3115_v23, %v6157_v41 }
 0x9d2   : > { %v2952_v53 = vsel %vm875_vm8, %v6086_v45, %v2931_v7 }
 0x9d3   : > { %6822 = vst [vmem:[#allocation23_spill] sm:$0xff] %v6198_v13  ;;  %v3679_v27 = vmul.f32 %v6198_v13, %v6198_v13  ;;  %v2973_v46 = vadd.f32 %v2952_v53, %v2868_v25 }
 0x9d5   : > { %v3024_v6 = vpop.permute.xlu1 %3023  ;;  %3690 = vrot.lane.b32.xlu1 %v3679_v27, %s6811_s10  ;;  %v6208_v29 = vpop.permute.xlu0 %3398 }
 0x9d6   : > { %v3045_v19 = vsel %vm891_vm6, %v6107_v57, %v3024_v6 }
 0x9d7   : > { %v3066_v61 = vadd.f32 %v3045_v19, %v2973_v46 }
 0x9d9   : > { %v3159_v16 = vadd.f32 %v3138_v35, %v3066_v61  ;;  %v6214_v45 = vpop.permute.xlu1 %3297  ;;  %v2941_v52 = vpop.permute.xlu0 %2940 }
 0x9db   : > { %v3237_v50 = vadd.f32 %v6161_v8, %v3159_v16 }
 0x9dd   : > { %v6217_v51 = vpop.permute.xlu1 %3390  ;;  %v3034_v53 = vpop.permute.xlu0 %3033  ;;  %v3342_v25 = vadd.f32 %v6214_v45, %v3237_v50 }
 0x9df   : > { %v3435_v57 = vadd.f32 %v6217_v51, %v3342_v25 }
 0x9e1   : > { %v6220_v27 = vpop.permute.xlu1 %3483  ;;  %v3127_v47 = vpop.permute.xlu0 %3126 }
 0x9e2   : > { %v3528_v23 = vadd.f32 %v6220_v27, %v3435_v57 }
 0x9e5   : > { %v3119_v46 = vpop.permute.xlu1 %3118  ;;  %v6223_v19 = vpop.permute.xlu0 %3307 }
 0x9e9   : > { %v3204_v61 = vpop.permute.xlu1 %3203  ;;  %v6226_v35 = vpop.permute.xlu0 %3576 }
 0x9ea   : > { %v3621_v16 = vadd.f32 %v6226_v35, %v3528_v23 }
 0x9ec   : > { %v6230_v63 = vmul.f32 %v3621_v16, %v5718_v26 }
 0x9ed   : > { %v2939_v4 = vpop.permute.xlu1 %2938 }
 0x9ee   : > { %6823 = vst [vmem:[#allocation24_spill] sm:$0xff] %v6230_v63  ;;  %v3641_v50 = vmul.f32 %v6230_v63, %v6230_v63  ;;  %v2955_v25 = vsel %vm875_vm8, %v6127_v59, %v2939_v4  ;;  %v2954_v59 = vsel %vm875_vm8, %v6167_v11, %v6139_v31 }
 0x9ef   : > { %v2977_v24 = vadd.f32 %v2955_v25, %v2872_v3 }
 0x9f0   : > { %3649 = vrot.lane.b32.xlu0 %v3641_v50, %s6811_s10  ;;  %v2871_v50 = vmul.f32 %v6065_v34, %v5958_v28  ;;  %v2874_v28 = vmul.f32 %v6122_v21, %v6047_v18  ;;  %v3050_v18 = vsel %vm891_vm6, %v3034_v53, %v6165_v44  ;;  %v3220_v44 = vsel %vm924_vm5, %v3204_v61, %v6145_v38 }
 0x9f1   : > { %v3032_v57 = vpop.permute.xlu1 %3031 }
 0x9f2   : > { %v3048_v14 = vsel %vm891_vm6, %v6075_v55, %v3032_v57  ;;  %v2870_v55 = vmul.f32 %v6065_v34, %v5999_v17 }
 0x9f3   : > { %v3070_v23 = vadd.f32 %v3048_v14, %v2977_v24  ;;  %v3047_v14 = vsel %vm891_vm6, %v6173_v22, %v6143_v43  ;;  %v2869_v24 = vmul.f32 %v6065_v34, %v5982_v36  ;;  %v2873_v36 = vmul.f32 %v6122_v21, %v6032_v32 }
 0x9f4   : > { %v2975_v25 = vadd.f32 %v2954_v59, %v2870_v55  ;;  %v2956_v34 = vsel %vm875_vm8, %v2939_v4, %v2941_v52 }
 0x9f5   : > { %v3125_v20 = vpop.permute.xlu1 %3124  ;;  %v2978_v4 = vadd.f32 %v2956_v34, %v2873_v36 }
 0x9f6   : > { %v3141_v16 = vsel %vm907_vm7, %v6096_v48, %v3125_v20  ;;  %v2953_v48 = vsel %vm875_vm8, %v2931_v7, %v6167_v11  ;;  %v3068_v11 = vadd.f32 %v3047_v14, %v2975_v25 }
 0x9f7   : > { %v3163_v13 = vadd.f32 %v3141_v16, %v3070_v23  ;;  %v2957_v16 = vsel %vm875_vm8, %v2941_v52, %v6159_v42  ;;  %v2974_v7 = vadd.f32 %v2953_v48, %v2869_v24  ;;  %v3049_v42 = vsel %vm891_vm6, %v3032_v57, %v3034_v53 }
 0x9f8   : > { %v2979_v32 = vadd.f32 %v2957_v16, %v2874_v28  ;;  %v3143_v52 = vsel %vm907_vm7, %v3127_v47, %v6171_v58  ;;  %v3071_v53 = vadd.f32 %v3049_v42, %v2978_v4  ;;  %v3321_v16 = vsel %vm943_vm4, %v6214_v45, %v6179_v15 }
 0x9f9   : > { %v3306_v9 = vpop.permute.xlu1 %3305  ;;  %v3241_v63 = vadd.f32 %v6200_v54, %v3163_v13  ;;  %v2976_v13 = vadd.f32 %v6139_v31, %v2871_v50  ;;  %v3139_v50 = vsel %vm907_vm7, %v6157_v41, %v3119_v46  ;;  %v3142_v41 = vsel %vm907_vm7, %v3125_v20, %v3127_v47 }
 0x9fa   : > { %v3164_v25 = vadd.f32 %v3142_v41, %v3071_v53 }
 0x9fb   : > { %v3346_v3 = vadd.f32 %v3306_v9, %v3241_v63  ;;  %v3046_v63 = vsel %vm891_vm6, %v3024_v6, %v6173_v22  ;;  %v3069_v31 = vadd.f32 %v6143_v43, %v2976_v13  ;;  %v3140_v22 = vsel %vm907_vm7, %v3119_v46, %v6141_v62  ;;  %v3494_v13 = vpop.permute.xlu0 %3493 }
 0x9fc   : > { %v3067_v6 = vadd.f32 %v3046_v63, %v2974_v7  ;;  %v3219_v43 = vsel %vm924_vm5, %v6161_v8, %v3204_v61  ;;  %v3161_v14 = vadd.f32 %v3140_v22, %v3068_v11  ;;  %v3322_v63 = vsel %vm943_vm4, %v6179_v15, %v6147_v30 }
 0x9fd   : > { %v3492_v23 = vpop.permute.xlu1 %3491  ;;  %v3439_v17 = vadd.f32 %v6208_v29, %v3346_v3  ;;  %v3072_v3 = vadd.f32 %v3050_v18, %v2979_v32  ;;  %v3162_v8 = vadd.f32 %v6141_v62, %v3069_v31  ;;  %v3324_v62 = vsel %vm943_vm4, %v3306_v9, %v6223_v19 }
 0x9fe   : > { %v3160_v46 = vadd.f32 %v3139_v50, %v3067_v6  ;;  %v3239_v48 = vadd.f32 %v3220_v44, %v3161_v14  ;;  %v3415_v18 = vsel %vm961_vm2, %v6187_v10, %v6151_v37 }
 0x9ff   : > { %v3532_v59 = vadd.f32 %v3492_v23, %v3439_v17  ;;  %v3165_v24 = vadd.f32 %v3143_v52, %v3072_v3  ;;  %v3240_v7 = vadd.f32 %v6145_v38, %v3162_v8  ;;  %v3587_v9 = vpop.permute.xlu0 %3586  ;;  %v3414_v38 = vsel %vm961_vm2, %v6217_v51, %v6187_v10 }
 0xa00   : > { %v3238_v58 = vadd.f32 %v3219_v43, %v3160_v46  ;;  %v3344_v36 = vadd.f32 %v3322_v63, %v3239_v48  ;;  %v3604_v32 = vsel %vm993_vm1, %v3587_v9, %v6191_v56  ;;  %v3416_v51 = vsel %vm961_vm2, %v6151_v37, %v6133_v33 }
 0xa01   : > { %v3585_v21 = vpop.permute.xlu1 %3584 }
 0xa02   : > { %v3625_v55 = vadd.f32 %v3585_v21, %v3532_v59  ;;  %v3603_v52 = vsel %vm993_vm1, %v3585_v21, %v3587_v9 }
 0xa03   : > { %v3581_v43 = vpop.permute.xlu0 %3580 }
 0xa04   : > { %v6284_v57 = vmul.f32 %v3625_v55, %v5718_v26 }
 0xa05   : > { %v3210_v28 = vpop.permute.xlu1 %3209 }
 0xa06   : > { %v3221_v61 = vsel %vm924_vm5, %v6200_v54, %v3210_v28  ;;  %v3222_v47 = vsel %vm924_vm5, %v3210_v28, %v6149_v39  ;;  %v3676_v20 = vmul.f32 %v6284_v57, %v6284_v57  ;;  %v3325_v54 = vsel %vm943_vm4, %v6223_v19, %v6177_v1 }
 0xa07   : > { %v3242_v17 = vadd.f32 %v3221_v61, %v3164_v25  ;;  %v3243_v26 = vadd.f32 %v3222_v47, %v3165_v24  ;;  %v3343_v39 = vadd.f32 %v3321_v16, %v3238_v58  ;;  %v3323_v1 = vsel %vm943_vm4, %v6147_v30, %v6119_v49  ;;  %v2644_v24 = vld [vmem:[%s6706_s24 + $0x8] sm:$0xf] }
 0xa08   : > { %3684 = vrot.lane.b32.xlu0 %v3676_v20, %s6811_s10  ;;  %v3437_v30 = vadd.f32 %v3415_v18, %v3344_v36  ;;  %v3345_v6 = vadd.f32 %v3323_v1, %v3240_v7 }
 0xa09   : > { %v3401_v34 = vpop.permute.xlu1 %3400  ;;  %v3347_v31 = vadd.f32 %v3324_v62, %v3242_v17  ;;  %v3348_v11 = vadd.f32 %v3325_v54, %v3243_v26  ;;  %v3436_v49 = vadd.f32 %v3414_v38, %v3343_v39 }
 0xa0a   : > { %v3417_v59 = vsel %vm961_vm2, %v6208_v29, %v3401_v34  ;;  %v3418_v15 = vsel %vm961_vm2, %v3401_v34, %v6153_v40  ;;  %v3511_v29 = vsel %vm977_vm3, %v3494_v13, %v6185_v60  ;;  %v3510_v40 = vsel %vm977_vm3, %v3492_v23, %v3494_v13 }
 0xa0b   : > { %v3440_v45 = vadd.f32 %v3417_v59, %v3347_v31  ;;  %v3441_v19 = vadd.f32 %v3418_v15, %v3348_v11  ;;  %v3508_v60 = vsel %vm977_vm3, %v6193_v0, %v6155_v12  ;;  %v3507_v23 = vsel %vm977_vm3, %v6220_v27, %v6193_v0 }
 0xa0c   : > { %v3529_v41 = vadd.f32 %v3507_v23, %v3436_v49  ;;  %v3530_v33 = vadd.f32 %v3508_v60, %v3437_v30  ;;  %v3438_v37 = vadd.f32 %v3416_v51, %v3345_v6  ;;  %v2647_v13 = vunpack.c.l.bf16 %v2644_v24 }
 0xa0d   : > { %v3533_v50 = vadd.f32 %v3510_v40, %v3440_v45  ;;  %v3534_v22 = vadd.f32 %v3511_v29, %v3441_v19  ;;  %v3490_v42 = vpop.permute.xlu1 %3489 }
 0xa0e   : > { %v3509_v55 = vsel %vm977_vm3, %v6155_v12, %v3490_v42  ;;  %4731 = vmatmul.mubr.msk.f32.gmra.mxu0 %vm2241_vm13, %v2647_v13  ;;  %4836 = vmatmul.mubr.msk.f32.gmra.mxu1 %vm2241_vm13, %v2647_v13 }
 0xa0f   : > { %v3626_v10 = vadd.f32 %v3603_v52, %v3533_v50  ;;  %v3627_v4 = vadd.f32 %v3604_v32, %v3534_v22  ;;  %v3531_v58 = vadd.f32 %v3509_v55, %v3438_v37 }
 0xa11   : > { %v6335_v44 = vmul.f32 %v3626_v10, %v5726_v5  ;;  %v6338_v56 = vmul.f32 %v3627_v4, %v5730_v2  ;;  %v3579_v21 = vpop.permute.xlu1 %3578 }
 0xa12   : > { %v3600_v3 = vsel %vm993_vm1, %v6226_v35, %v3579_v21  ;;  %v3601_v46 = vsel %vm993_vm1, %v3579_v21, %v3581_v43 }
 0xa13   : > { %v3622_v0 = vadd.f32 %v3600_v3, %v3529_v41  ;;  %v3623_v27 = vadd.f32 %v3601_v46, %v3530_v33  ;;  %v3678_v14 = vmul.f32 %v6338_v56, %v6338_v56  ;;  %v3677_v53 = vmul.f32 %v6335_v44, %v6335_v44  ;;  %v6826_v3 = vld [vmem:[#allocation23_spill] sm:$0xff] }
 0xa15   : > { %v6353_v12 = vmul.f32 %v3622_v0, %v5726_v5  ;;  %v6356_v35 = vmul.f32 %v3623_v27, %v5730_v2  ;;  %v3583_v48 = vpop.permute.xlu1 %3582  ;;  %3688 = vrot.lane.b32.xlu0 %v3678_v14, %s6811_s10  ;;  %3686 = vrot.lane.b32.xlu1 %v3677_v53, %s6811_s10  ;;  %v6824_v5 = vmov 0.0   ;;  %v6825_v2 = vld [vmem:[#allocation19_spill] sm:$0xff]  ;;  %v6827_v14 = vld [vmem:[#allocation24_spill] sm:$0xff] }
 0xa16   : > { %v3602_v25 = vsel %vm993_vm1, %v3581_v43, %v3583_v48  ;;  %4840 = vmatprep.mubr.msk.f32.mxu1 %vm5100_vm9, %v6824_v5 }
 0xa17   : > { %v3624_v28 = vadd.f32 %v3602_v25, %v3531_v58  ;;  %v3642_v8 = vmul.f32 %v6353_v12, %v6353_v12  ;;  %v3643_v61 = vmul.f32 %v6356_v35, %v6356_v35 }
 0xa19   : > { %v6370_v47 = vmul.f32 %v3624_v28, %v6825_v2  ;;  %3651 = vrot.lane.b32.xlu1 %v3642_v8, %s6811_s10  ;;  %3653 = vrot.lane.b32.xlu0 %v3643_v61, %s6811_s10  ;;  %v2840_v28 = vld [vmem:[%s6707_s25 + $0x10] sm:$0xff]  ;;  %v6828_v2 = vmov 3  }
 0xa1b   : > { %v3644_v20 = vmul.f32 %v6370_v47, %v6370_v47 }
 0xa1d   : > { %3655 = vrot.lane.b32.xlu1 %v3644_v20, %s6811_s10  ;;  %v6829_v20 = vmov 4  }
 0xa47   : > { %v3691_v26 = vpop.permute.xlu1 %3690 }
 0xa62   : > { %v3650_v17 = vpop.permute.xlu0 %3649 }
 0xa7a   : > { %v3685_v63 = vpop.permute.xlu0 %3684 }
 0xa87   : > { %v3687_v16 = vpop.permute.xlu1 %3686  ;;  %v3689_v54 = vpop.permute.xlu0 %3688 }
 0xa88   : > { %v3692_v62 = vsel %vm1078_vm10, %v3685_v63, %v3687_v16  ;;  %v3693_v39 = vsel %vm1078_vm10, %v3687_v16, %v3689_v54  ;;  %v3694_v36 = vsel %vm1078_vm10, %v3689_v54, %v3691_v26  ;;  %v6831_v26 = vmov 7  }
 0xa89   : > { %v3698_v34 = vsel %vm997_vm0, %v3692_v62, 0.0  ;;  %v4084_v31 = vsel %vm4070_vm14, %v3692_v62, 0.0  ;;  %v3699_v11 = vsel %vm997_vm0, %v3693_v39, 0.0  ;;  %v4085_v59 = vsel %vm4070_vm14, %v3693_v39, 0.0 }
 0xa8a   : > { %v3700_v7 = vadd.f32 %v3699_v11, %v3698_v34  ;;  %v3701_v15 = vsel %vm997_vm0, %v3694_v36, 0.0  ;;  %v4086_v1 = vadd.f32 %v4085_v59, %v4084_v31  ;;  %v4087_v18 = vsel %vm4070_vm14, %v3694_v36, 0.0 }
 0xa8b   : > { %v3652_v9 = vpop.permute.xlu1 %3651  ;;  %v3654_v45 = vpop.permute.xlu0 %3653  ;;  %v6832_v63 = vmov 6   ;;  %v6833_v16 = vmov 0   ;;  %v6834_v54 = vmov 8  }
 0xa8c   : > { %v3702_v19 = vadd.f32 %v3701_v15, %v3700_v7  ;;  %v3657_v38 = vsel %vm1078_vm10, %v3650_v17, %v3652_v9  ;;  %v3658_v29 = vsel %vm1078_vm10, %v3652_v9, %v3654_v45  ;;  %v4088_v40 = vadd.f32 %v4087_v18, %v4086_v1 }
 0xa8d   : > { %v3663_v50 = vsel %vm997_vm0, %v3657_v38, 0.0  ;;  %v4071_v22 = vsel %vm4070_vm14, %v3657_v38, 0.0  ;;  %v3664_v42 = vsel %vm997_vm0, %v3658_v29, 0.0  ;;  %v4072_v49 = vsel %vm4070_vm14, %v3658_v29, 0.0 }
 0xa8e   : > { %3703 = vadd.xlane.f32.xlu0 %v3702_v19  ;;  %v4073_v30 = vadd.f32 %v4072_v49, %v4071_v22  ;;  %v3665_v32 = vadd.f32 %v3664_v42, %v3663_v50  ;;  %v6830_v17 = vmov 5   ;;  %v6835_v22 = vld [vmem:[#allocation17_spill] sm:$0xff]  ;;  %v6836_v49 = vld [vmem:[#allocation18_spill] sm:$0xff] }
 0xa8f   : > { %v3656_v6 = vpop.permute.xlu1 %3655 }
 0xa90   : > { %v3659_v52 = vsel %vm1078_vm10, %v3654_v45, %v3656_v6 }
 0xa91   : > { %v3666_v51 = vsel %vm997_vm0, %v3659_v52, 0.0  ;;  %v4074_v10 = vsel %vm4070_vm14, %v3659_v52, 0.0 }
 0xa92   : > { %v3667_v4 = vadd.f32 %v3666_v51, %v3665_v32  ;;  %v4075_v60 = vadd.f32 %v4074_v10, %v4073_v30  ;;  %v6837_v51 = vld [vmem:[#allocation16_spill] sm:$0xff] }
 0xa94   : > { %3668 = vadd.xlane.f32.xlu1 %v3667_v4 }
 0xace   : > { %v2816_v8 = vpop.f32.mrf.mxu1 }
 0xacf   : > { %v6439_v10 = vmul.f32 %v2816_v8, %v6837_v51 }
 0xad0   : > { %v4837_v61 = vpop.f32.mrf.mxu1 }
 0xb17   : > { %v3704_v23 = vpop.xlane.xlu0 %3703 }
 0xb18   : > { %v3705_v43 = vmax.f32 %v3704_v23, 1e-24 }
 0xb1a   : > { %5011 = vrsqrt.f32 %v3705_v43  ;;  %v3887_v43 = vld [vmem:[%s6838_s8] sm:$0x1] }
 0xb1b   : > { %4865 = vpush %v3887_v43 }
 0xb1d   : > { %v3669_v21 = vpop.xlane.xlu1 %3668 }
 0xb1e   : > { %v3670_v41 = vmax.f32 %v3669_v21, 1e-24 }
 0xb20   : > { %5013 = vrsqrt.f32 %v3670_v41 }
 0xb27   : > { %v5012_v33 = vpop.eup %5011 }
 0xb28   : > { %v3709_v37 = vmul.f32 %v5012_v33, %v6338_v56  ;;  %v3708_v55 = vmul.f32 %v5012_v33, %v6335_v44  ;;  %v3710_v46 = vmul.f32 %v5012_v33, %v6826_v3  ;;  %v3707_v0 = vmul.f32 %v5012_v33, %v6284_v57 }
 0xb2a   : > { %3737 = vrot.lane.b32.xlu1 %v3709_v37, %s6811_s10  ;;  %3735 = vrot.lane.b32.xlu0 %v3708_v55, %s6811_s10 }
 0xb2d   : > { %v5014_v27 = vpop.eup %5013 }
 0xb2e   : > { %3739 = vrot.lane.b32.xlu1 %v3710_v46, %s6811_s10  ;;  %3733 = vrot.lane.b32.xlu0 %v3707_v0, %s6811_s10  ;;  %v3672_v53 = vmul.f32 %v5014_v27, %v6827_v14  ;;  %v3675_v24 = vmul.f32 %v5014_v27, %v6370_v47  ;;  %v3673_v58 = vmul.f32 %v5014_v27, %v6353_v12 }
 0xb2f   : > { %v3674_v48 = vmul.f32 %v5014_v27, %v6356_v35 }
 0xb30   : > { %v4960_v13 = vpack.i.bf16 %v3675_v24, %v3672_v53 }
 0xb31   : > { %v4955_v25 = vpack.i.bf16 %v3674_v48, %v3673_v58 }
 0xb32   : > { %4961 = vrot.lane.b32.xlu1 %v4960_v13, %s6811_s10 }
 0xb33   : > { %4956 = vrot.lane.b32.xlu0 %v4955_v25, %s6811_s10 }
 0xb36   : > { %2994 = vperm.xlu1 %4966, %v2840_v28  }
 0xb37   : > { %2901 = vperm.xlu0 %4965, %v2840_v28  }
 0xb3a   : > { %4967 = vset.pattern.permute.xlu1 %v6828_v2 }
 0xb3b   : > { %4968 = vset.pattern.permute.xlu0 %v6829_v20  ;;  %3087 = vperm.xlu1 %4967, %v2840_v28  }
 0xb3c   : > { %3180 = vperm.xlu0 %4968, %v2840_v28  }
 0xb3f   : > { %4969 = vset.pattern.permute.xlu1 %v6830_v17 }
 0xb40   : > { %4971 = vset.pattern.permute.xlu0 %v6831_v26  ;;  %3270 = vperm.xlu1 %4969, %v2840_v28  }
 0xb41   : > { %3456 = vperm.xlu0 %4971, %v2840_v28  }
 0xb44   : > { %4970 = vset.pattern.permute.xlu1 %v6832_v63 }
 0xb45   : > { %3363 = vperm.xlu1 %4970, %v2840_v28   ;;  %4973 = vset.pattern.permute.xlu0 %v6833_v16 }
 0xb49   : > { %4972 = vset.pattern.permute.xlu1 %v6834_v54 }
 0xb4a   : > { %3549 = vperm.xlu1 %4972, %v2840_v28  }
 0xb60   : > { %4089 = vadd.xlane.f32.xlu0 %v4088_v40  ;;  %v2735_v40 = vpop.f32.mrf.mxu0 }
 0xb61   : > { %v6431_v42 = vmul.f32 %v2735_v40, %v6835_v22 }
 0xb62   : > { %v2737_v50 = vpop.f32.mrf.mxu0 }
 0xb63   : > { %v6434_v30 = vmul.f32 %v2737_v50, %v6836_v49 }
 0xb64   : > { %4076 = vadd.xlane.f32.xlu0 %v4075_v60 }
 0xb7a   : > { %2865 = vperm.xlu0 %4973, %v2840_v28  }
 0xb7e   : > { %4984 = vset.pattern.permute.xlu0 %v6834_v54 }
 0xb9c   : > { %v3738_v62 = vpop.permute.xlu1 %3737  ;;  %v3736_v39 = vpop.permute.xlu0 %3735 }
 0xb9d   : > { %v3742_v36 = vsel %vm1078_vm10, %v3736_v39, %v3738_v62 }
 0xb9e   : > { %3777 = vmatprep.subr.mxu0 %v3742_v36 }
 0xba0   : > { %v3740_v34 = vpop.permute.xlu1 %3739  ;;  %v3734_v31 = vpop.permute.xlu0 %3733 }
 0xba1   : > { %v3743_v11 = vsel %vm1078_vm10, %v3738_v62, %v3740_v34  ;;  %v3741_v7 = vsel %vm1078_vm10, %v3734_v31, %v3736_v39 }
 0xba2   : > { %3778 = vmatpush1.xpose.msra.mxu0 %v3741_v7  ;;  %4839 = vmatpush3.xpose.msra.mxu1 %v3743_v11 }
 0xba3   : > { %4843 = vmatprep.subr.mxu1 %v6824_v5 }
 0xba4   : > { %v4962_v59 = vpop.permute.xlu1 %4961 }
 0xba5   : > { %v4964_v15 = vunpack.i.h.bf16 %v4962_v59  ;;  %v4963_v1 = vunpack.i.l.bf16 %v4962_v59  ;;  %v4957_v9 = vpop.permute.xlu0 %4956 }
 0xba6   : > { %v4959_v45 = vunpack.i.h.bf16 %v4957_v9  ;;  %v4958_v19 = vunpack.i.l.bf16 %v4957_v9 }
 0xba8   : > { %v3724_v18 = vsel %vm1078_vm10, %v4958_v19, %v4959_v45  ;;  %v3725_v38 = vsel %vm1078_vm10, %v4959_v45, %v4964_v15  ;;  %v3723_v29 = vsel %vm1078_vm10, %v4963_v1, %v4958_v19 }
 0xba9   : > { %3811 = vmatprep.mubr.f32.mxu0 %v3724_v18  ;;  %4841 = vmatmul.mubr.f32.vlgmr.msra.gmra.mxu1 %v3725_v38 }
 0xbaa   : > { %3812 = vmatmul.mubr.f32.vlgmr.msra.gmra.mxu0 %v3723_v29  ;;  %4845 = vmatprep.mubr.msk.f32.mxu1 %vm5100_vm9, %v6824_v5 }
 0xbab   : > { %3993 = vmatprep.mubr.f32.mxu0 %v6824_v5 }
 0xbb1   : > { %v2995_v6 = vpop.permute.xlu1 %2994 }
 0xbb2   : > { %v2902_v32 = vpop.permute.xlu0 %2901  ;;  %v3006_v46 = vmul.f32 %v2995_v6, %v6431_v42  ;;  %v3007_v53 = vmul.f32 %v2995_v6, %v6434_v30  ;;  %v3008_v58 = vmul.f32 %v2995_v6, %v6439_v10  ;;  %v3005_v25 = vmul.f32 0.0, %v2995_v6 }
 0xbb3   : > { %v2913_v52 = vmul.f32 %v2902_v32, %v6431_v42  ;;  %v2914_v4 = vmul.f32 %v2902_v32, %v6434_v30  ;;  %v2915_v21 = vmul.f32 %v2902_v32, %v6439_v10  ;;  %v2912_v37 = vmul.f32 0.0, %v2902_v32 }
 0xbb5   : > { %2946 = vrot.lane.b32.xlu1 %v2913_v52, %s6809_s6 }
 0xbb6   : > { %v3088_v60 = vpop.permute.xlu1 %3087 }
 0xbb7   : > { %v3099_v23 = vmul.f32 %v3088_v60, %v6431_v42  ;;  %v3101_v41 = vmul.f32 %v3088_v60, %v6439_v10  ;;  %v3181_v33 = vpop.permute.xlu0 %3180  ;;  %v3100_v8 = vmul.f32 %v3088_v60, %v6434_v30  ;;  %v3098_v20 = vmul.f32 0.0, %v3088_v60 }
 0xbb8   : > { %v3189_v55 = vmul.f32 %v3181_v33, %v6431_v42  ;;  %v3191_v0 = vmul.f32 %v3181_v33, %v6439_v10  ;;  %v3190_v26 = vmul.f32 %v3181_v33, %v6434_v30 }
 0xbb9   : > { %2948 = vrot.lane.b32.xlu1 %v2914_v4, %s6809_s6  ;;  %3132 = vrot.lane.b32.xlu0 %v3099_v23, %s6799_s12 }
 0xbbb   : > { %v3271_v27 = vpop.permute.xlu1 %3270 }
 0xbbc   : > { %v3282_v24 = vmul.f32 %v3271_v27, %v6434_v30  ;;  %v3284_v48 = vmul.f32 0.0, %v3271_v27  ;;  %v3457_v2 = vpop.permute.xlu0 %3456  ;;  %v3281_v54 = vmul.f32 %v3271_v27, %v6431_v42  ;;  %v3283_v39 = vmul.f32 %v3271_v27, %v6439_v10 }
 0xbbd   : > { %2950 = vrot.lane.b32.xlu1 %v2915_v21, %s6809_s6  ;;  %3136 = vrot.lane.b32.xlu0 %v3101_v41, %s6799_s12  ;;  %v3468_v17 = vmul.f32 %v3457_v2, %v6434_v30  ;;  %v3470_v63 = vmul.f32 0.0, %v3457_v2  ;;  %v3467_v18 = vmul.f32 %v3457_v2, %v6431_v42  ;;  %v3469_v38 = vmul.f32 %v3457_v2, %v6439_v10 }
 0xbc0   : > { %v3364_v13 = vpop.permute.xlu1 %3363 }
 0xbc1   : > { %2944 = vrot.lane.b32.xlu1 %v2912_v37, %s6809_s6  ;;  %3213 = vrot.lane.b32.xlu0 %v3189_v55, %s6808_s9  ;;  %v3375_v28 = vmul.f32 %v3364_v13, %v6434_v30  ;;  %v3377_v61 = vmul.f32 0.0, %v3364_v13  ;;  %v3374_v45 = vmul.f32 %v3364_v13, %v6431_v42  ;;  %v3376_v19 = vmul.f32 %v3364_v13, %v6439_v10  ;;  %s6841_s6 = sld [smem:[#allocation8_spill]] }
 0xbc5   : > { %3039 = vrot.lane.b32.xlu1 %v3006_v46, %s6798_s29  ;;  %3217 = vrot.lane.b32.xlu0 %v3191_v0, %s6808_s9  ;;  %v3550_v16 = vpop.permute.xlu1 %3549 }
 0xbc6   : > { %v3561_v62 = vmul.f32 %v3550_v16, %v6434_v30  ;;  %v3563_v36 = vmul.f32 0.0, %v3550_v16  ;;  %v3560_v29 = vmul.f32 %v3550_v16, %v6431_v42  ;;  %v3562_v40 = vmul.f32 %v3550_v16, %v6439_v10 }
 0xbc7   : > { %s836_s23 = sand.u32 1, %s6841_s6  }
 0xbc8   : > { %s4863_s26 = smul.u32 24, %s836_s23 }
 0xbc9   : > { %3041 = vrot.lane.b32.xlu1 %v3007_v53, %s6798_s29  ;;  %3315 = vrot.lane.b32.xlu0 %v3282_v24, %s6800_s1 }
 0xbca   : > { %s838_s5 = scalar_lea.vmem [#allocation4], %s4863_s26 }
 0xbcb   : > { %s4642_s3 = sshll.u32 %s838_s5, 4  ;;  %s4643_s3 = int_to_ptr.vmem [resolvable:$true] %s4642_s3 }
 0xbcd   : > { %3043 = vrot.lane.b32.xlu1 %v3008_v58, %s6798_s29  ;;  %3319 = vrot.lane.b32.xlu0 %v3284_v48, %s6800_s1 }
 0xbd1   : > { %3037 = vrot.lane.b32.xlu1 %v3005_v25, %s6798_s29  ;;  %3408 = vrot.lane.b32.xlu0 %v3375_v28, %s6801_s4  ;;  %s4866_s29 = spop %4865 }
 0xbd2   : > { %v3890_v11 = vstv %s4866_s29  ;;  %s4628_s29 = scalar_lea.sflag [#allocation5], %s836_s23 }
 0xbd5   : > { %3134 = vrot.lane.b32.xlu1 %v3100_v8, %s6799_s12  ;;  %3412 = vrot.lane.b32.xlu0 %v3377_v61, %s6801_s4 }
 0xbd9   : > { %3130 = vrot.lane.b32.xlu1 %v3098_v20, %s6799_s12  ;;  %3501 = vrot.lane.b32.xlu0 %v3468_v17, %s6803_s11  ;;  %s5110_s12 = smov [#allocation4]  }
 0xbdd   : > { %3215 = vrot.lane.b32.xlu1 %v3190_v26, %s6808_s9  ;;  %3505 = vrot.lane.b32.xlu0 %v3470_v63, %s6803_s11  ;;  %s6840_s9 = sld [smem:[#allocation41_spill]] }
 0xbe1   : > { %3313 = vrot.lane.b32.xlu1 %v3281_v54, %s6800_s1  ;;  %3594 = vrot.lane.b32.xlu0 %v3561_v62, %s6810_s0 }
 0xbe5   : > { %3317 = vrot.lane.b32.xlu1 %v3283_v39, %s6800_s1  ;;  %3598 = vrot.lane.b32.xlu0 %v3563_v36, %s6810_s0 }
 0xbe9   : > { %v6498_v52 = vpop.xlane.xlu0 %4089 }
 0xbed   : > { %v4077_v4 = vpop.xlane.xlu0 %4076 }
 0xbee   : > { %v4078_v63 = vmax.f32 %v4077_v4, 1e-24 }
 0xbf5   : > { %v2866_v60 = vpop.permute.xlu0 %2865 }
 0xbf6   : > { %v2876_v61 = vmul.f32 0.0, %v2866_v60  ;;  %v2877_v26 = vmul.f32 %v2866_v60, %v6431_v42 }
 0xc27   : > { %v2947_v50 = vpop.permute.xlu1 %2946 }
 0xc2b   : > { %v2949_v22 = vpop.permute.xlu1 %2948  ;;  %v3133_v43 = vpop.permute.xlu0 %3132 }
 0xc2c   : > { %v2959_v20 = vsel %vm875_vm8, %v2947_v50, %v2949_v22 }
 0xc2d   : > { %v2982_v54 = vadd.f32 %v2959_v20, %v2877_v26 }
 0xc2f   : > { %v2951_v49 = vpop.permute.xlu1 %2950  ;;  %v6500_v41 = vpop.permute.xlu0 %3136 }
 0xc33   : > { %v2945_v6 = vpop.permute.xlu1 %2944  ;;  %v3214_v37 = vpop.permute.xlu0 %3213 }
 0xc34   : > { %v2958_v17 = vsel %vm875_vm8, %v2945_v6, %v2947_v50 }
 0xc35   : > { %v2981_v62 = vadd.f32 %v2958_v17, %v2876_v61 }
 0xc37   : > { %v3040_v32 = vpop.permute.xlu1 %3039  ;;  %v6502_v46 = vpop.permute.xlu0 %3217 }
 0xc3b   : > { %v3042_v51 = vpop.permute.xlu1 %3041  ;;  %v3316_v27 = vpop.permute.xlu0 %3315 }
 0xc3c   : > { %v3052_v16 = vsel %vm891_vm6, %v3040_v32, %v3042_v51 }
 0xc3f   : > { %v3044_v23 = vpop.permute.xlu1 %3043  ;;  %v6506_v24 = vpop.permute.xlu0 %3319 }
 0xc43   : > { %v3038_v21 = vpop.permute.xlu1 %3037  ;;  %v3409_v48 = vpop.permute.xlu0 %3408 }
 0xc47   : > { %v3135_v33 = vpop.permute.xlu1 %3134  ;;  %v6510_v28 = vpop.permute.xlu0 %3412 }
 0xc4b   : > { %v3131_v55 = vpop.permute.xlu1 %3130  ;;  %v3502_v39 = vpop.permute.xlu0 %3501 }
 0xc4f   : > { %v3216_v0 = vpop.permute.xlu1 %3215  ;;  %v3506_v6 = vpop.permute.xlu0 %3505 }
 0xc50   : > { %v3223_v42 = vsel %vm924_vm5, %v3214_v37, %v3216_v0 }
 0xc53   : > { %v6504_v53 = vpop.permute.xlu1 %3313  ;;  %v3595_v17 = vpop.permute.xlu0 %3594 }
 0xc57   : > { %v6508_v58 = vpop.permute.xlu1 %3317 }
 0xc69   : > { %v3883_v34 = vpop.f32.mrf.mxu1 }
 0xc6a   : > { %v3813_v31 = vpop.f32.mrf.mxu0 }
 0xc6b   : > { %v3884_v7 = vadd.f32 %v3883_v34, %v3813_v31  ;;  %v4842_v59 = vpop.f32.mrf.mxu1  ;;  %v2960_v34 = vsel %vm875_vm8, %v2949_v22, %v2951_v49  ;;  %v3051_v31 = vsel %vm891_vm6, %v3038_v21, %v3040_v32  ;;  %v3224_v32 = vsel %vm924_vm5, %v3216_v0, %v6502_v46 }
 0xc6c   : > { %v3815_v15 = vpop.f32.mrf.mxu0  ;;  %v3075_v59 = vadd.f32 %v3052_v16, %v2982_v54 }
 0xc6d   : > { %v3892_v1 = vmul.f32 %v3890_v11, %v3884_v7  ;;  %v3145_v11 = vsel %vm907_vm7, %v3133_v43, %v3135_v33  ;;  %v2878_v7 = vmul.f32 %v2866_v60, %v6434_v30  ;;  %v3053_v15 = vsel %vm891_vm6, %v3042_v51, %v3044_v23 }
 0xc6e   : > { %v4091_v30 = vmax.f32 %v6498_v52, 1e-24 }
 0xc6f   : > { %v3894_v9 = vsel %vm3893_vm15, %v3892_v1, -inf }
 0xc70   : > { %3895 = vmax.xlane.f32.xlu1 %v3894_v9  ;;  %v3074_v9 = vadd.f32 %v3051_v31, %v2981_v62 }
 0xc81   : > { %3406 = vrot.lane.b32.xlu1 %v3374_v45, %s6801_s4  ;;  %v3168_v45 = vadd.f32 %v3145_v11, %v3075_v59  ;;  %v3329_v11 = vsel %vm943_vm4, %v6508_v58, %v6506_v24 }
 0xc83   : > { %v3246_v22 = vadd.f32 %v3223_v42, %v3168_v45 }
 0xc85   : > { %3410 = vrot.lane.b32.xlu1 %v3376_v19, %s6801_s4 }
 0xc89   : > { %3499 = vrot.lane.b32.xlu1 %v3467_v18, %s6803_s11  ;;  %v3146_v18 = vsel %vm907_vm7, %v3135_v33, %v6500_v41 }
 0xc8d   : > { %3503 = vrot.lane.b32.xlu1 %v3469_v38, %s6803_s11  ;;  %v3144_v38 = vsel %vm907_vm7, %v3131_v55, %v3133_v43  ;;  %s5027_s11 = scalar_lea.vmem %s4643_s3, 384 }
 0xc8e   : > { %v3167_v33 = vadd.f32 %v3144_v38, %v3074_v9  ;;  %p5028_p11 = scmp.ne.s32.totalorder %s4643_s3, %s5027_s11 }
 0xc90   : > { %v3245_v61 = vadd.f32 %v3214_v37, %v3167_v33  ;;  %p5029_p12 = pnand %p5028_p11, %p5294_p5 }
 0xc91   : > { %3592 = vrot.lane.b32.xlu1 %v3560_v29, %s6810_s0  ;;  %v3327_v29 = vsel %vm943_vm4, %v6504_v53, %v3316_v27 }
 0xc92   : > { %v3351_v43 = vadd.f32 %v3327_v29, %v3246_v22  ;;  %p5030_p13 = pneg %p5029_p12 }
 0xc95   : > { %3596 = vrot.lane.b32.xlu1 %v3562_v40, %s6810_s0  ;;  %v2879_v40 = vmul.f32 %v2866_v60, %v6439_v10  ;;  %s6842_s0 = sld [smem:[#allocation11_spill]] }
 0xc97   : > { %v2984_v4 = vadd.f32 %v2951_v49, %v2879_v40 }
 0xc99   : > { %v3077_v60 = vadd.f32 %v3044_v23, %v2984_v4 }
 0xc9b   : > { %v3170_v54 = vadd.f32 %v6500_v41, %v3077_v60  ;;  %s4869_s30 = smul.u32 384, %s6842_s0 }
 0xc9d   : > { %s4640_s8 = scalar_lea.hbm %s6847_s28, %s4869_s30 }
 0xcf9   : > { %v3896_v13 = vpop.xlane.xlu1 %3895 }
 0xcfa   : > { %v3897_v25 = vsub.f32 %v3892_v1, %v3896_v13  ;;  %v2983_v1 = vadd.f32 %v2960_v34, %v2878_v7  ;;  %v3328_v13 = vsel %vm943_vm4, %v3316_v27, %v6508_v58  ;;  %v3248_v7 = vadd.f32 %v6502_v46, %v3170_v54  ;;  %v3599_v46 = vpop.permute.xlu0 %3598 }
 0xcfc   : > { %v3898_v8 = vmul.f32 1.442695, %v3897_v25  ;;  %v3076_v50 = vadd.f32 %v3053_v15, %v2983_v1  ;;  %v3353_v1 = vadd.f32 %v3329_v11, %v3248_v7 }
 0xcfd   : > { %v6512_v2 = vpop.permute.xlu1 %3406 }
 0xcfe   : > { %5015 = vpow2.f32 %v3898_v8  ;;  %v3420_v51 = vsel %vm961_vm2, %v6512_v2, %v3409_v48  ;;  %v3169_v21 = vadd.f32 %v3146_v18, %v3076_v50 }
 0xcff   : > { %5017 = vrsqrt.f32 %v4078_v63  ;;  %v3444_v8 = vadd.f32 %v3420_v51, %v3351_v43 }
 0xd00   : > { %5019 = vrsqrt.f32 %v4091_v30  ;;  %v3247_v25 = vadd.f32 %v3224_v32, %v3169_v21 }
 0xd01   : > { %v3411_v36 = vpop.permute.xlu1 %3410 }
 0xd02   : > { %v3421_v0 = vsel %vm961_vm2, %v3409_v48, %v3411_v36  ;;  %v3352_v20 = vadd.f32 %v3328_v13, %v3247_v25  ;;  %v3350_v48 = vadd.f32 %v6504_v53, %v3245_v61  ;;  %v3422_v53 = vsel %vm961_vm2, %v3411_v36, %v6510_v28 }
 0xd03   : > { %v3446_v58 = vadd.f32 %v3422_v53, %v3353_v1 }
 0xd04   : > { %v3445_v23 = vadd.f32 %v3421_v0, %v3352_v20  ;;  %v3443_v41 = vadd.f32 %v6512_v2, %v3350_v48 }
 0xd05   : > { %v3500_v19 = vpop.permute.xlu1 %3499 }
 0xd06   : > { %v3513_v52 = vsel %vm977_vm3, %v3500_v19, %v3502_v39  ;;  %v3536_v9 = vadd.f32 %v3500_v19, %v3443_v41 }
 0xd07   : > { %v3537_v26 = vadd.f32 %v3513_v52, %v3444_v8 }
 0xd09   : > { %v3504_v55 = vpop.permute.xlu1 %3503 }
 0xd0a   : > { %v3514_v27 = vsel %vm977_vm3, %v3502_v39, %v3504_v55  ;;  %v3515_v24 = vsel %vm977_vm3, %v3504_v55, %v3506_v6 }
 0xd0b   : > { %v6538_v10 = vpop.eup %5015  ;;  %v3538_v31 = vadd.f32 %v3514_v27, %v3445_v23  ;;  %v3539_v36 = vadd.f32 %v3515_v24, %v3446_v58 }
 0xd0c   : > { %v3900_v49 = vsel %vm3893_vm15, %v6538_v10, 0.0  ;;  %v5018_v34 = vpop.eup %5017 }
 0xd0d   : > { %3901 = vadd.xlane.f32.xlu1 %v3900_v49  ;;  %v3593_v63 = vpop.permute.xlu1 %3592  ;;  %v4080_v15 = vmul.f32 %v5018_v34, %v6827_v14  ;;  %v4083_v42 = vmul.f32 %v5018_v34, %v6370_v47  ;;  %v5020_v2 = vpop.eup %5019  ;;  %v4082_v32 = vmul.f32 %v5018_v34, %v6356_v35 }
 0xd0e   : > { %v3606_v16 = vsel %vm993_vm1, %v3593_v63, %v3595_v17  ;;  %v6566_v45 = vadd.f32 %v3593_v63, %v3536_v9  ;;  %v4094_v14 = vmul.f32 %v5020_v2, %v6335_v44  ;;  %v4095_v30 = vmul.f32 %v5020_v2, %v6338_v56  ;;  %v4281_v56 = vld [vmem:[%s6839_s16 + $0x1] sm:$0x1] }
 0xd0f   : > { %v6546_v62 = vadd.f32 %v3606_v16, %v3537_v26  ;;  %v4101_v38 = vrot.slane %v4080_v15, 4  ;;  %v4104_v28 = vrot.slane %v4083_v42, 4  ;;  %v4093_v50 = vmul.f32 %v5020_v2, %v6284_v57  ;;  %4867 = vpush %v4281_v56 }
 0xd10   : > { %v4124_v29 = vrot.slane %v4094_v14, 4  ;;  %v4125_v40 = vrot.slane %v4095_v30, 4  ;;  %v4096_v6 = vmul.f32 %v5020_v2, %v6826_v3  ;;  %v4081_v44 = vmul.f32 %v5018_v34, %v6353_v12 }
 0xd11   : > { %3911 = vrot.lane.b32.xlu0 %v6546_v62, %s6811_s10  ;;  %v3597_v37 = vpop.permute.xlu1 %3596  ;;  %v4979_v19 = vpack.i.bf16 %v4104_v28, %v4101_v38  ;;  %v4123_v22 = vrot.slane %v4093_v50, 4  ;;  %v4103_v21 = vrot.slane %v4082_v32, 4  ;;  %v4298_v2 = vrot.slane %v6566_v45, 4  ;;  %v4475_v32 = vld [vmem:[%s6840_s9] sm:$0xf] }
 0xd12   : > { %v3607_v39 = vsel %vm993_vm1, %v3595_v17, %v3597_v37  ;;  %v3608_v18 = vsel %vm993_vm1, %v3597_v37, %v3599_v46  ;;  %v4126_v51 = vrot.slane %v4096_v6, 4  ;;  %v4102_v4 = vrot.slane %v4081_v44, 4 }
 0xd13   : > { %v6557_v59 = vadd.f32 %v3607_v39, %v3538_v31  ;;  %v6571_v47 = vadd.f32 %v3608_v18, %v3539_v36  ;;  %v4299_v46 = vrot.slane %v6546_v62, 4  ;;  %v4476_v56 = vunpack.c.l.bf16 %v4475_v32 }
 0xd14   : > { %v4974_v57 = vpack.i.bf16 %v4103_v21, %v4102_v4 }
 0xd15   : > { %3913 = vrot.lane.b32.xlu0 %v6557_v59, %s6811_s10  ;;  %v4301_v18 = vrot.slane %v6571_v47, 4  ;;  %v4300_v62 = vrot.slane %v6557_v59, 4 }
 0xd19   : > { %3909 = vrot.lane.b32.xlu0 %v6566_v45, %s6811_s10 }
 0xd1d   : > { %3915 = vrot.lane.b32.xlu0 %v6571_v47, %s6811_s10 }
 0xd1e   : > { %4980 = vrot.lane.b32.xlu1 %v4979_v19, %s6811_s10 }
 0xd21   : > { %4129 = vrot.lane.b32.xlu0 %v4124_v29, %s6811_s10 }
 0xd25   : > { %4131 = vrot.lane.b32.xlu0 %v4125_v40, %s6811_s10 }
 0xd29   : > { %4127 = vrot.lane.b32.xlu0 %v4123_v22, %s6811_s10 }
 0xd2d   : > { %4133 = vrot.lane.b32.xlu0 %v4126_v51, %s6811_s10 }
 0xd31   : > { %4975 = vrot.lane.b32.xlu0 %v4974_v57, %s6811_s10 }
 0xd40   : > { %s4868_s1 = spop %4867 }
 0xd41   : > { %v4284_v15 = vstv %s4868_s1  ;;  %s5031_s1 = sshll.u32 %s5110_s12, 4  ;;  %s5032_s1 = int_to_ptr.vmem [resolvable:$false] %s5031_s1 }
 0xd42   : > { %p5034_p0 = scmp.lt.s32.totalorder %s4643_s3, %s5032_s1 }
 0xd83   : > { %v3912_v3 = vpop.permute.xlu0 %3911 }
 0xd87   : > { %v3914_v33 = vpop.permute.xlu0 %3913 }
 0xd88   : > { %v3918_v12 = vsel %vm1078_vm10, %v3912_v3, %v3914_v33 }
 0xd89   : > { %4735 = vmatprep.subr.msk.mxu0 %vm997_vm0, %v3918_v12 }
 0xd8b   : > { %v3910_v35 = vpop.permute.xlu0 %3909 }
 0xd8c   : > { %v3917_v43 = vsel %vm1078_vm10, %v3910_v35, %v3912_v3 }
 0xd8d   : > { %4736 = vmatpush1.msk.msra.mxu0 %vm997_vm0, %v3917_v43 }
 0xd8f   : > { %v3916_v55 = vpop.permute.xlu0 %3915 }
 0xd90   : > { %v3919_v13 = vsel %vm1078_vm10, %v3914_v33, %v3916_v55 }
 0xd91   : > { %4844 = vmatpush3.msk.msra.mxu1 %vm997_vm0, %v3919_v13  ;;  %v6843_v13 = vld [vmem:[#allocation20_spill] sm:$0xff] }
 0xd92   : > { %4848 = vmatprep.subr.mxu1 %v6824_v5 }
 0xd93   : > { %v4130_v52 = vpop.permute.xlu0 %4129 }
 0xd96   : > { %v3902_v60 = vpop.xlane.xlu1 %3901 }
 0xd97   : > { %5021 = vrcp.f32 %v3902_v60  ;;  %v4132_v25 = vpop.permute.xlu0 %4131 }
 0xd98   : > { %v4136_v8 = vsel %vm1078_vm10, %v4130_v52, %v4132_v25 }
 0xd99   : > { %4171 = vmatprep.subr.mxu0 %v4136_v8  ;;  %v6845_v8 = vld [vmem:[#allocation21_spill] sm:$0xff] }
 0xd9a   : > { %v4981_v63 = vpop.permute.xlu1 %4980 }
 0xd9b   : > { %v4128_v0 = vpop.permute.xlu0 %4127  ;;  %v4983_v34 = vunpack.i.h.bf16 %v4981_v63  ;;  %v4982_v48 = vunpack.i.l.bf16 %v4981_v63 }
 0xd9c   : > { %v4135_v54 = vsel %vm1078_vm10, %v4128_v0, %v4130_v52 }
 0xd9f   : > { %v4134_v49 = vpop.permute.xlu0 %4133 }
 0xda0   : > { %v4137_v23 = vsel %vm1078_vm10, %v4132_v25, %v4134_v49 }
 0xda3   : > { %v4976_v61 = vpop.permute.xlu0 %4975 }
 0xda4   : > { %v5022_v20 = vpop.eup %5021  ;;  %v4978_v17 = vunpack.i.h.bf16 %v4976_v61  ;;  %v4977_v26 = vunpack.i.l.bf16 %v4976_v61  ;;  %v6846_v61 = vld [vmem:[#allocation22_spill] sm:$0xff] }
 0xda5   : > { %v3904_v27 = vmul.f32 %v5022_v20, %v6538_v10 }
 0xda6   : > { %v4114_v16 = vsel %vm1078_vm10, %v4977_v26, %v4978_v17  ;;  %v4113_v10 = vsel %vm1078_vm10, %v4982_v48, %v4977_v26  ;;  %v4115_v31 = vsel %vm1078_vm10, %v4978_v17, %v4983_v34 }
 0xda7   : > { %4737 = vmatmul.mubr.msk.f32.vlgmr.msra.gmra.mxu0 %vm1371_vm12, %v3904_v27  ;;  %4846 = vmatmul.mubr.msk.f32.vlgmr.msra.gmra.mxu1 %vm1371_vm12, %v3904_v27 }
 0xda8   : > { %4172 = vmatpush1.xpose.msra.mxu0 %v4135_v54  ;;  %4849 = vmatpush3.xpose.msra.mxu1 %v4137_v23 }
 0xda9   : > { %4205 = vmatprep.mubr.f32.mxu0 %v4114_v16  ;;  %4850 = vmatprep.mubr.msk.f32.mxu1 %vm5100_vm9, %v6824_v5 }
 0xdaa   : > { %4853 = vmatprep.subr.mxu1 %v6824_v5 }
 0xdab   : > { %4206 = vmatmul.mubr.f32.vlgmr.msra.gmra.mxu0 %v4113_v10  ;;  %4851 = vmatmul.mubr.f32.vlgmr.msra.gmra.mxu1 %v4115_v31 }
 0xdac   : > { %4386 = vmatprep.mubr.f32.mxu0 %v6824_v5  ;;  %4855 = vmatprep.mubr.msk.f32.mxu1 %vm5100_vm9, %v6824_v5 }
 0xe67   : > { %v6612_v37 = vpop.f32.mrf.mxu0  ;;  %v4066_v11 = vpop.f32.mrf.mxu1 }
 0xe69   : > { %v3997_v39 = vpop.f32.mrf.mxu0  ;;  %v4847_v7 = vpop.f32.mrf.mxu1 }
 0xe6b   : > { %v4207_v41 = vpop.f32.mrf.mxu0  ;;  %v4277_v53 = vpop.f32.mrf.mxu1 }
 0xe6c   : > { %v4278_v42 = vadd.f32 %v4277_v53, %v4207_v41 }
 0xe6d   : > { %v4209_v1 = vpop.f32.mrf.mxu0  ;;  %v4852_v9 = vpop.f32.mrf.mxu1 }
 0xe6e   : > { %v4286_v24 = vmul.f32 %v4284_v15, %v4278_v42 }
 0xe70   : > { %v4287_v58 = vsel %vm3893_vm15, %v4286_v24, -inf }
 0xe71   : > { %4288 = vmax.xlane.f32.xlu0 %v4287_v58 }
 0xe87   : > { %4304 = vrot.lane.b32.xlu0 %v4299_v46, %s6811_s10 }
 0xe8b   : > { %4302 = vrot.lane.b32.xlu0 %v4298_v2, %s6811_s10 }
 0xe8f   : > { %4308 = vrot.lane.b32.xlu0 %v4301_v18, %s6811_s10 }
 0xefa   : > { %v4289_v38 = vpop.xlane.xlu0 %4288 }
 0xefb   : > { %v4290_v28 = vsub.f32 %v4286_v24, %v4289_v38 }
 0xefd   : > { %v4291_v36 = vmul.f32 1.442695, %v4290_v28 }
 0xefe   : > { %v4305_v29 = vpop.permute.xlu0 %4304 }
 0xeff   : > { %5023 = vpow2.f32 %v4291_v36 }
 0xf02   : > { %v4303_v45 = vpop.permute.xlu0 %4302 }
 0xf03   : > { %v4310_v6 = vsel %vm1078_vm10, %v4303_v45, %v4305_v29 }
 0xf06   : > { %v4309_v40 = vpop.permute.xlu0 %4308 }
 0xf0c   : > { %v5024_v14 = vpop.eup %5023 }
 0xf0d   : > { %v4293_v19 = vsel %vm3893_vm15, %v5024_v14, 0.0 }
 0xf0e   : > { %4294 = vadd.xlane.f32.xlu1 %v4293_v19 }
 0xf1f   : > { %4306 = vrot.lane.b32.xlu1 %v4300_v62, %s6811_s10  ;;  %s5033_s10 = scalar_lea.vmem %s5032_s1, 768 }
 0xf20   : > { %p5035_p1 = scmp.lt.s32.totalorder %s5033_s10, %s5027_s11 }
 0xf22   : > { %p5036_p2 = por %p5035_p1, %p5034_p0 }
 0xf24   : > { %p5037_p3 = pnand %p5036_p2, %p5030_p13 }
 0xf97   : > { %v4295_v30 = vpop.xlane.xlu1 %4294 }
 0xf98   : > { %5025 = vrcp.f32 %v4295_v30 }
 0xf9b   : > { %v4307_v47 = vpop.permute.xlu1 %4306 }
 0xf9c   : > { %v4311_v50 = vsel %vm1078_vm10, %v4305_v29, %v4307_v47  ;;  %v4312_v22 = vsel %vm1078_vm10, %v4307_v47, %v4309_v40 }
 0xf9d   : > { %4740 = vmatprep.subr.msk.mxu0 %vm997_vm0, %v4311_v50  ;;  %4854 = vmatpush3.msk.msra.mxu1 %vm997_vm0, %v4312_v22 }
 0xf9e   : > { %4741 = vmatpush1.msk.msra.mxu0 %vm997_vm0, %v4310_v6  ;;  %4858 = vmatprep.subr.mxu1 %v6824_v5 }
 0xfa5   : > { %v5026_v59 = vpop.eup %5025 }
 0xfa6   : > { %v4297_v44 = vmul.f32 %v5026_v59, %v5024_v14 }
 0xfa8   : > { %4742 = vmatmul.mubr.msk.f32.vlgmr.msra.gmra.mxu0 %vm1371_vm12, %v4297_v44  ;;  %4856 = vmatmul.mubr.msk.f32.vlgmr.msra.gmra.mxu1 %vm1371_vm12, %v4297_v44 }
 0xfa9   : > { %4860 = vmatprep.mubr.msk.f32.mxu1 %vm5100_vm9, %v6824_v5  ;;  %4544 = vmatprep.mubr.f32.mxu0 %v6824_v5 }
0x1068   : > { %v4388_v51 = vpop.f32.mrf.mxu0  ;;  %v4459_v4 = vpop.f32.mrf.mxu1 }
0x1069   : > { %v4468_v21 = vrot.slane %v4459_v4, 4  ;;  %v4466_v57 = vrot.slane %v4388_v51, 4 }
0x106a   : > { %v4390_v3 = vpop.f32.mrf.mxu0  ;;  %v4857_v33 = vpop.f32.mrf.mxu1 }
0x106b   : > { %v4467_v12 = vrot.slane %v4390_v3, 4  ;;  %v4474_v35 = vsel %vm997_vm0, %v4066_v11, %v4468_v21  ;;  %v4472_v43 = vsel %vm997_vm0, %v6612_v37, %v4466_v57 }
0x106c   : > { %4859 = vmatpush3.msra.mxu1 %v4474_v35 }
0x106d   : > { %4861 = vmatmul.mubr.msk.f32.vlgmr.msra.gmra.mxu1 %vm2241_vm13, %v4476_v56  ;;  %v4473_v5 = vsel %vm997_vm0, %v3997_v39, %v4467_v12 }
0x106e   : > { %4510 = vmatprep.subr.mxu0 %v4473_v5 }
0x106f   : > { %4511 = vmatpush1.msra.mxu0 %v4472_v43 }
0x1070   : > { %4745 = vmatmul.mubr.msk.f32.vlgmr.msra.gmra.mxu0 %vm2241_vm13, %v4476_v56 }
0x112d   : > { %v4617_v55 = vpop.f32.mrf.mxu1 }
0x112e   : > { %v4623_v52 = vadd.f32 %v4617_v55, %v6843_v13 }
0x112f   : > { %v4862_v60 = vpop.f32.mrf.mxu1 }
0x1130   : > { %4626 = vst [vmem:[%s838_s5 + $0x10] sm:$0xff] %v4623_v52  ;;  %v4546_v25 = vpop.f32.mrf.mxu0 }
0x1131   : > { %v4621_v0 = vadd.f32 %v4546_v25, %v6845_v8 }
0x1132   : > { %v4548_v49 = vpop.f32.mrf.mxu0 }
0x1133   : > { %4624 = vst [vmem:[%s838_s5] sm:$0xff] %v4621_v0  ;;  %v4622_v20 = vadd.f32 %v4548_v49, %v6846_v61 }
0x1135   : > { %4625 = vst [vmem:[%s838_s5 + $0x8] sm:$0xff] %v4622_v20 }
0x1136   : > { %5040 = shalt.err (!%p5037_p3)
}
0x1137   : > { %s5041_s4 = scalar_lea.hbm %s4640_s8, 384  ;;  %s5045_s0 = scalar_lea.hbm %s6847_s28, 768 }
0x1138   : > { %p5042_p4 = scmp.ne.s32.totalorder %s4640_s8, %s5041_s4  ;;  %p5046_p9 = scmp.lt.s32.totalorder %s4640_s8, %s6847_s28 }
0x1139   : > { %p5047_p10 = scmp.lt.s32.totalorder %s5045_s0, %s5041_s4 }
0x113a   : > { %p5043_p7 = pnand %p5042_p4, %p5294_p5 }
0x113b   : > { %p5048_p11 = por %p5047_p10, %p5046_p9 }
0x113c   : > { %p5044_p8 = pneg %p5043_p7 }
0x113e   : > { %p5049_p12 = pnand %p5048_p11, %p5044_p8 }
0x1140   : > { %5052 = shalt.err (!%p5049_p12)
}
0x1141   : > { %4870 = dma.vmem_to_hbm [thread:$0]  (%p5294_p5), %s4643_s3, 384, %s4640_s8, %s4628_s29  }
0x1142 PF: > { %s6848_s30 = sld [smem:[#allocation10_spill]] }
0x1143   : > { %s6849_s5 = sld [smem:[#allocation7_spill]] }
0x1148   : > { %p4876_p13 = scmp.ge.s32.totalorder %s6848_s30, 2 }
0x1149   : > { %s4654_s7 = sand.u32 1, %s6849_s5  }
0x114a   : > { %p4873_p0 = pnand %p4876_p13, %p5298_p6  ;;  %s4655_s11 = scalar_lea.sflag [#allocation5], %s4654_s7 }
0x114c   : > { %p4874_p1 = pneg %p4873_p0 }
0x114e   : > { %5070 = dma.done.wait (%p4874_p1), %s4655_s11, 384  }
0x114f   : > { %5072 = vsyncadd (%p4874_p1), %s4655_s11, 4294966912  ;;  %s6851_s30 = sld [smem:[#allocation12_spill]] }
0x1150   : > { %s6852_s8 = sld [smem:[#allocation8_spill]] }
0x1151   : > { %s6853_s5 = sld [smem:[#allocation9_spill]] }
0x1152   : > { %s6854_s9 = sld [smem:[#allocation13_spill]] }
0x1155   : > { %p38_p2 = scmp.ge.s32.totalorder %s6851_s30, 4  }
0x1157   :  { %40 = sbr.rel (!%p38_p2) target bundleno = 22 (0x16), region = 167 }
0x115c   :  { %4660 = vsyncpa [#allocation5], 1 }
0x115d   :  { %4662 = vsyncpa [#allocation5 + $0x1], 1 }

</bundles_post_ra>
